<compile_context>
chip_gen: v7x
topology: tpu7x:2x2x1
jax: 0.10.0
libtpu: 0.0.40
codegen_flags: <defaults>
</compile_context>

<pallas_src>
import functools

import jax
import jax.numpy as jnp
from jax import lax
from jax.experimental import pallas as pl
from jax.experimental.pallas import tpu as pltpu


def _da_img_head_kernel(x_ref, w1_ref, b1_ref, w2_ref, b2_ref, o_ref, *, precision):
    # Per grid step:
    #   x_ref:  (1, C, t_hw)   one sample, all channels, lane-dense spatial tile
    #   w1_ref: (hidden, C)    conv1 weight (PyTorch (out, in, 1, 1) squeezed)
    #   b1_ref: (hidden, 1)    conv1 bias
    #   w2_ref: (hidden, 1)    conv2 weight, transposed for the VPU projection
    #   b2_ref: (1,)           conv2 bias, scalar in SMEM
    #   o_ref:  (1, 1, t_hw)   lane-dense output tile
    # GradientScalarLayer(-9.1) is identity in the forward pass.
    x = x_ref[0]                                                      # (C, t_hw)
    h = jnp.dot(w1_ref[...], x, precision=precision,
                preferred_element_type=jnp.float32)                   # (hidden, t_hw) f32
    h = jnp.maximum(h + b1_ref[...], 0.0)                             # bias + ReLU (f32)
    # conv2 is an M=1 matmul -> worst MXU shape (stationary push for a single
    # output row).  Do it on the VPU/XLU: elementwise multiply by w2 then
    # reduce over the hidden (sublane) axis.
    out = jnp.sum(h * w2_ref[...], axis=0, keepdims=True)             # (1, t_hw)
    o_ref[0] = (out + b2_ref[0]).astype(o_ref.dtype)


@functools.partial(jax.jit, static_argnames=("tile_hw",))
def da_img_head(x_nchw, w1, b1, w2, b2, *, tile_hw=2048):
    """x_nchw: (N, C, H, W).  Returns (N, 1, H, W) in x's dtype.

    w1: (hidden, C), b1: (hidden,), w2: (1, hidden), b2: (1,)  (squeezed
    PyTorch 1x1-conv parameters).
    """
    N, C, H, W = x_nchw.shape
    hidden = w1.shape[0]
    HW = H * W

    # ---- spatial tile selection (lane-dense) --------------------------------
    tile_hw = max(128, (int(tile_hw) // 128) * 128)       # multiple of 128
    t_hw = HW if HW <= tile_hw else tile_hw                # full dim or 128-multiple
    # Megacore guard (v7x: 2 TCs share the grid): make sure there are at least
    # a few parallel grid steps when the feature map is small and N is tiny.
    if t_hw >= 256 and N * pl.cdiv(HW, t_hw) < 4:
        want = max(2, pl.cdiv(4, N))
        new_t = pl.cdiv(pl.cdiv(HW, want), 128) * 128
        if 128 <= new_t < t_hw:
            t_hw = new_t
    n_tiles = pl.cdiv(HW, t_hw)                            # ragged last block OK

    # ---- dtype / precision handling -----------------------------------------
    if x_nchw.dtype == jnp.float32:
        w1c = w1.astype(jnp.float32)
        precision = lax.Precision.HIGHEST     # exact parity with PyTorch f32 conv
    else:
        # bf16 (or other low-precision) fast path: native MXU precision,
        # f32 accumulation via preferred_element_type.
        w1c = w1.astype(x_nchw.dtype)
        precision = lax.Precision.DEFAULT

    x3 = x_nchw.reshape(N, C, HW)             # free reshape, stays NCHW in HBM
    b1_2d = b1.reshape(hidden, 1).astype(jnp.float32)
    w2_col = w2.reshape(hidden, 1).astype(jnp.float32)
    b2_1d = b2.reshape(1).astype(jnp.float32)
    out_dtype = x_nchw.dtype

    # ---- VMEM budget sized to actual usage (not hard-coded to physical) -----
    x_item = jnp.dtype(x_nchw.dtype).itemsize
    w_item = jnp.dtype(w1c.dtype).itemsize
    vmem_bytes = int(
        2 * x_item * C * t_hw              # double-buffered x tile
        + 2 * w_item * hidden * C          # W1 (constant index map)
        + 4 * hidden * t_hw                # f32 intermediate h
        + 2 * 4 * (2 * hidden + t_hw)      # b1, w2, out tile (double-buffered)
        + (4 << 20)                        # slack for compiler scratch
    )
    vmem_bytes = min(vmem_bytes, 48 * 1024 * 1024)

    flops = 2 * N * HW * C * hidden + 2 * N * HW * hidden
    bytes_accessed = (x_item * N * C * HW + 4 * N * HW
                      + w_item * hidden * C + 4 * (2 * hidden + 1))

    out = pl.pallas_call(
        functools.partial(_da_img_head_kernel, precision=precision),
        out_shape=jax.ShapeDtypeStruct((N, 1, HW), out_dtype),
        grid_spec=pltpu.PrefetchScalarGridSpec(
            num_scalar_prefetch=0,
            grid=(N, n_tiles),
            in_specs=[
                pl.BlockSpec((1, C, t_hw), lambda n, j: (n, 0, j)),      # x tile
                pl.BlockSpec((hidden, C), lambda n, j: (0, 0)),          # W1
                pl.BlockSpec((hidden, 1), lambda n, j: (0, 0)),          # b1
                pl.BlockSpec((hidden, 1), lambda n, j: (0, 0)),          # W2 (col)
                pl.BlockSpec(memory_space=pltpu.MemorySpace.SMEM),       # b2 scalar
            ],
            out_specs=pl.BlockSpec((1, 1, t_hw), lambda n, j: (n, 0, j)),
        ),
        compiler_params=pltpu.CompilerParams(
            dimension_semantics=("parallel", "parallel"),
            vmem_limit_bytes=vmem_bytes,
        ),
        cost_estimate=pl.CostEstimate(
            flops=flops, transcendentals=0, bytes_accessed=bytes_accessed),
    )(x3, w1c, b1_2d, w2_col, b2_1d)

    return out.reshape(N, 1, H, W)


def init_params(key, in_channels, hidden=512):
    """Mirror the module init: normal(std=0.001) weights, zero bias.

    W1: (hidden, in_c), W2: (1, hidden)  (squeezed PyTorch conv weights).
    """
    k1, k2 = jax.random.split(key)
    w1 = 0.001 * jax.random.normal(k1, (hidden, in_channels), jnp.float32)
    b1 = jnp.zeros((hidden,), jnp.float32)
    w2 = 0.001 * jax.random.normal(k2, (1, hidden), jnp.float32)
    b2 = jnp.zeros((1,), jnp.float32)
    return w1, b1, w2, b2


def _reference(x, w1, b1, w2, b2):
    """Plain-JAX forward of the same module (f32, HIGHEST precision)."""
    N, C, H, W = x.shape
    xm = x.reshape(N, C, H * W).astype(jnp.float32)
    h = jnp.einsum("oc,nck->nok", w1, xm, precision=lax.Precision.HIGHEST)
    h = jnp.maximum(h + b1[None, :, None], 0.0)
    o = jnp.einsum("oh,nhk->nok", w2, h, precision=lax.Precision.HIGHEST)
    o = o + b2[None, :, None]
    return o.reshape(N, 1, H, W)


if __name__ == "__main__":
    key = jax.random.PRNGKey(0)
    kx, kx2, kp = jax.random.split(key, 3)

    # Small shapes consistent with the module (hidden is fixed at 512 by spec).
    N, C, H, W = 2, 4, 16, 16
    x = jax.random.normal(kx, (N, C, H, W), jnp.float32)
    w1, b1, w2, b2 = init_params(kp, in_channels=C)

    out = jax.block_until_ready(da_img_head(x, w1, b1, w2, b2))
    assert out.shape == (N, 1, H, W), out.shape
    ref = _reference(x, w1, b1, w2, b2)
    assert jnp.allclose(out, ref, atol=1e-6, rtol=1e-5), float(
        jnp.max(jnp.abs(out - ref)))

    # Ragged spatial extent (HW=156 not a multiple of t_hw=128) exercises the
    # masked boundary-block path that replaced the wrapper-side pad/slice.
    x2 = jax.random.normal(kx2, (1, C, 12, 13), jnp.float32)
    out2 = jax.block_until_ready(da_img_head(x2, w1, b1, w2, b2, tile_hw=128))
    assert out2.shape == (1, 1, 12, 13), out2.shape
    ref2 = _reference(x2, w1, b1, w2, b2)
    assert jnp.allclose(out2, ref2, atol=1e-6, rtol=1e-5), float(
        jnp.max(jnp.abs(out2 - ref2)))

    print("KERNEL_OK")
</pallas_src>

<mosaic_0001>
module attributes {stable_mosaic.version = 11 : i64} {
  func.func @_da_img_head_kernel(%arg0: i32, %arg1: i32, %arg2: memref<1x4x128xf32, #tpu.memory_space<vmem>>, %arg3: memref<512x4xf32, #tpu.memory_space<vmem>>, %arg4: memref<512x1xf32, #tpu.memory_space<vmem>>, %arg5: memref<512x1xf32, #tpu.memory_space<vmem>>, %arg6: memref<1xf32, #tpu.memory_space<smem>>, %arg7: memref<1x1x128xf32, #tpu.memory_space<vmem>>) attributes {dimension_semantics = [#tpu.dimension_semantics<parallel>, #tpu.dimension_semantics<parallel>], iteration_bounds = array<i64: 2, 2>, scalar_prefetch = 0 : i64, scratch_operands = 0 : i64, tpu.core_type = #tpu.core_type<tc>, window_params = [{transform_indices = @transform_0, window_bounds = array<i64: 1, 4, 128>}, {pipeline_mode = #tpu.pipeline_mode<synchronous>, transform_indices = @transform_1, window_bounds = array<i64: 512, 4>}, {pipeline_mode = #tpu.pipeline_mode<synchronous>, transform_indices = @transform_2, window_bounds = array<i64: 512, 1>}, {pipeline_mode = #tpu.pipeline_mode<synchronous>, transform_indices = @transform_3, window_bounds = array<i64: 512, 1>}, {transform_indices = @transform_4, window_bounds = array<i64: 1>}, {transform_indices = @transform_5, window_bounds = array<i64: 1, 1, 128>}]} {
    %c0 = arith.constant 0 : index
    %c0_0 = arith.constant 0 : index
    %c0_1 = arith.constant 0 : index
    %0 = vector.load %arg2[%c0, %c0_0, %c0_1] : memref<1x4x128xf32, #tpu.memory_space<vmem>>, vector<1x4x128xf32>
    %1 = vector.shape_cast %0 : vector<1x4x128xf32> to vector<4x128xf32>
    %c0_2 = arith.constant 0 : index
    %c0_3 = arith.constant 0 : index
    %2 = vector.load %arg3[%c0_2, %c0_3] : memref<512x4xf32, #tpu.memory_space<vmem>>, vector<512x4xf32>
    %cst = arith.constant dense<0.000000e+00> : vector<512x128xf32>
    %3 = tpu.matmul %2, %1, %cst {dimension_numbers = #tpu.dot_dimension_numbers<[1], [0], [0], [1], [0, 0, 1, 1], [], []>, precision = #tpu.contract_precision<fp32>} : vector<512x4xf32>, vector<4x128xf32>, vector<512x128xf32> -> vector<512x128xf32>
    %c0_4 = arith.constant 0 : index
    %c0_5 = arith.constant 0 : index
    %4 = vector.load %arg4[%c0_4, %c0_5] : memref<512x1xf32, #tpu.memory_space<vmem>>, vector<512x1xf32>
    %5 = vector.broadcast %4 : vector<512x1xf32> to vector<512x128xf32>
    %6 = arith.addf %3, %5 : vector<512x128xf32>
    %cst_6 = arith.constant 0.000000e+00 : f32
    %7 = vector.broadcast %cst_6 : f32 to vector<512x128xf32>
    %8 = arith.maximumf %6, %7 : vector<512x128xf32>
    %c0_7 = arith.constant 0 : index
    %c0_8 = arith.constant 0 : index
    %9 = vector.load %arg5[%c0_7, %c0_8] : memref<512x1xf32, #tpu.memory_space<vmem>>, vector<512x1xf32>
    %10 = vector.broadcast %9 : vector<512x1xf32> to vector<512x128xf32>
    %11 = arith.mulf %8, %10 : vector<512x128xf32>
    %cst_9 = arith.constant dense<0.000000e+00> : vector<128xf32>
    %12 = vector.multi_reduction <add>, %11, %cst_9 [0] : vector<512x128xf32> to vector<128xf32>
    %13 = vector.shape_cast %12 : vector<128xf32> to vector<1x128xf32>
    %c0_10 = arith.constant 0 : index
    %14 = memref.load %arg6[%c0_10] : memref<1xf32, #tpu.memory_space<smem>>
    %15 = vector.broadcast %14 : f32 to vector<1x128xf32>
    %16 = arith.addf %13, %15 : vector<1x128xf32>
    %c0_11 = arith.constant 0 : index
    %c0_12 = arith.constant 0 : index
    %c0_13 = arith.constant 0 : index
    %17 = vector.load %arg7[%c0_11, %c0_12, %c0_13] : memref<1x1x128xf32, #tpu.memory_space<vmem>>, vector<1x1x128xf32>
    %18 = vector.shape_cast %17 : vector<1x1x128xf32> to vector<1x128xf32>
    %19 = vector.shape_cast %16 : vector<1x128xf32> to vector<1x1x128xf32>
    tpu.vector_store %arg7[%c0_11, %c0_12, %c0_13], %19 {strides = array<i32>} : memref<1x1x128xf32, #tpu.memory_space<vmem>>, vector<1x1x128xf32>,
    return
  }
  func.func @transform_0(%arg0: i32, %arg1: i32) -> (i32, i32, i32) {
    %c0_i32 = arith.constant 0 : i32
    %c0_i32_0 = arith.constant 0 : i32
    return %arg0, %c0_i32, %arg1 : i32, i32, i32
  }
  func.func @transform_1(%arg0: i32, %arg1: i32) -> (i32, i32) {
    %c0_i32 = arith.constant 0 : i32
    %c0_i32_0 = arith.constant 0 : i32
    %c0_i32_1 = arith.constant 0 : i32
    return %c0_i32, %c0_i32_0 : i32, i32
  }
  func.func @transform_2(%arg0: i32, %arg1: i32) -> (i32, i32) {
    %c0_i32 = arith.constant 0 : i32
    %c0_i32_0 = arith.constant 0 : i32
    %c0_i32_1 = arith.constant 0 : i32
    return %c0_i32, %c0_i32_0 : i32, i32
  }
  func.func @transform_3(%arg0: i32, %arg1: i32) -> (i32, i32) {
    %c0_i32 = arith.constant 0 : i32
    %c0_i32_0 = arith.constant 0 : i32
    %c0_i32_1 = arith.constant 0 : i32
    return %c0_i32, %c0_i32_0 : i32, i32
  }
  func.func @transform_4(%arg0: i32, %arg1: i32) -> i32 {
    %c0_i32 = arith.constant 0 : i32
    %c0_i32_0 = arith.constant 0 : i32
    return %c0_i32 : i32
  }
  func.func @transform_5(%arg0: i32, %arg1: i32) -> (i32, i32, i32) {
    %c0_i32 = arith.constant 0 : i32
    %c0_i32_0 = arith.constant 0 : i32
    return %arg0, %c0_i32, %arg1 : i32, i32, i32
  }
}

</mosaic_0001>

<bundles_post_ra>
// kernel: da_img_head.1
= control target key start
LH: loop header
LB: loop body
LE: loop exit
PB: predicated region body
PF: predicated region fallthrough
CT: control target
= control target key end

     0   :  { %s6210_s20 = smov 0   ;;  %s6212_s21 = smov 0   ;;  %s8157_s0 = inlined_call_operand.vmem [shape: f32[2,4,256], index: 0, kind: input, shape index: {}]   ;;  %s8158_s1 = inlined_call_operand.vmem [shape: f32[512,4], index: 1, kind: input, shape index: {}]   ;;  %s8159_s2 = inlined_call_operand.vmem [shape: f32[512,1], index: 2, kind: input, shape index: {}]   ;;  %s8160_s3 = inlined_call_operand.vmem [shape: f32[512,1], index: 3, kind: input, shape index: {}]   ;;  %s8161_s4 = inlined_call_operand.<no memory space> [shape: f32[1], index: 4, kind: input, shape index: {}]   ;;  %s8162_s5 = inlined_call_operand.vmem [shape: f32[2,1,256], index: 5, kind: output, shape index: {}]  }
   0x1   :  { %10 = sst [smem:[#allocation2]] %s8161_s4  ;;  %s6214_s22 = smov 0  }
   0x2   :  { %s6216_s23 = smov 0   ;;  %s6218_s24 = smov 0  }
   0x3 LB: > { %s25_s4 = sadd.s32 1, %s6166_s22  ;;  %s28_s25 = sadd.s32 1, %s6170_s23  ;;  %s6174_s24 = sphi %s6218_s24, %s16_s24   ;;  %s6170_s23 = sphi %s6216_s23, %s8668_s23   ;;  %s6166_s22 = sphi %s6214_s22, %s8667_s22   ;;  %s6162_s21 = sphi %s6212_s21, %s8666_s21   ;;  %s6158_s20 = sphi %s6210_s20, %s8665_s20  }
   0x4   : > { %p26_p0 = scmp.ge.s32.totalorder %s25_s4, 2  ;;  %p4725_p1 = scmp.ge.s32.totalorder %s6174_s24, 1 }
   0x5   : > { %p207_p2 = scmp.lt.s32.totalorder %s6174_s24, 5 }
   0x6   : > { %s8670_s4 = smov (%p26_p0, %s25_s4), 0  ;;  %s8672_s25 = smov (!%p26_p0, %s28_s25), %s6170_s23 }
   0x7   : > { %p208_p3 = pnand %p4725_p1, %p207_p2  ;;  %p30_p4 = scmp.ge.s32.totalorder %s8672_s25, 2 }
   0x9   : > { %s8674_s25 = smov (%p30_p4, %s8672_s25), 0  ;;  %211 = sbr.rel (%p208_p3) target bundleno = 652 (0x28c), region = 40 }
  0x10   : > { %v322_v0 = vld [vmem:[%s8159_s2 + $0x10] sm:$0xff]  ;;  %v320_v1 = vld [vmem:[%s8159_s2] sm:$0xff]  ;;  %p240_p5 = scmp.lt.s32.totalorder %s6162_s21, 1  ;;  %p242_p6 = scmp.lt.s32.totalorder %s6158_s20, 1  ;;  %v6176_v2 = vmov 0   ;;  %vm704_vm0 = vcmask 31744  }
  0x11   : > { %6135 = vset.pattern.permute.xlu1 %v6176_v2  ;;  %6134 = vset.pattern.permute.xlu0 %v6176_v2  ;;  %v323_v3 = vld [vmem:[%s8159_s2 + $0x18] sm:$0xff]  ;;  %v256_v4 = vld [vmem:[%s8158_s1] sm:$0xff]  ;;  %v321_v5 = vld [vmem:[%s8159_s2 + $0x8] sm:$0xff]  ;;  %vm897_vm1 = vcmask 1043456   ;;  %s4637_s10 = sld [smem:[#allocation2]] }
  0x12   : > { %396 = vperm.xlu1 %6135, %v322_v0   ;;  %386 = vperm.xlu0 %6134, %v320_v1   ;;  %s8676_s21 = smov (!%p240_p5, %s6162_s21), 1  ;;  %s8678_s20 = smov (!%p242_p6, %s6158_s20), 1  ;;  %v706_v6 = vsel %vm704_vm0, %v256_v4, 0  ;;  %v257_v7 = vld [vmem:[%s8158_s1 + $0x8] sm:$0xff]  ;;  %v258_v8 = vld [vmem:[%s8158_s1 + $0x10] sm:$0xff]  ;;  %v259_v12 = vld [vmem:[%s8158_s1 + $0x18] sm:$0xff] }
  0x13   : > { %s4726_s15 = sshll.u32 %s8676_s21, 1  ;;  %v6266_v9 = vand.u32 4294901760, %v706_v6  ;;  %v709_v10 = vsel %vm704_vm0, %v257_v7, 0  ;;  %v712_v11 = vsel %vm704_vm0, %v258_v8, 0  ;;  %v715_v15 = vsel %vm704_vm0, %v259_v12, 0  ;;  %v260_v16 = vld [vmem:[%s8158_s1 + $0x20] sm:$0xff] }
  0x14   : > { %s6273_s18 = sadd.s32 %s4726_s15, %s8678_s20  ;;  %v6275_v13 = vand.u32 4294901760, %v709_v10  ;;  %v6277_v14 = vand.u32 4294901760, %v712_v11  ;;  %v6287_v18 = vand.u32 4294901760, %v715_v15  ;;  %v718_v19 = vsel %vm704_vm0, %v260_v16, 0  ;;  %v261_v20 = vld [vmem:[%s8158_s1 + $0x28] sm:$0xff]  ;;  %v262_v21 = vld [vmem:[%s8158_s1 + $0x30] sm:$0xff] }
  0x15   : > { %s4727_s26 = sshll.u32 %s6273_s18, 2  ;;  %v6285_v17 = vsub.f32 %v706_v6, %v6266_v9  ;;  %v325_v22 = vld [vmem:[%s8159_s2 + $0x28] sm:$0xff]  ;;  %v324_v23 = vld [vmem:[%s8159_s2 + $0x20] sm:$0xff]  ;;  %v6311_v26 = vand.u32 4294901760, %v718_v19  ;;  %v721_v27 = vsel %vm704_vm0, %v261_v20, 0  ;;  %v724_v32 = vsel %vm704_vm0, %v262_v21, 0  ;;  %s254_s13 = scalar_lea.vmem %s8162_s5, %s6273_s18 }
  0x16   : > { %401 = vperm.xlu1 %6135, %v323_v3   ;;  %391 = vperm.xlu0 %6134, %v321_v5   ;;  %s247_s11 = scalar_lea.vmem %s8157_s0, %s4727_s26  ;;  %v6306_v24 = vsub.f32 %v709_v10, %v6275_v13  ;;  %v6309_v25 = vsub.f32 %v712_v11, %v6277_v14  ;;  %v6316_v30 = vsub.f32 %v715_v15, %v6287_v18  ;;  %v6318_v31 = vand.u32 4294901760, %v721_v27  ;;  %v327_v41 = vld [vmem:[%s8159_s2 + $0x38] sm:$0xff]  ;;  %v326_v48 = vld [vmem:[%s8159_s2 + $0x30] sm:$0xff]  ;;  %v264_v52 = vld [vmem:[%s8158_s1 + $0x40] sm:$0xff] }
  0x17   : > { %8297 = vst [vmem:[#allocation3_spill] sm:$0xff] %v6285_v17  ;;  %v255_v28 = vld [vmem:[%s247_s11] sm:$0xf]  ;;  %v969_v29 = vand.u32 4294901760, %v6285_v17  ;;  %v6325_v36 = vsub.f32 %v718_v19, %v6311_v26  ;;  %v6340_v45 = vand.u32 4294901760, %v724_v32  ;;  %v263_v46 = vld [vmem:[%s8158_s1 + $0x38] sm:$0xff] }
  0x18   : > { %8298 = vst [vmem:[#allocation4_spill] sm:$0xff] %v6306_v24  ;;  %8299 = vst [vmem:[#allocation5_spill] sm:$0xff] %v6309_v25  ;;  %v899_v33 = vsel %vm897_vm1, %v255_v28, 0  ;;  %v979_v34 = vand.u32 4294901760, %v6306_v24  ;;  %v989_v35 = vand.u32 4294901760, %v6309_v25  ;;  %v999_v39 = vand.u32 4294901760, %v6316_v30 }
  0x19   : > { %8300 = vst [vmem:[#allocation6_spill] sm:$0xff] %v6316_v30  ;;  %8301 = vst [vmem:[#allocation7_spill] sm:$0xff] %v6325_v36  ;;  %v6327_v37 = vand.u32 4294901760, %v899_v33  ;;  %v970_v38 = vsub.f32 %v6285_v17, %v969_v29  ;;  %v6332_v40 = vsub.f32 %v721_v27, %v6318_v31  ;;  %5417 = vmatprep.mubr.f32.mxu0 %v969_v29  ;;  %v1009_v44 = vand.u32 4294901760, %v6325_v36  ;;  %v265_v57 = vld [vmem:[%s8158_s1 + $0x48] sm:$0xff]  ;;  %v266_v62 = vld [vmem:[%s8158_s1 + $0x50] sm:$0xff] }
  0x1a   : > { %411 = vperm.xlu1 %6135, %v325_v22   ;;  %406 = vperm.xlu0 %6134, %v324_v23   ;;  %v980_v42 = vsub.f32 %v6306_v24, %v979_v34  ;;  %v990_v43 = vsub.f32 %v6309_v25, %v989_v35  ;;  %v1000_v49 = vsub.f32 %v6316_v30, %v999_v39  ;;  %v727_v61 = vsel %vm704_vm0, %v263_v46, 0  ;;  %v329_v63 = vld [vmem:[%s8159_s2 + $0x48] sm:$0xff]  ;;  %v267_v4 = vld [vmem:[%s8158_s1 + $0x58] sm:$0xff]  ;;  %v328_v5 = vld [vmem:[%s8159_s2 + $0x40] sm:$0xff] }
  0x1b   : > { %8302 = vst [vmem:[#allocation8_spill] sm:$0xff] %v6332_v40  ;;  %5121 = vmatprep.subr.mxu1 %v6327_v37  ;;  %5415 = vmatprep.subr.mxu0 %v6327_v37  ;;  %v971_v47 = vand.u32 4294901760, %v970_v38  ;;  %v6354_v50 = vsub.f32 %v899_v33, %v6327_v37  ;;  %v1019_v51 = vand.u32 4294901760, %v6332_v40  ;;  %v1010_v55 = vsub.f32 %v6325_v36, %v1009_v44  ;;  %v268_v19 = vld [vmem:[%s8158_s1 + $0x60] sm:$0xff]  ;;  %v269_v20 = vld [vmem:[%s8158_s1 + $0x68] sm:$0xff]  ;;  %v331_v28 = vld [vmem:[%s8159_s2 + $0x58] sm:$0xff] }
  0x1c   : > { %5122 = vmatpush3.msra.mxu1 %v6327_v37  ;;  %5416 = vmatpush3.msra.mxu0 %v6327_v37  ;;  %v981_v53 = vand.u32 4294901760, %v980_v42  ;;  %v991_v54 = vand.u32 4294901760, %v990_v43  ;;  %v6366_v56 = vsub.f32 %v724_v32, %v6340_v45  ;;  %v1001_v58 = vand.u32 4294901760, %v1000_v49  ;;  %v330_v38 = vld [vmem:[%s8159_s2 + $0x50] sm:$0xff] }
  0x1d   : > { %5123 = vmatprep.mubr.f32.mxu1 %v971_v47  ;;  %v1610_v59 = vand.u32 4294901760, %v6354_v50  ;;  %v1020_v60 = vsub.f32 %v6332_v40, %v1019_v51  ;;  %v1011_v0 = vand.u32 4294901760, %v1010_v55  ;;  %v6383_v2 = vand.u32 4294901760, %v727_v61  ;;  %5418 = vmatmul.mubr.f32.vlgmr.msra.gmra.mrb[0].mxu0 %v979_v34 }
  0x1e   : > { %8303 = vst [vmem:[#allocation9_spill] sm:$0xff] %v6366_v56  ;;  %421 = vperm.xlu1 %6135, %v327_v41   ;;  %416 = vperm.xlu0 %6134, %v326_v48   ;;  %v1029_v1 = vand.u32 4294901760, %v6366_v56  ;;  %v730_v3 = vsel %vm704_vm0, %v264_v52, 0  ;;  %v733_v10 = vsel %vm704_vm0, %v265_v57, 0  ;;  %v736_v16 = vsel %vm704_vm0, %v266_v62, 0  ;;  %v271_v57 = vld [vmem:[%s8158_s1 + $0x78] sm:$0xff] }
  0x1f   : > { %5124 = vmatmul.mubr.f32.vlgmr.msra.gmra.mrb[0].mxu1 %v981_v53  ;;  %v1611_v6 = vsub.f32 %v6354_v50, %v1610_v59  ;;  %v1021_v7 = vand.u32 4294901760, %v1020_v60  ;;  %v6393_v8 = vand.u32 4294901760, %v730_v3  ;;  %5420 = vmatprep.mubr.f32.mxu0 %v989_v35  ;;  %v6400_v12 = vsub.f32 %v727_v61, %v6383_v2  ;;  %v270_v35 = vld [vmem:[%s8158_s1 + $0x70] sm:$0xff]  ;;  %v332_v62 = vld [vmem:[%s8159_s2 + $0x60] sm:$0xff] }
  0x20   : > { %5126 = vmatprep.mubr.f32.mxu1 %v991_v54  ;;  %5513 = vmatprep.subr.mxu0 %v1610_v59  ;;  %v1030_v11 = vsub.f32 %v6366_v56, %v1029_v1  ;;  %v6402_v15 = vand.u32 4294901760, %v733_v10  ;;  %v6414_v23 = vand.u32 4294901760, %v736_v16  ;;  %v739_v27 = vsel %vm704_vm0, %v267_v4, 0 }
  0x21   : > { %8304 = vst [vmem:[#allocation10_spill] sm:$0xff] %v6400_v12  ;;  %v1612_v21 = vand.u32 4294901760, %v1611_v6  ;;  %5514 = vmatpush3.msra.mxu0 %v1610_v59  ;;  %v6412_v22 = vsub.f32 %v730_v3, %v6393_v8  ;;  %v1039_v32 = vand.u32 4294901760, %v6400_v12  ;;  %v6424_v34 = vand.u32 4294901760, %v739_v27 }
  0x22   : > { %431 = vperm.xlu1 %6135, %v329_v63   ;;  %426 = vperm.xlu0 %6134, %v328_v5   ;;  %v1031_v29 = vand.u32 4294901760, %v1030_v11  ;;  %v6422_v33 = vsub.f32 %v733_v10, %v6402_v15  ;;  %v6436_v42 = vsub.f32 %v736_v16, %v6414_v23  ;;  %v742_v43 = vsel %vm704_vm0, %v268_v19, 0  ;;  %v272_v5 = vld [vmem:[%s8158_s1 + $0x80] sm:$0xff] }
  0x23   : > { %8305 = vst [vmem:[#allocation11_spill] sm:$0xff] %v6412_v22  ;;  %5127 = vmatmul.mubr.f32.gmra.mrb[2].mxu1 %v1001_v58  ;;  %5421 = vmatmul.mubr.f32.gmra.mrb[2].mxu0 %v999_v39  ;;  %v1049_v41 = vand.u32 4294901760, %v6412_v22  ;;  %v745_v46 = vsel %vm704_vm0, %v269_v20, 0  ;;  %v1040_v47 = vsub.f32 %v6400_v12, %v1039_v32  ;;  %v6443_v48 = vsub.f32 %v739_v27, %v6424_v34  ;;  %v333_v58 = vld [vmem:[%s8159_s2 + $0x68] sm:$0xff]  ;;  %v275_v20 = vld [vmem:[%s8158_s1 + $0x98] sm:$0xff] }
  0x24   : > { %8306 = vst [vmem:[#allocation12_spill] sm:$0xff] %v6422_v33  ;;  %5219 = vmatprep.subr.mxu1 %v1612_v21  ;;  %8307 = vst [vmem:[#allocation13_spill] sm:$0xff] %v6436_v42  ;;  %5129 = vmatprep.mubr.f32.mxu1 %v1011_v0  ;;  %v1059_v39 = vand.u32 4294901760, %v6422_v33  ;;  %v6445_v49 = vand.u32 4294901760, %v742_v43  ;;  %v1069_v53 = vand.u32 4294901760, %v6436_v42  ;;  %v6451_v54 = vand.u32 4294901760, %v745_v46 }
  0x25   : > { %5220 = vmatpush3.msra.mxu1 %v1612_v21  ;;  %8308 = vst [vmem:[#allocation14_spill] sm:$0xff] %v6443_v48  ;;  %5423 = vmatprep.mubr.f32.mxu0 %v1009_v44  ;;  %v1050_v52 = vsub.f32 %v6412_v22, %v1049_v41  ;;  %v748_v55 = vsel %vm704_vm0, %v270_v35, 0  ;;  %v1041_v44 = vand.u32 4294901760, %v1040_v47  ;;  %v1079_v60 = vand.u32 4294901760, %v6443_v48  ;;  %v335_v21 = vld [vmem:[%s8159_s2 + $0x78] sm:$0xff] }
  0x26   : > { %441 = vperm.xlu1 %6135, %v331_v28   ;;  %436 = vperm.xlu0 %6134, %v330_v38   ;;  %v1060_v59 = vsub.f32 %v6422_v33, %v1059_v39  ;;  %v6465_v61 = vsub.f32 %v742_v43, %v6445_v49  ;;  %v1070_v0 = vsub.f32 %v6436_v42, %v1069_v53  ;;  %v6478_v4 = vand.u32 4294901760, %v748_v55  ;;  %v334_v38 = vld [vmem:[%s8159_s2 + $0x70] sm:$0xff] }
  0x27   : > { %5130 = vmatmul.mubr.f32.gmra.mrb[4].mxu1 %v1021_v7  ;;  %5424 = vmatmul.mubr.f32.gmra.mrb[4].mxu0 %v1019_v51  ;;  %v1051_v63 = vand.u32 4294901760, %v1050_v52  ;;  %v6476_v3 = vsub.f32 %v745_v46, %v6451_v54  ;;  %v273_v51 = vld [vmem:[%s8158_s1 + $0x88] sm:$0xff]  ;;  %v1080_v6 = vsub.f32 %v6443_v48, %v1079_v60  ;;  %v751_v10 = vsel %vm704_vm0, %v271_v57, 0 }
  0x28   : > { %8309 = vst [vmem:[#allocation15_spill] sm:$0xff] %v6465_v61  ;;  %5132 = vmatprep.mubr.f32.mxu1 %v1031_v29  ;;  %5426 = vmatprep.mubr.f32.mxu0 %v1029_v1  ;;  %v1089_v7 = vand.u32 4294901760, %v6465_v61  ;;  %v6496_v16 = vsub.f32 %v748_v55, %v6478_v4  ;;  %v6498_v19 = vand.u32 4294901760, %v751_v10  ;;  %v274_v1 = vld [vmem:[%s8158_s1 + $0x90] sm:$0xff]  ;;  %v1061_v27 = vand.u32 4294901760, %v1060_v59 }
  0x29   : > { %8310 = vst [vmem:[#allocation16_spill] sm:$0xff] %v6476_v3  ;;  %5317 = vmatprep.subr.mxu1 %v6354_v50  ;;  %v8166_v11 = vand.u32 4294901760, %v6476_v3  ;;  %5611 = vmatprep.subr.mxu0 %v6327_v37  ;;  %v1071_v28 = vand.u32 4294901760, %v1070_v0  ;;  %v754_v29 = vsel %vm704_vm0, %v272_v5, 0  ;;  %v757_v35 = vsel %vm704_vm0, %v273_v51, 0  ;;  %v277_v0 = vld [vmem:[%s8158_s1 + $0xa8] sm:$0xff] }
  0x2a   : > { %451 = vperm.xlu1 %6135, %v333_v58   ;;  %8311 = vst [vmem:[#allocation17_spill] sm:$0xff] %v6496_v16  ;;  %446 = vperm.xlu0 %6134, %v332_v62   ;;  %v1090_v43 = vsub.f32 %v6465_v61, %v1089_v7  ;;  %v8163_v46 = vand.u32 4294901760, %v6496_v16  ;;  %v6520_v47 = vsub.f32 %v751_v10, %v6498_v19  ;;  %v6522_v52 = vand.u32 4294901760, %v754_v29  ;;  %v337_v5 = vld [vmem:[%s8159_s2 + $0x88] sm:$0xff]  ;;  %v340_v61 = vld [vmem:[%s8159_s2 + $0xa0] sm:$0xff] }
  0x2b   : > { %5133 = vmatmul.mubr.f32.gmra.mrb[6].mxu1 %v1041_v44  ;;  %5427 = vmatmul.mubr.f32.gmra.mrb[6].mxu0 %v1039_v32  ;;  %v276_v32 = vld [vmem:[%s8158_s1 + $0xa0] sm:$0xff]  ;;  %v1081_v55 = vand.u32 4294901760, %v1080_v6  ;;  %v6527_v57 = vand.u32 4294901760, %v757_v35  ;;  %v760_v58 = vsel %vm704_vm0, %v274_v1, 0  ;;  %v763_v44 = vsel %vm704_vm0, %v275_v20, 0 }
  0x2c   : > { %5135 = vmatprep.mubr.f32.mxu1 %v1051_v63  ;;  %8312 = vst [vmem:[#allocation18_spill] sm:$0xff] %v6520_v47  ;;  %5429 = vmatprep.mubr.f32.mxu0 %v1049_v41  ;;  %v1100_v59 = vsub.f32 %v6476_v3, %v8166_v11  ;;  %v1110_v62 = vsub.f32 %v6496_v16, %v8163_v46  ;;  %v8164_v63 = vand.u32 4294901760, %v6520_v47  ;;  %v6550_v6 = vand.u32 4294901760, %v760_v58  ;;  %v336_v20 = vld [vmem:[%s8159_s2 + $0x80] sm:$0xff]  ;;  %v279_v46 = vld [vmem:[%s8158_s1 + $0xb8] sm:$0xff] }
  0x2d   : > { %v6539_v41 = vsub.f32 %v754_v29, %v6522_v52  ;;  %v6548_v51 = vsub.f32 %v757_v35, %v6527_v57  ;;  %v6552_v10 = vand.u32 4294901760, %v763_v44  ;;  %v766_v1 = vsel %vm704_vm0, %v276_v32, 0  ;;  %v278_v35 = vld [vmem:[%s8158_s1 + $0xb0] sm:$0xff] }
  0x2e   : > { %461 = vperm.xlu1 %6135, %v335_v21   ;;  %456 = vperm.xlu0 %6134, %v334_v38   ;;  %v1091_v21 = vand.u32 4294901760, %v1090_v43  ;;  %v6561_v29 = vand.u32 4294901760, %v766_v1  ;;  %v6569_v38 = vsub.f32 %v760_v58, %v6550_v6  ;;  %v1101_v58 = vand.u32 4294901760, %v1100_v59 }
  0x2f   : > { %8313 = vst [vmem:[#allocation19_spill] sm:$0xff] %v6539_v41  ;;  %5136 = vmatmul.mubr.f32.gmra.mrb[8].mxu1 %v1061_v27  ;;  %8314 = vst [vmem:[#allocation20_spill] sm:$0xff] %v6548_v51  ;;  %5430 = vmatmul.mubr.f32.gmra.mrb[8].mxu0 %v1059_v39  ;;  %v8165_v27 = vand.u32 4294901760, %v6539_v41  ;;  %v769_v39 = vsel %vm704_vm0, %v277_v0, 0  ;;  %v6574_v43 = vsub.f32 %v763_v44, %v6552_v10  ;;  %v1111_v0 = vand.u32 4294901760, %v1110_v62 }
  0x30   : > { %5138 = vmatprep.mubr.f32.mxu1 %v1071_v28  ;;  %5432 = vmatprep.mubr.f32.mxu0 %v1069_v53  ;;  %8315 = vst [vmem:[#allocation21_spill] sm:$0xff] %v6569_v38  ;;  %v8167_v28 = vand.u32 4294901760, %v6548_v51  ;;  %v6576_v32 = vand.u32 4294901760, %v769_v39  ;;  %v339_v53 = vld [vmem:[%s8159_s2 + $0x98] sm:$0xff]  ;;  %v772_v44 = vsel %vm704_vm0, %v278_v35, 0  ;;  %v6598_v62 = vsub.f32 %v766_v1, %v6561_v29  ;;  %v281_v35 = vld [vmem:[%s8158_s1 + $0xc8] sm:$0xff] }
  0x31   : > { %8316 = vst [vmem:[#allocation22_spill] sm:$0xff] %v6574_v43  ;;  %v8323_v42 = vand.u32 4294901760, %v6574_v43 }
  0x32   : > { %471 = vperm.xlu1 %6135, %v337_v5   ;;  %466 = vperm.xlu0 %6134, %v336_v20   ;;  %v1120_v5 = vsub.f32 %v6520_v47, %v8164_v63  ;;  %v1130_v20 = vsub.f32 %v6539_v41, %v8165_v27  ;;  %8317 = vst [vmem:[#allocation23_spill] sm:$0xff] %v6598_v62  ;;  %v6600_v63 = vand.u32 4294901760, %v772_v44 }
  0x33   : > { %5139 = vmatmul.mubr.f32.gmra.mrb[10].mxu1 %v1081_v55  ;;  %5433 = vmatmul.mubr.f32.gmra.mrb[10].mxu0 %v1079_v60  ;;  %v338_v55 = vld [vmem:[%s8159_s2 + $0x90] sm:$0xff]  ;;  %v280_v60 = vld [vmem:[%s8158_s1 + $0xc0] sm:$0xff]  ;;  %v1140_v1 = vsub.f32 %v6548_v51, %v8167_v28  ;;  %v6616_v59 = vsub.f32 %v769_v39, %v6576_v32  ;;  %v8320_v39 = vand.u32 4294901760, %v6476_v3 }
  0x34   : > { %5141 = vmatprep.mubr.f32.mxu1 %v1091_v21  ;;  %5435 = vmatprep.mubr.f32.mxu0 %v1089_v7  ;;  %v775_v21 = vsel %vm704_vm0, %v279_v46, 0  ;;  %v282_v7 = vld [vmem:[%s8158_s1 + $0xd0] sm:$0xff]  ;;  %v341_v46 = vld [vmem:[%s8159_s2 + $0xa8] sm:$0xff]  ;;  %v6627_v28 = vsub.f32 %v772_v44, %v6600_v63  ;;  %v778_v27 = vsel %vm704_vm0, %v280_v60, 0  ;;  %v781_v44 = vsel %vm704_vm0, %v281_v35, 0  ;;  %v283_v60 = vld [vmem:[%s8158_s1 + $0xd8] sm:$0xff] }
  0x35   : > { %8318 = vst [vmem:[#allocation24_spill] sm:$0xff] %v6616_v59  ;;  %v6618_v11 = vand.u32 4294901760, %v775_v21  ;;  %v784_v3 = vsel %vm704_vm0, %v282_v7, 0  ;;  %v343_v7 = vld [vmem:[%s8159_s2 + $0xb8] sm:$0xff] }
  0x36   : > { %481 = vperm.xlu1 %6135, %v339_v53   ;;  %476 = vperm.xlu0 %6134, %v338_v55   ;;  %v1121_v53 = vand.u32 4294901760, %v1120_v5  ;;  %8319 = vst [vmem:[#allocation25_spill] sm:$0xff] %v6627_v28  ;;  %v1131_v55 = vand.u32 4294901760, %v1130_v20  ;;  %v1141_v20 = vand.u32 4294901760, %v1140_v1  ;;  %v8325_v5 = vand.u32 4294901760, %v6520_v47 }
  0x37   : > { %5142 = vmatmul.mubr.f32.gmra.mrb[12].mxu1 %v1101_v58  ;;  %5436 = vmatmul.mubr.f32.gmra.mrb[12].mxu0 %v8320_v39  ;;  %v8321_v58 = vand.u32 4294901760, %v6569_v38  ;;  %v8322_v39 = vand.u32 4294901760, %v6496_v16  ;;  %v6653_v35 = vsub.f32 %v775_v21, %v6618_v11  ;;  %v284_v16 = vld [vmem:[%s8158_s1 + $0xe0] sm:$0xff]  ;;  %v285_v21 = vld [vmem:[%s8158_s1 + $0xe8] sm:$0xff]  ;;  %v8326_v1 = vand.u32 4294901760, %v6598_v62 }
  0x38   : > { %5144 = vmatprep.mubr.f32.mxu1 %v1111_v0  ;;  %v6645_v0 = vand.u32 4294901760, %v778_v27  ;;  %v790_v12 = vsel %vm704_vm0, %v284_v16, 0  ;;  %v793_v56 = vsel %vm704_vm0, %v285_v21, 0  ;;  %v345_v16 = vld [vmem:[%s8159_s2 + $0xc8] sm:$0xff]  ;;  %v8333_v47 = vand.u32 4294901760, %v6548_v51 }
  0x39   : > { %v1150_v48 = vsub.f32 %v6569_v38, %v8321_v58  ;;  %5438 = vmatprep.mubr.f32.mxu0 %v8322_v39  ;;  %v1160_v58 = vsub.f32 %v6574_v43, %v8323_v42  ;;  %8324 = vst [vmem:[#allocation26_spill] sm:$0xff] %v6653_v35  ;;  %v6664_v42 = vand.u32 4294901760, %v784_v3  ;;  %v787_v39 = vsel %vm704_vm0, %v283_v60, 0 }
  0x3a   : > { %491 = vperm.xlu1 %6135, %v341_v46   ;;  %486 = vperm.xlu0 %6134, %v340_v61   ;;  %v6662_v46 = vand.u32 4294901760, %v781_v44  ;;  %v342_v61 = vld [vmem:[%s8159_s2 + $0xb0] sm:$0xff]  ;;  %v1170_v33 = vsub.f32 %v6598_v62, %v8326_v1  ;;  %v6679_v22 = vsub.f32 %v778_v27, %v6645_v0  ;;  %v8328_v60 = vand.u32 4294901760, %v6539_v41 }
  0x3b   : > { %5145 = vmatmul.mubr.f32.gmra.mrb[14].mxu1 %v1121_v53  ;;  %5439 = vmatmul.mubr.f32.gmra.mrb[14].mxu0 %v8325_v5  ;;  %v1151_v53 = vand.u32 4294901760, %v1150_v48  ;;  %v6688_v48 = vand.u32 4294901760, %v787_v39  ;;  %v286_v27 = vld [vmem:[%s8158_s1 + $0xf0] sm:$0xff]  ;;  %v8330_v1 = vand.u32 4294901760, %v6627_v28  ;;  %v6704_v21 = vsub.f32 %v784_v3, %v6664_v42 }
  0x3c   : > { %5147 = vmatprep.mubr.f32.mxu1 %v1131_v55  ;;  %8327 = vst [vmem:[#allocation27_spill] sm:$0xff] %v6679_v22  ;;  %5441 = vmatprep.mubr.f32.mxu0 %v8328_v60  ;;  %v8329_v55 = vand.u32 4294901760, %v6616_v59  ;;  %v6712_v41 = vand.u32 4294901760, %v790_v12  ;;  %v8334_v3 = vand.u32 4294901760, %v6569_v38  ;;  %v8346_v38 = vand.u32 4294901760, %v6616_v59 }
  0x3d   : > { %v1190_v60 = vsub.f32 %v6627_v28, %v8330_v1  ;;  %8332 = vst [vmem:[#allocation29_spill] sm:$0xff] %v6704_v21  ;;  %v6719_v1 = vand.u32 4294901760, %v793_v56  ;;  %v6729_v40 = vsub.f32 %v787_v39, %v6688_v48  ;;  %v346_v39 = vld [vmem:[%s8159_s2 + $0xd0] sm:$0xff] }
  0x3e   : > { %501 = vperm.xlu1 %6135, %v343_v7   ;;  %v1180_v5 = vsub.f32 %v6616_v59, %v8329_v55  ;;  %496 = vperm.xlu0 %6134, %v342_v61   ;;  %v1161_v7 = vand.u32 4294901760, %v1160_v58  ;;  %v6701_v55 = vsub.f32 %v781_v44, %v6662_v46  ;;  %v1171_v61 = vand.u32 4294901760, %v1170_v33  ;;  %v287_v44 = vld [vmem:[%s8158_s1 + $0xf8] sm:$0xff] }
  0x3f   : > { %5148 = vmatmul.mubr.f32.gmra.mrb[16].mxu1 %v1141_v20  ;;  %5442 = vmatmul.mubr.f32.gmra.mrb[16].mxu0 %v8333_v47  ;;  %v344_v20 = vld [vmem:[%s8159_s2 + $0xc0] sm:$0xff]  ;;  %v796_v47 = vsel %vm704_vm0, %v286_v27, 0  ;;  %v8335_v58 = vand.u32 4294901760, %v6653_v35  ;;  %8336 = vst [vmem:[#allocation30_spill] sm:$0xff] %v6729_v40  ;;  %v1191_v27 = vand.u32 4294901760, %v1190_v60  ;;  %v6746_v60 = vsub.f32 %v790_v12, %v6712_v41 }
  0x40   : > { %8331 = vst [vmem:[#allocation28_spill] sm:$0xff] %v6701_v55  ;;  %5150 = vmatprep.mubr.f32.mxu1 %v1151_v53  ;;  %5444 = vmatprep.mubr.f32.mxu0 %v8334_v3  ;;  %v288_v53 = vld [vmem:[%s8158_s1 + $0x100] sm:$0xff]  ;;  %v1181_v33 = vand.u32 4294901760, %v1180_v5  ;;  %v347_v3 = vld [vmem:[%s8159_s2 + $0xd8] sm:$0xff]  ;;  %v799_v5 = vsel %vm704_vm0, %v287_v44, 0  ;;  %v289_v44 = vld [vmem:[%s8158_s1 + $0x108] sm:$0xff] }
  0x41   : > { %v1200_v51 = vsub.f32 %v6653_v35, %v8335_v58  ;;  %8339 = vst [vmem:[#allocation31_spill] sm:$0xff] %v6746_v60  ;;  %v6748_v58 = vand.u32 4294901760, %v796_v47  ;;  %v802_v36 = vsel %vm704_vm0, %v288_v53, 0  ;;  %v349_v53 = vld [vmem:[%s8159_s2 + $0xe8] sm:$0xff]  ;;  %v8348_v59 = vand.u32 4294901760, %v6627_v28 }
  0x42   : > { %511 = vperm.xlu1 %6135, %v345_v16   ;;  %506 = vperm.xlu0 %6134, %v344_v20   ;;  %v8337_v16 = vand.u32 4294901760, %v6574_v43  ;;  %v6763_v43 = vand.u32 4294901760, %v799_v5 }
  0x43   : > { %5151 = vmatmul.mubr.f32.gmra.mrb[18].mxu1 %v1161_v7  ;;  %v8338_v7 = vand.u32 4294901760, %v6679_v22  ;;  %v1201_v12 = vand.u32 4294901760, %v1200_v51  ;;  %v805_v51 = vsel %vm704_vm0, %v289_v44, 0  ;;  %v291_v44 = vld [vmem:[%s8158_s1 + $0x118] sm:$0xff] }
  0x44   : > { %5445 = vmatmul.mubr.f32.gmra.mrb[18].mxu0 %v8337_v16  ;;  %5153 = vmatprep.mubr.f32.mxu1 %v1171_v61  ;;  %v8340_v61 = vand.u32 4294901760, %v6598_v62  ;;  %v6757_v16 = vsub.f32 %v793_v56, %v6719_v1  ;;  %8342 = vst [vmem:[#allocation33_spill] sm:$0xff] %v6763_v43  ;;  %v8344_v62 = vand.u32 4294901760, %v6704_v21  ;;  %v6802_v25 = vand.u32 4294901760, %v805_v51 }
  0x45   : > { %v1210_v20 = vsub.f32 %v6679_v22, %v8338_v7  ;;  %v290_v7 = vld [vmem:[%s8158_s1 + $0x110] sm:$0xff]  ;;  %v811_v24 = vsel %vm704_vm0, %v291_v44, 0  ;;  %v293_v44 = vld [vmem:[%s8158_s1 + $0x128] sm:$0xff] }
  0x46   : > { %5447 = vmatprep.mubr.f32.mxu0 %v8340_v61  ;;  %8341 = vst [vmem:[#allocation32_spill] sm:$0xff] %v6757_v16  ;;  %521 = vperm.xlu1 %6135, %v347_v3   ;;  %v8343_v61 = vand.u32 4294901760, %v6701_v55  ;;  %v1230_v30 = vsub.f32 %v6704_v21, %v8344_v62  ;;  %v6774_v3 = vand.u32 4294901760, %v802_v36  ;;  %v808_v62 = vsel %vm704_vm0, %v290_v7, 0  ;;  %8351 = vst [vmem:[#allocation37_spill] sm:$0xff] %v6802_v25 }
  0x47   : > { %516 = vperm.xlu0 %6134, %v346_v39   ;;  %5154 = vmatmul.mubr.f32.gmra.mrb[20].mxu1 %v1181_v33  ;;  %v348_v33 = vld [vmem:[%s8159_s2 + $0xe0] sm:$0xff]  ;;  %v1211_v39 = vand.u32 4294901760, %v1210_v20  ;;  %v8349_v20 = vand.u32 4294901760, %v6729_v40  ;;  %v6800_v7 = vsub.f32 %v799_v5, %v6763_v43  ;;  %v350_v5 = vld [vmem:[%s8159_s2 + $0xf0] sm:$0xff]  ;;  %v361_v43 = vld [vmem:[%s8159_s2 + $0x148] sm:$0xff] }
  0x48   : > { %v1220_v56 = vsub.f32 %v6701_v55, %v8343_v61  ;;  %8345 = vst [vmem:[#allocation34_spill] sm:$0xff] %v6774_v3  ;;  %5448 = vmatmul.mubr.f32.gmra.mrb[20].mxu0 %v8346_v38  ;;  %5156 = vmatprep.mubr.f32.mxu1 %v1191_v27  ;;  %v6784_v61 = vsub.f32 %v796_v47, %v6748_v58  ;;  %v292_v27 = vld [vmem:[%s8158_s1 + $0x120] sm:$0xff] }
  0x49   : > { %5450 = vmatprep.mubr.f32.mxu0 %v8348_v59  ;;  %v1240_v47 = vsub.f32 %v6729_v40, %v8349_v20  ;;  %8350 = vst [vmem:[#allocation36_spill] sm:$0xff] %v6800_v7  ;;  %v351_v59 = vld [vmem:[%s8159_s2 + $0xf8] sm:$0xff]  ;;  %v6808_v28 = vsub.f32 %v802_v36, %v6774_v3  ;;  %v8354_v20 = vand.u32 4294901760, %v6653_v35  ;;  %v814_v17 = vsel %vm704_vm0, %v292_v27, 0  ;;  %v294_v27 = vld [vmem:[%s8158_s1 + $0x130] sm:$0xff] }
  0x4a   : > { %8347 = vst [vmem:[#allocation35_spill] sm:$0xff] %v6784_v61  ;;  %531 = vperm.xlu1 %6135, %v349_v53   ;;  %v1221_v38 = vand.u32 4294901760, %v1220_v56  ;;  %v6810_v53 = vand.u32 4294901760, %v808_v62  ;;  %v6835_v36 = vand.u32 4294901760, %v811_v24  ;;  %v8362_v3 = vand.u32 4294901760, %v6701_v55 }
  0x4b   : > { %526 = vperm.xlu0 %6134, %v348_v33   ;;  %5157 = vmatmul.mubr.f32.gmra.mrb[22].mxu1 %v1201_v12  ;;  %8352 = vst [vmem:[#allocation38_spill] sm:$0xff] %v6808_v28  ;;  %v1231_v12 = vand.u32 4294901760, %v1230_v30  ;;  %v8355_v33 = vand.u32 4294901760, %v6746_v60  ;;  %v1241_v30 = vand.u32 4294901760, %v1240_v47 }
  0x4c   : > { %8353 = vst [vmem:[#allocation39_spill] sm:$0xff] %v6810_v53  ;;  %5451 = vmatmul.mubr.f32.gmra.mrb[22].mxu0 %v8354_v20  ;;  %5159 = vmatprep.mubr.f32.mxu1 %v1211_v39  ;;  %v8356_v20 = vand.u32 4294901760, %v6679_v22  ;;  %v8357_v39 = vand.u32 4294901760, %v6757_v16  ;;  %8359 = vst [vmem:[#allocation41_spill] sm:$0xff] %v6835_v36  ;;  %v6845_v47 = vsub.f32 %v808_v62, %v6810_v53  ;;  %v8363_v22 = vand.u32 4294901760, %v6784_v61  ;;  %v295_v62 = vld [vmem:[%s8158_s1 + $0x138] sm:$0xff] }
  0x4d   : > { %v1250_v56 = vsub.f32 %v6746_v60, %v8355_v33  ;;  %v6833_v33 = vsub.f32 %v805_v51, %v6802_v25  ;;  %v817_v51 = vsel %vm704_vm0, %v293_v44, 0  ;;  %v8364_v53 = vand.u32 4294901760, %v6704_v21  ;;  %v296_v21 = vld [vmem:[%s8158_s1 + $0x140] sm:$0xff] }
  0x4e   : > { %5453 = vmatprep.mubr.f32.mxu0 %v8356_v20  ;;  %v1260_v35 = vsub.f32 %v6757_v16, %v8357_v39  ;;  %541 = vperm.xlu1 %6135, %v351_v59   ;;  %v353_v20 = vld [vmem:[%s8159_s2 + $0x108] sm:$0xff]  ;;  %8360 = vst [vmem:[#allocation42_spill] sm:$0xff] %v6845_v47  ;;  %v6847_v39 = vand.u32 4294901760, %v814_v17  ;;  %v1270_v59 = vsub.f32 %v6784_v61, %v8363_v22  ;;  %v6871_v22 = vand.u32 4294901760, %v817_v51 }
  0x4f   : > { %8358 = vst [vmem:[#allocation40_spill] sm:$0xff] %v6833_v33  ;;  %536 = vperm.xlu0 %6134, %v350_v5   ;;  %5160 = vmatmul.mubr.f32.gmra.mrb[24].mxu1 %v1221_v38  ;;  %v352_v38 = vld [vmem:[%s8159_s2 + $0x100] sm:$0xff]  ;;  %v1251_v5 = vand.u32 4294901760, %v1250_v56  ;;  %v6869_v25 = vsub.f32 %v811_v24, %v6835_v36  ;;  %v8370_v56 = vand.u32 4294901760, %v6729_v40 }
  0x50   : > { %8361 = vst [vmem:[#allocation43_spill] sm:$0xff] %v6847_v39  ;;  %5454 = vmatmul.mubr.f32.gmra.mrb[24].mxu0 %v8362_v3  ;;  %5162 = vmatprep.mubr.f32.mxu1 %v1231_v12  ;;  %v1261_v44 = vand.u32 4294901760, %v1260_v35  ;;  %v820_v3 = vsel %vm704_vm0, %v294_v27, 0  ;;  %v8365_v12 = vand.u32 4294901760, %v6800_v7  ;;  %8367 = vst [vmem:[#allocation45_spill] sm:$0xff] %v6871_v22  ;;  %v355_v35 = vld [vmem:[%s8159_s2 + $0x118] sm:$0xff]  ;;  %v6884_v24 = vsub.f32 %v814_v17, %v6847_v39 }
  0x51   : > { %5456 = vmatprep.mubr.f32.mxu0 %v8364_v53  ;;  %8366 = vst [vmem:[#allocation44_spill] sm:$0xff] %v6869_v25  ;;  %v8368_v53 = vand.u32 4294901760, %v6808_v28  ;;  %v6892_v36 = vand.u32 4294901760, %v820_v3  ;;  %v297_v17 = vld [vmem:[%s8158_s1 + $0x148] sm:$0xff] }
  0x52   : > { %551 = vperm.xlu1 %6135, %v353_v20   ;;  %v1280_v55 = vsub.f32 %v6800_v7, %v8365_v12  ;;  %8369 = vst [vmem:[#allocation46_spill] sm:$0xff] %v6884_v24  ;;  %v823_v12 = vsel %vm704_vm0, %v295_v62, 0  ;;  %v826_v20 = vsel %vm704_vm0, %v296_v21, 0  ;;  %v357_v21 = vld [vmem:[%s8159_s2 + $0x128] sm:$0xff] }
  0x53   : > { %546 = vperm.xlu0 %6134, %v352_v38   ;;  %5163 = vmatmul.mubr.f32.gmra.mrb[26].mxu1 %v1241_v30  ;;  %v1290_v27 = vsub.f32 %v6808_v28, %v8368_v53  ;;  %v354_v30 = vld [vmem:[%s8159_s2 + $0x110] sm:$0xff]  ;;  %v1271_v38 = vand.u32 4294901760, %v1270_v59  ;;  %8371 = vst [vmem:[#allocation47_spill] sm:$0xff] %v6892_v36  ;;  %v8372_v53 = vand.u32 4294901760, %v6746_v60  ;;  %v6905_v59 = vsub.f32 %v817_v51, %v6871_v22 }
  0x54   : > { %5457 = vmatmul.mubr.f32.gmra.mrb[26].mxu0 %v8370_v56  ;;  %5165 = vmatprep.mubr.f32.mxu1 %v1251_v5  ;;  %v298_v5 = vld [vmem:[%s8158_s1 + $0x150] sm:$0xff]  ;;  %v1281_v62 = vand.u32 4294901760, %v1280_v55  ;;  %v6907_v40 = vand.u32 4294901760, %v823_v12  ;;  %v8375_v60 = vand.u32 4294901760, %v6833_v33  ;;  %v8376_v55 = vand.u32 4294901760, %v6845_v47 }
  0x55   : > { %5459 = vmatprep.mubr.f32.mxu0 %v8372_v53  ;;  %8373 = vst [vmem:[#allocation48_spill] sm:$0xff] %v6905_v59  ;;  %v1291_v53 = vand.u32 4294901760, %v1290_v27  ;;  %v8377_v56 = vand.u32 4294901760, %v6757_v16  ;;  %v6925_v27 = vsub.f32 %v820_v3, %v6892_v36  ;;  %v832_v22 = vsel %vm704_vm0, %v298_v5, 0  ;;  %v359_v5 = vld [vmem:[%s8159_s2 + $0x138] sm:$0xff] }
  0x56   : > { %561 = vperm.xlu1 %6135, %v355_v35   ;;  %8374 = vst [vmem:[#allocation49_spill] sm:$0xff] %v6907_v40  ;;  %v1300_v39 = vsub.f32 %v6833_v33, %v8375_v60  ;;  %v1310_v35 = vsub.f32 %v6845_v47, %v8376_v55  ;;  %v829_v60 = vsel %vm704_vm0, %v297_v17, 0  ;;  %v299_v55 = vld [vmem:[%s8158_s1 + $0x158] sm:$0xff]  ;;  %v6941_v16 = vsub.f32 %v823_v12, %v6907_v40  ;;  %v300_v17 = vld [vmem:[%s8158_s1 + $0x160] sm:$0xff] }
  0x57   : > { %556 = vperm.xlu0 %6134, %v354_v30   ;;  %5166 = vmatmul.mubr.f32.gmra.mrb[28].mxu1 %v1261_v44  ;;  %v356_v44 = vld [vmem:[%s8159_s2 + $0x120] sm:$0xff]  ;;  %8378 = vst [vmem:[#allocation50_spill] sm:$0xff] %v6925_v27  ;;  %v6927_v30 = vand.u32 4294901760, %v826_v20  ;;  %v8385_v12 = vand.u32 4294901760, %v6800_v7  ;;  %v8386_v3 = vand.u32 4294901760, %v6884_v24  ;;  %v8394_v7 = vand.u32 4294901760, %v6925_v27 }
  0x58   : > { %5460 = vmatmul.mubr.f32.gmra.mrb[28].mxu0 %v8377_v56  ;;  %5168 = vmatprep.mubr.f32.mxu1 %v1271_v38  ;;  %v8380_v56 = vand.u32 4294901760, %v6784_v61  ;;  %v8381_v38 = vand.u32 4294901760, %v6869_v25  ;;  %8382 = vst [vmem:[#allocation52_spill] sm:$0xff] %v6941_v16  ;;  %v6951_v61 = vand.u32 4294901760, %v832_v22 }
  0x59   : > { %8379 = vst [vmem:[#allocation51_spill] sm:$0xff] %v6927_v30  ;;  %v1330_v40 = vsub.f32 %v6884_v24, %v8386_v3  ;;  %v6964_v36 = vsub.f32 %v826_v20, %v6927_v30 }
  0x5a   : > { %5462 = vmatprep.mubr.f32.mxu0 %v8380_v56  ;;  %571 = vperm.xlu1 %6135, %v357_v21   ;;  %v1320_v51 = vsub.f32 %v6869_v25, %v8381_v38  ;;  %v1301_v21 = vand.u32 4294901760, %v1300_v39  ;;  %v6949_v56 = vand.u32 4294901760, %v829_v60  ;;  %8384 = vst [vmem:[#allocation54_spill] sm:$0xff] %v6951_v61  ;;  %v835_v38 = vsel %vm704_vm0, %v299_v55, 0  ;;  %v301_v55 = vld [vmem:[%s8158_s1 + $0x168] sm:$0xff] }
  0x5b   : > { %566 = vperm.xlu0 %6134, %v356_v44   ;;  %5169 = vmatmul.mubr.f32.gmra.mrb[30].mxu1 %v1281_v62  ;;  %v358_v44 = vld [vmem:[%s8159_s2 + $0x130] sm:$0xff]  ;;  %v1311_v62 = vand.u32 4294901760, %v1310_v35  ;;  %8387 = vst [vmem:[#allocation55_spill] sm:$0xff] %v6964_v36  ;;  %v838_v35 = vsel %vm704_vm0, %v300_v17, 0  ;;  %v8389_v39 = vand.u32 4294901760, %v6905_v59  ;;  %v6979_v30 = vand.u32 4294901760, %v835_v38 }
  0x5c   : > { %8383 = vst [vmem:[#allocation53_spill] sm:$0xff] %v6949_v56  ;;  %5463 = vmatmul.mubr.f32.gmra.mrb[30].mxu0 %v8385_v12  ;;  %5171 = vmatprep.mubr.f32.mxu1 %v1291_v53  ;;  %v302_v53 = vld [vmem:[%s8158_s1 + $0x170] sm:$0xff]  ;;  %v8388_v12 = vand.u32 4294901760, %v6808_v28  ;;  %v1321_v3 = vand.u32 4294901760, %v1320_v51  ;;  %v6988_v17 = vsub.f32 %v832_v22, %v6951_v61  ;;  %v841_v51 = vsel %vm704_vm0, %v301_v55, 0  ;;  %v303_v55 = vld [vmem:[%s8158_s1 + $0x178] sm:$0xff] }
  0x5d   : > { %v1340_v20 = vsub.f32 %v6905_v59, %v8389_v39  ;;  %8390 = vst [vmem:[#allocation56_spill] sm:$0xff] %v6979_v30  ;;  %v8393_v39 = vand.u32 4294901760, %v6833_v33  ;;  %v7001_v28 = vand.u32 4294901760, %v838_v35  ;;  %v363_v22 = vld [vmem:[%s8159_s2 + $0x158] sm:$0xff]  ;;  %v8402_v61 = vand.u32 4294901760, %v6964_v36 }
  0x5e   : > { %5465 = vmatprep.mubr.f32.mxu0 %v8388_v12  ;;  %581 = vperm.xlu1 %6135, %v359_v5   ;;  %v6985_v12 = vsub.f32 %v829_v60, %v6949_v56  ;;  %8392 = vst [vmem:[#allocation58_spill] sm:$0xff] %v6988_v17  ;;  %v844_v5 = vsel %vm704_vm0, %v302_v53, 0  ;;  %v1350_v60 = vsub.f32 %v6925_v27, %v8394_v7  ;;  %v8396_v53 = vand.u32 4294901760, %v6845_v47  ;;  %v304_v7 = vld [vmem:[%s8158_s1 + $0x180] sm:$0xff] }
  0x5f   : > { %576 = vperm.xlu0 %6134, %v358_v44   ;;  %5172 = vmatmul.mubr.f32.gmra.mrb[32].mxu1 %v1301_v21  ;;  %v360_v21 = vld [vmem:[%s8159_s2 + $0x140] sm:$0xff]  ;;  %v1331_v44 = vand.u32 4294901760, %v1330_v40  ;;  %8395 = vst [vmem:[#allocation59_spill] sm:$0xff] %v7001_v28  ;;  %v7011_v40 = vand.u32 4294901760, %v841_v51  ;;  %v7013_v33 = vand.u32 4294901760, %v844_v5  ;;  %v847_v47 = vsel %vm704_vm0, %v303_v55, 0 }
  0x60   : > { %8391 = vst [vmem:[#allocation57_spill] sm:$0xff] %v6985_v12  ;;  %5466 = vmatmul.mubr.f32.gmra.mrb[32].mxu0 %v8393_v39  ;;  %5174 = vmatprep.mubr.f32.mxu1 %v1311_v62  ;;  %v1341_v62 = vand.u32 4294901760, %v1340_v20  ;;  %v7009_v39 = vsub.f32 %v835_v38, %v6979_v30  ;;  %v8233_v38 = vand.u32 4294901760, %v6985_v12  ;;  %v8401_v30 = vand.u32 4294901760, %v6869_v25 }
  0x61   : > { %5468 = vmatprep.mubr.f32.mxu0 %v8396_v53  ;;  %8398 = vst [vmem:[#allocation61_spill] sm:$0xff] %v7011_v40  ;;  %8399 = vst [vmem:[#allocation62_spill] sm:$0xff] %v7013_v33  ;;  %v1370_v56 = vsub.f32 %v6964_v36, %v8402_v61  ;;  %v8404_v53 = vand.u32 4294901760, %v6884_v24  ;;  %v850_v55 = vsel %vm704_vm0, %v304_v7, 0  ;;  %v7049_v61 = vsub.f32 %v844_v5, %v7013_v33 }
  0x62   : > { %591 = vperm.xlu1 %6135, %v361_v43   ;;  %8397 = vst [vmem:[#allocation60_spill] sm:$0xff] %v7009_v39  ;;  %v8400_v43 = vand.u32 4294901760, %v6941_v16  ;;  %v8408_v5 = vand.u32 4294901760, %v6988_v17  ;;  %v8409_v24 = vand.u32 4294901760, %v6905_v59  ;;  %v8415_v25 = vand.u32 4294901760, %v6941_v16 }
  0x63   : > { %586 = vperm.xlu0 %6134, %v360_v21   ;;  %5175 = vmatmul.mubr.f32.gmra.mrb[34].mxu1 %v1321_v3  ;;  %v362_v3 = vld [vmem:[%s8159_s2 + $0x150] sm:$0xff]  ;;  %v1351_v21 = vand.u32 4294901760, %v1350_v60  ;;  %v7046_v60 = vsub.f32 %v841_v51, %v7011_v40  ;;  %8406 = vst [vmem:[#allocation65_spill] sm:$0xff] %v7049_v61  ;;  %v1380_v51 = vsub.f32 %v6985_v12, %v8233_v38  ;;  %v8411_v38 = vand.u32 4294901760, %v6925_v27 }
  0x64   : > { %v1360_v20 = vsub.f32 %v6941_v16, %v8400_v43  ;;  %5469 = vmatmul.mubr.f32.gmra.mrb[34].mxu0 %v8401_v30  ;;  %5177 = vmatprep.mubr.f32.mxu1 %v1331_v44  ;;  %v7036_v43 = vsub.f32 %v838_v35, %v7001_v28  ;;  %v305_v30 = vld [vmem:[%s8158_s1 + $0x188] sm:$0xff]  ;;  %v7051_v35 = vand.u32 4294901760, %v847_v47  ;;  %v1390_v44 = vsub.f32 %v6988_v17, %v8408_v5 }
  0x65   : > { %5471 = vmatprep.mubr.f32.mxu0 %v8404_v53  ;;  %8405 = vst [vmem:[#allocation64_spill] sm:$0xff] %v7046_v60  ;;  %v306_v53 = vld [vmem:[%s8158_s1 + $0x190] sm:$0xff]  ;;  %v853_v33 = vsel %vm704_vm0, %v305_v30, 0  ;;  %v8420_v16 = vand.u32 4294901760, %v7046_v60 }
  0x66   : > { %8403 = vst [vmem:[#allocation63_spill] sm:$0xff] %v7036_v43  ;;  %601 = vperm.xlu1 %6135, %v363_v22   ;;  %8407 = vst [vmem:[#allocation66_spill] sm:$0xff] %v7051_v35  ;;  %v365_v22 = vld [vmem:[%s8159_s2 + $0x168] sm:$0xff]  ;;  %v1361_v7 = vand.u32 4294901760, %v1360_v20  ;;  %v7071_v20 = vand.u32 4294901760, %v850_v55  ;;  %v856_v5 = vsel %vm704_vm0, %v306_v53, 0  ;;  %v7086_v30 = vsub.f32 %v847_v47, %v7051_v35 }
  0x67   : > { %596 = vperm.xlu0 %6134, %v362_v3   ;;  %5178 = vmatmul.mubr.f32.gmra.mrb[36].mxu1 %v1341_v62  ;;  %v364_v62 = vld [vmem:[%s8159_s2 + $0x160] sm:$0xff]  ;;  %v1371_v3 = vand.u32 4294901760, %v1370_v56  ;;  %v367_v53 = vld [vmem:[%s8159_s2 + $0x178] sm:$0xff]  ;;  %v1391_v27 = vand.u32 4294901760, %v1390_v44  ;;  %v366_v47 = vld [vmem:[%s8159_s2 + $0x170] sm:$0xff]  ;;  %v8416_v59 = vand.u32 4294901760, %v7036_v43 }
  0x68   : > { %5472 = vmatmul.mubr.f32.gmra.mrb[36].mxu0 %v8409_v24  ;;  %5180 = vmatprep.mubr.f32.mxu1 %v1351_v21  ;;  %8410 = vst [vmem:[#allocation67_spill] sm:$0xff] %v7071_v20  ;;  %v307_v24 = vld [vmem:[%s8158_s1 + $0x198] sm:$0xff]  ;;  %v8412_v21 = vand.u32 4294901760, %v7009_v39  ;;  %8413 = vst [vmem:[#allocation68_spill] sm:$0xff] %v7086_v30  ;;  %v7107_v35 = vand.u32 4294901760, %v856_v5 }
  0x69   : > { %5474 = vmatprep.mubr.f32.mxu0 %v8411_v38  ;;  %v308_v38 = vld [vmem:[%s8158_s1 + $0x1a0] sm:$0xff]  ;;  %v859_v44 = vsel %vm704_vm0, %v307_v24, 0  ;;  %v8421_v24 = vand.u32 4294901760, %v7049_v61 }
  0x6a   : > { %611 = vperm.xlu1 %6135, %v365_v22   ;;  %v1400_v56 = vsub.f32 %v7009_v39, %v8412_v21  ;;  %v1381_v22 = vand.u32 4294901760, %v1380_v51  ;;  %v7094_v21 = vand.u32 4294901760, %v853_v33  ;;  %8418 = vst [vmem:[#allocation71_spill] sm:$0xff] %v7107_v35  ;;  %v310_v51 = vld [vmem:[%s8158_s1 + $0x1b0] sm:$0xff] }
  0x6b   : > { %606 = vperm.xlu0 %6134, %v364_v62   ;;  %5181 = vmatmul.mubr.f32.gmra.mrb[38].mxu1 %v1361_v7  ;;  %v1410_v7 = vsub.f32 %v7036_v43, %v8416_v59  ;;  %v7105_v62 = vsub.f32 %v850_v55, %v7071_v20  ;;  %v862_v59 = vsel %vm704_vm0, %v308_v38, 0  ;;  %v1420_v20 = vsub.f32 %v7046_v60, %v8420_v16 }
  0x6c   : > { %8414 = vst [vmem:[#allocation69_spill] sm:$0xff] %v7094_v21  ;;  %5475 = vmatmul.mubr.f32.gmra.mrb[38].mxu0 %v8415_v25  ;;  %5183 = vmatprep.mubr.f32.mxu1 %v1371_v3  ;;  %v309_v25 = vld [vmem:[%s8158_s1 + $0x1a8] sm:$0xff]  ;;  %v8419_v3 = vand.u32 4294901760, %v6964_v36  ;;  %v1401_v55 = vand.u32 4294901760, %v1400_v56  ;;  %v1430_v40 = vsub.f32 %v7049_v61, %v8421_v24  ;;  %v7130_v38 = vsub.f32 %v853_v33, %v7094_v21 }
  0x6d   : > { %8417 = vst [vmem:[#allocation70_spill] sm:$0xff] %v7105_v62  ;;  %v7132_v56 = vand.u32 4294901760, %v859_v44  ;;  %v868_v16 = vsel %vm704_vm0, %v310_v51, 0  ;;  %v8424_v36 = vand.u32 4294901760, %v6985_v12  ;;  %v7143_v33 = vsub.f32 %v856_v5, %v7107_v35  ;;  %v371_v12 = vld [vmem:[%s8159_s2 + $0x198] sm:$0xff] }
  0x6e   : > { %5477 = vmatprep.mubr.f32.mxu0 %v8419_v3  ;;  %621 = vperm.xlu1 %6135, %v367_v53   ;;  %v369_v3 = vld [vmem:[%s8159_s2 + $0x188] sm:$0xff]  ;;  %8422 = vst [vmem:[#allocation72_spill] sm:$0xff] %v7130_v38  ;;  %v865_v53 = vsel %vm704_vm0, %v309_v25, 0  ;;  %v7145_v28 = vand.u32 4294901760, %v862_v59  ;;  %v311_v25 = vld [vmem:[%s8158_s1 + $0x1b8] sm:$0xff]  ;;  %v8427_v51 = vand.u32 4294901760, %v6988_v17 }
  0x6f   : > { %616 = vperm.xlu0 %6134, %v366_v47   ;;  %5184 = vmatmul.mubr.f32.gmra.mrb[40].mxu1 %v1381_v22  ;;  %8423 = vst [vmem:[#allocation73_spill] sm:$0xff] %v7132_v56  ;;  %v368_v22 = vld [vmem:[%s8159_s2 + $0x180] sm:$0xff]  ;;  %v1411_v47 = vand.u32 4294901760, %v1410_v7  ;;  %8425 = vst [vmem:[#allocation74_spill] sm:$0xff] %v7143_v33  ;;  %v1431_v7 = vand.u32 4294901760, %v1430_v40  ;;  %v7155_v24 = vand.u32 4294901760, %v865_v53 }
  0x70   : > { %5478 = vmatmul.mubr.f32.gmra.mrb[40].mxu0 %v8424_v36  ;;  %5186 = vmatprep.mubr.f32.mxu1 %v1391_v27  ;;  %8426 = vst [vmem:[#allocation75_spill] sm:$0xff] %v7145_v28  ;;  %v312_v36 = vld [vmem:[%s8158_s1 + $0x1c0] sm:$0xff]  ;;  %v1421_v27 = vand.u32 4294901760, %v1420_v20  ;;  %v7157_v5 = vand.u32 4294901760, %v868_v16  ;;  %v8430_v17 = vand.u32 4294901760, %v7086_v30  ;;  %v871_v40 = vsel %vm704_vm0, %v311_v25, 0 }
  0x71   : > { %5480 = vmatprep.mubr.f32.mxu0 %v8427_v51  ;;  %8428 = vst [vmem:[#allocation76_spill] sm:$0xff] %v7155_v24  ;;  %v8432_v20 = vand.u32 4294901760, %v7009_v39  ;;  %v7180_v35 = vsub.f32 %v862_v59, %v7145_v28  ;;  %v8435_v25 = vand.u32 4294901760, %v7036_v43  ;;  %v314_v59 = vld [vmem:[%s8158_s1 + $0x1d0] sm:$0xff]  ;;  %v8441_v39 = vand.u32 4294901760, %v7046_v60 }
  0x72   : > { %631 = vperm.xlu1 %6135, %v369_v3   ;;  %8429 = vst [vmem:[#allocation77_spill] sm:$0xff] %v7157_v5  ;;  %v1440_v51 = vsub.f32 %v7086_v30, %v8430_v17  ;;  %v7167_v3 = vsub.f32 %v859_v44, %v7132_v56  ;;  %v874_v44 = vsel %vm704_vm0, %v312_v36, 0  ;;  %v7194_v17 = vand.u32 4294901760, %v871_v40  ;;  %v373_v36 = vld [vmem:[%s8159_s2 + $0x1a8] sm:$0xff] }
  0x73   : > { %626 = vperm.xlu0 %6134, %v368_v22   ;;  %5187 = vmatmul.mubr.f32.gmra.mrb[42].mxu1 %v1401_v55  ;;  %v370_v55 = vld [vmem:[%s8159_s2 + $0x190] sm:$0xff]  ;;  %v8433_v22 = vand.u32 4294901760, %v7105_v62  ;;  %8434 = vst [vmem:[#allocation79_spill] sm:$0xff] %v7180_v35  ;;  %v7206_v43 = vand.u32 4294901760, %v874_v44  ;;  %v880_v60 = vsel %vm704_vm0, %v314_v59, 0  ;;  %v375_v59 = vld [vmem:[%s8159_s2 + $0x1b8] sm:$0xff] }
  0x74   : > { %8431 = vst [vmem:[#allocation78_spill] sm:$0xff] %v7167_v3  ;;  %5481 = vmatmul.mubr.f32.gmra.mrb[42].mxu0 %v8432_v20  ;;  %5189 = vmatprep.mubr.f32.mxu1 %v1411_v47  ;;  %v313_v47 = vld [vmem:[%s8158_s1 + $0x1c8] sm:$0xff]  ;;  %v7189_v20 = vsub.f32 %v865_v53, %v7155_v24  ;;  %8438 = vst [vmem:[#allocation82_spill] sm:$0xff] %v7194_v17  ;;  %v8448_v24 = vand.u32 4294901760, %v7086_v30 }
  0x75   : > { %v1450_v21 = vsub.f32 %v7105_v62, %v8433_v22  ;;  %5483 = vmatprep.mubr.f32.mxu0 %v8435_v25  ;;  %v7192_v22 = vsub.f32 %v868_v16, %v7157_v5  ;;  %v1441_v25 = vand.u32 4294901760, %v1440_v51  ;;  %8440 = vst [vmem:[#allocation83_spill] sm:$0xff] %v7206_v43  ;;  %v8442_v5 = vand.u32 4294901760, %v7143_v33 }
  0x76   : > { %641 = vperm.xlu1 %6135, %v371_v12   ;;  %8436 = vst [vmem:[#allocation80_spill] sm:$0xff] %v7189_v20  ;;  %v8439_v12 = vand.u32 4294901760, %v7130_v38  ;;  %v8443_v16 = vand.u32 4294901760, %v7049_v61 }
  0x77   : > { %8437 = vst [vmem:[#allocation81_spill] sm:$0xff] %v7192_v22  ;;  %636 = vperm.xlu0 %6134, %v370_v55   ;;  %5190 = vmatmul.mubr.f32.gmra.mrb[44].mxu1 %v1421_v27  ;;  %v372_v27 = vld [vmem:[%s8159_s2 + $0x1a0] sm:$0xff]  ;;  %v1451_v55 = vand.u32 4294901760, %v1450_v21  ;;  %v1470_v51 = vsub.f32 %v7143_v33, %v8442_v5  ;;  %v7227_v5 = vsub.f32 %v871_v40, %v7194_v17  ;;  %v7251_v17 = vand.u32 4294901760, %v880_v60 }
  0x78   : > { %v1460_v53 = vsub.f32 %v7130_v38, %v8439_v12  ;;  %5484 = vmatmul.mubr.f32.gmra.mrb[44].mxu0 %v8441_v39  ;;  %5192 = vmatprep.mubr.f32.mxu1 %v1431_v7  ;;  %v877_v12 = vsel %vm704_vm0, %v313_v47, 0  ;;  %v315_v39 = vld [vmem:[%s8158_s1 + $0x1d8] sm:$0xff]  ;;  %v316_v47 = vld [vmem:[%s8158_s1 + $0x1e0] sm:$0xff]  ;;  %v7239_v7 = vsub.f32 %v874_v44, %v7206_v43 }
  0x79   : > { %5486 = vmatprep.mubr.f32.mxu0 %v8443_v16  ;;  %8444 = vst [vmem:[#allocation84_spill] sm:$0xff] %v7227_v5  ;;  %v7241_v40 = vand.u32 4294901760, %v877_v12  ;;  %v883_v44 = vsel %vm704_vm0, %v315_v39, 0  ;;  %v886_v30 = vsel %vm704_vm0, %v316_v47, 0  ;;  %v377_v47 = vld [vmem:[%s8159_s2 + $0x1c8] sm:$0xff]  ;;  %v7285_v39 = vsub.f32 %v880_v60, %v7251_v17 }
  0x7a   : > { %651 = vperm.xlu1 %6135, %v373_v36   ;;  %v1461_v16 = vand.u32 4294901760, %v1460_v53  ;;  %v8445_v36 = vand.u32 4294901760, %v7167_v3  ;;  %8446 = vst [vmem:[#allocation85_spill] sm:$0xff] %v7239_v7  ;;  %v8449_v53 = vand.u32 4294901760, %v7180_v35  ;;  %v7277_v28 = vand.u32 4294901760, %v883_v44 }
  0x7b   : > { %646 = vperm.xlu0 %6134, %v372_v27   ;;  %5193 = vmatmul.mubr.f32.gmra.mrb[46].mxu1 %v1441_v25  ;;  %8447 = vst [vmem:[#allocation86_spill] sm:$0xff] %v7241_v40  ;;  %v374_v25 = vld [vmem:[%s8159_s2 + $0x1b0] sm:$0xff]  ;;  %v1471_v27 = vand.u32 4294901760, %v1470_v51  ;;  %8456 = vst [vmem:[#allocation89_spill] sm:$0xff] %v7285_v39 }
  0x7c   : > { %v1480_v21 = vsub.f32 %v7167_v3, %v8445_v36  ;;  %5487 = vmatmul.mubr.f32.gmra.mrb[46].mxu0 %v8448_v24  ;;  %5195 = vmatprep.mubr.f32.mxu1 %v1451_v55  ;;  %v1490_v61 = vsub.f32 %v7180_v35, %v8449_v53  ;;  %v8450_v36 = vand.u32 4294901760, %v7105_v62  ;;  %v317_v24 = vld [vmem:[%s8158_s1 + $0x1e8] sm:$0xff]  ;;  %v8451_v55 = vand.u32 4294901760, %v7189_v20  ;;  %8454 = vst [vmem:[#allocation88_spill] sm:$0xff] %v7277_v28 }
  0x7d   : > { %v8452_v53 = vand.u32 4294901760, %v7192_v22  ;;  %v1529_v62 = vand.u32 4294901760, %v7239_v7  ;;  %v889_v56 = vsel %vm704_vm0, %v317_v24, 0  ;;  %v379_v24 = vld [vmem:[%s8159_s2 + $0x1d8] sm:$0xff] }
  0x7e   : > { %5489 = vmatprep.mubr.f32.mxu0 %v8450_v36  ;;  %661 = vperm.xlu1 %6135, %v375_v59   ;;  %v1500_v51 = vsub.f32 %v7189_v20, %v8451_v55  ;;  %v318_v36 = vld [vmem:[%s8158_s1 + $0x1f0] sm:$0xff]  ;;  %v1481_v59 = vand.u32 4294901760, %v1480_v21  ;;  %v7275_v55 = vsub.f32 %v877_v12, %v7241_v40  ;;  %v7287_v21 = vand.u32 4294901760, %v886_v30 }
  0x7f   : > { %v1510_v43 = vsub.f32 %v7192_v22, %v8452_v53  ;;  %656 = vperm.xlu0 %6134, %v374_v25   ;;  %5196 = vmatmul.mubr.f32.gmra.mrb[48].mxu1 %v1461_v16  ;;  %v8455_v53 = vand.u32 4294901760, %v7130_v38  ;;  %v376_v16 = vld [vmem:[%s8159_s2 + $0x1c0] sm:$0xff]  ;;  %v1491_v25 = vand.u32 4294901760, %v1490_v61  ;;  %v8458_v12 = vand.u32 4294901760, %v7143_v33 }
  0x80   : > { %8453 = vst [vmem:[#allocation87_spill] sm:$0xff] %v7275_v55  ;;  %5198 = vmatprep.mubr.f32.mxu1 %v1471_v27  ;;  %8457 = vst [vmem:[#allocation90_spill] sm:$0xff] %v7287_v21  ;;  %v892_v40 = vsel %vm704_vm0, %v318_v36, 0  ;;  %v319_v27 = vld [vmem:[%s8158_s1 + $0x1f8] sm:$0xff]  ;;  %v8459_v61 = vand.u32 4294901760, %v7227_v5  ;;  %v1539_v36 = vand.u32 4294901760, %v7275_v55  ;;  %v7305_v33 = vsub.f32 %v883_v44, %v7277_v28 }
  0x81   : > { %5490 = vmatmul.mubr.f32.gmra.mrb[48].mxu0 %v8455_v53  ;;  %v1501_v53 = vand.u32 4294901760, %v1500_v51  ;;  %v1511_v38 = vand.u32 4294901760, %v1510_v43  ;;  %v8461_v43 = vand.u32 4294901760, %v7167_v3  ;;  %v378_v51 = vld [vmem:[%s8159_s2 + $0x1d0] sm:$0xff]  ;;  %v895_v44 = vsel %vm704_vm0, %v319_v27, 0 }
  0x82   : > { %5492 = vmatprep.mubr.f32.mxu0 %v8458_v12  ;;  %671 = vperm.xlu1 %6135, %v377_v47   ;;  %v1520_v60 = vsub.f32 %v7227_v5, %v8459_v61  ;;  %v1530_v12 = vsub.f32 %v7239_v7, %v1529_v62  ;;  %8460 = vst [vmem:[#allocation91_spill] sm:$0xff] %v7305_v33  ;;  %v7307_v47 = vand.u32 4294901760, %v889_v56  ;;  %v7318_v61 = vand.u32 4294901760, %v892_v40 }
  0x83   : > { %666 = vperm.xlu0 %6134, %v376_v16   ;;  %5199 = vmatmul.mubr.f32.gmra.mrb[50].mxu1 %v1481_v59  ;;  %v1549_v59 = vand.u32 4294901760, %v7285_v39  ;;  %v7316_v16 = vsub.f32 %v886_v30, %v7287_v21  ;;  %v8464_v7 = vand.u32 4294901760, %v7180_v35  ;;  %v1559_v30 = vand.u32 4294901760, %v7305_v33  ;;  %v4180_v35 = vld [vmem:[%s8160_s3 + $0x1e0] sm:$0xff] }
  0x84   : > { %5201 = vmatprep.mubr.f32.mxu1 %v1491_v25  ;;  %8463 = vst [vmem:[#allocation93_spill] sm:$0xff] %v7318_v61  ;;  %v1521_v3 = vand.u32 4294901760, %v1520_v60  ;;  %v381_v25 = vld [vmem:[%s8159_s2 + $0x1e8] sm:$0xff]  ;;  %v7329_v21 = vsub.f32 %v889_v56, %v7307_v47  ;;  %v7331_v28 = vand.u32 4294901760, %v895_v44  ;;  %v8467_v27 = vand.u32 4294901760, %v7189_v20  ;;  %v4178_v20 = vld [vmem:[%s8160_s3 + $0x1d0] sm:$0xff] }
  0x85   : > { %5493 = vmatmul.mubr.f32.gmra.mrb[50].mxu0 %v8461_v43  ;;  %8462 = vst [vmem:[#allocation92_spill] sm:$0xff] %v7316_v16  ;;  %v1540_v43 = vsub.f32 %v7275_v55, %v1539_v36  ;;  %v1550_v60 = vsub.f32 %v7285_v39, %v1549_v59  ;;  %v8469_v56 = vand.u32 4294901760, %v7192_v22  ;;  %v8519_v22 = vld [vmem:[#allocation75_spill] sm:$0xff] }
  0x86   : > { %5495 = vmatprep.mubr.f32.mxu0 %v8464_v7  ;;  %681 = vperm.xlu1 %6135, %v379_v24   ;;  %8465 = vst [vmem:[#allocation94_spill] sm:$0xff] %v7329_v21  ;;  %8466 = vst [vmem:[#allocation95_spill] sm:$0xff] %v7331_v28  ;;  %v380_v7 = vld [vmem:[%s8159_s2 + $0x1e0] sm:$0xff]  ;;  %v1569_v24 = vand.u32 4294901760, %v7316_v16  ;;  %v1579_v39 = vand.u32 4294901760, %v7329_v21  ;;  %v7351_v55 = vsub.f32 %v895_v44, %v7331_v28  ;;  %v4121_v44 = vld [vmem:[%s8160_s3 + $0x8] sm:$0xff] }
  0x87   : > { %676 = vperm.xlu0 %6134, %v378_v51   ;;  %5202 = vmatmul.mubr.f32.gmra.mrb[52].mxu1 %v1501_v53  ;;  %v1531_v53 = vand.u32 4294901760, %v1530_v12  ;;  %v7341_v51 = vsub.f32 %v892_v40, %v7318_v61  ;;  %v1560_v12 = vsub.f32 %v7305_v33, %v1559_v30  ;;  %v8471_v40 = vand.u32 4294901760, %v7227_v5  ;;  %v4176_v33 = vld [vmem:[%s8160_s3 + $0x1c0] sm:$0xff]  ;;  %v4179_v5 = vld [vmem:[%s8160_s3 + $0x1d8] sm:$0xff] }
  0x88   : > { %5204 = vmatprep.mubr.f32.mxu1 %v1511_v38  ;;  %v383_v38 = vld [vmem:[%s8159_s2 + $0x1f8] sm:$0xff]  ;;  %8470 = vst [vmem:[#allocation97_spill] sm:$0xff] %v7351_v55 }
  0x89   : > { %5496 = vmatmul.mubr.f32.gmra.mrb[52].mxu0 %v8467_v27  ;;  %8468 = vst [vmem:[#allocation96_spill] sm:$0xff] %v7341_v51  ;;  %v1541_v27 = vand.u32 4294901760, %v1540_v43  ;;  %v1589_v43 = vand.u32 4294901760, %v7341_v51 }
  0x8a   : > { %5498 = vmatprep.mubr.f32.mxu0 %v8469_v56  ;;  %691 = vperm.xlu1 %6135, %v381_v25   ;;  %v1551_v25 = vand.u32 4294901760, %v1550_v60  ;;  %v1561_v56 = vand.u32 4294901760, %v1560_v12  ;;  %v4120_v60 = vld [vmem:[%s8160_s3] sm:$0xff] }
  0x8b   : > { %686 = vperm.xlu0 %6134, %v380_v7   ;;  %5205 = vmatmul.mubr.f32.gmra.mrb[54].mxu1 %v1521_v3  ;;  %v382_v3 = vld [vmem:[%s8159_s2 + $0x1f0] sm:$0xff]  ;;  %v1570_v7 = vsub.f32 %v7316_v16, %v1569_v24 }
  0x8c   : > { %5207 = vmatprep.mubr.f32.mxu1 %v1531_v53  ;;  %v1580_v53 = vsub.f32 %v7329_v21, %v1579_v39 }
  0x8d   : > { %5499 = vmatmul.mubr.f32.gmra.mrb[54].mxu0 %v8471_v40  ;;  %v1599_v40 = vand.u32 4294901760, %v7351_v55  ;;  %v1571_v16 = vand.u32 4294901760, %v1570_v7  ;;  %v4128_v7 = vld [vmem:[%s8160_s3 + $0x40] sm:$0xff] }
  0x8e   : > { %5501 = vmatprep.mubr.f32.mxu0 %v1529_v62  ;;  %701 = vperm.xlu1 %6135, %v383_v38   ;;  %v1590_v62 = vsub.f32 %v7341_v51, %v1589_v43  ;;  %v4123_v38 = vld [vmem:[%s8160_s3 + $0x18] sm:$0xff]  ;;  %v4174_v51 = vld [vmem:[%s8160_s3 + $0x1b0] sm:$0xff] }
  0x8f   : > { %696 = vperm.xlu0 %6134, %v382_v3   ;;  %5208 = vmatmul.mubr.f32.gmra.mrb[56].mxu1 %v1541_v27  ;;  %v1581_v27 = vand.u32 4294901760, %v1580_v53  ;;  %v1600_v12 = vsub.f32 %v7351_v55, %v1599_v40  ;;  %v4134_v53 = vld [vmem:[%s8160_s3 + $0x70] sm:$0xff]  ;;  %v4172_v55 = vld [vmem:[%s8160_s3 + $0x1a0] sm:$0xff] }
  0x90   : > { %5210 = vmatprep.mubr.f32.mxu1 %v1551_v25  ;;  %v1591_v3 = vand.u32 4294901760, %v1590_v62  ;;  %v4139_v62 = vld [vmem:[%s8160_s3 + $0x98] sm:$0xff] }
  0x91   : > { %5502 = vmatmul.mubr.f32.gmra.mrb[56].mxu0 %v1539_v36  ;;  %v4122_v36 = vld [vmem:[%s8160_s3 + $0x10] sm:$0xff]  ;;  %v1601_v25 = vand.u32 4294901760, %v1600_v12  ;;  %v4140_v12 = vld [vmem:[%s8160_s3 + $0xa0] sm:$0xff] }
  0x92   : > { %5504 = vmatprep.mubr.f32.mxu0 %v1549_v59  ;;  %4191 = vperm.xlu1 %6135, %v4121_v44   ;;  %v4125_v59 = vld [vmem:[%s8160_s3 + $0x28] sm:$0xff]  ;;  %v4130_v44 = vld [vmem:[%s8160_s3 + $0x50] sm:$0xff] }
  0x93   : > { %4186 = vperm.xlu0 %6134, %v4120_v60   ;;  %5211 = vmatmul.mubr.f32.gmra.mrb[58].mxu1 %v1561_v56  ;;  %v4135_v56 = vld [vmem:[%s8160_s3 + $0x78] sm:$0xff]  ;;  %v4136_v60 = vld [vmem:[%s8160_s3 + $0x80] sm:$0xff] }
  0x94   : > { %5213 = vmatprep.mubr.f32.mxu1 %v1571_v16  ;;  %v4124_v16 = vld [vmem:[%s8160_s3 + $0x20] sm:$0xff] }
  0x95   : > { %5505 = vmatmul.mubr.f32.gmra.mrb[58].mxu0 %v1559_v30  ;;  %v4127_v30 = vld [vmem:[%s8160_s3 + $0x38] sm:$0xff] }
  0x96   : > { %5507 = vmatprep.mubr.f32.mxu0 %v1569_v24  ;;  %4201 = vperm.xlu1 %6135, %v4123_v38   ;;  %v4129_v24 = vld [vmem:[%s8160_s3 + $0x48] sm:$0xff]  ;;  %v4138_v38 = vld [vmem:[%s8160_s3 + $0x90] sm:$0xff] }
  0x97   : > { %4196 = vperm.xlu0 %6134, %v4122_v36   ;;  %5214 = vmatmul.mubr.f32.gmra.mrb[60].mxu1 %v1581_v27  ;;  %v4141_v27 = vld [vmem:[%s8160_s3 + $0xa8] sm:$0xff]  ;;  %v7462_v36 = vpop.permute.xlu1 %396 }
  0x98   : > { %5216 = vmatprep.mubr.f32.mxu1 %v1591_v3  ;;  %8472 = vst [vmem:[#allocation98_spill] sm:$0xff] %v7462_v36  ;;  %v7464_v3 = vpop.permute.xlu0 %386 }
  0x99   : > { %5508 = vmatmul.mubr.f32.gmra.mrb[60].mxu0 %v1579_v39  ;;  %v4126_v39 = vld [vmem:[%s8160_s3 + $0x30] sm:$0xff]  ;;  %8473 = vst [vmem:[#allocation99_spill] sm:$0xff] %v7464_v3  ;;  %v4173_v3 = vld [vmem:[%s8160_s3 + $0x1a8] sm:$0xff] }
  0x9a   : > { %5510 = vmatprep.mubr.f32.mxu0 %v1589_v43  ;;  %4211 = vperm.xlu1 %6135, %v4125_v59   ;;  %v4131_v43 = vld [vmem:[%s8160_s3 + $0x58] sm:$0xff] }
  0x9b   : > { %4206 = vperm.xlu0 %6134, %v4124_v16   ;;  %5217 = vmatmul.mubr.f32.gmra.mrb[62].mxu1 %v1601_v25  ;;  %v4143_v59 = vld [vmem:[%s8160_s3 + $0xb8] sm:$0xff]  ;;  %v4142_v25 = vld [vmem:[%s8160_s3 + $0xb0] sm:$0xff]  ;;  %v4145_v16 = vld [vmem:[%s8160_s3 + $0xc8] sm:$0xff] }
  0x9c   : > { %5221 = vmatprep.mubr.f32.mxu1 %v6266_v9 }
  0x9d   : > { %5511 = vmatmul.mubr.f32.gmra.mrb[62].mxu0 %v1599_v40  ;;  %v4137_v40 = vld [vmem:[%s8160_s3 + $0x88] sm:$0xff] }
  0x9e   : > { %5515 = vmatprep.mubr.f32.mxu0 %v6266_v9  ;;  %4221 = vperm.xlu1 %6135, %v4127_v30   ;;  %v7480_v30 = vpop.permute.xlu1 %401 }
  0x9f   : > { %4216 = vperm.xlu0 %6134, %v4126_v39   ;;  %5222 = vmatmul.mubr.f32.vlgmr.msra.gmra.mrb[0].mxu1 %v6275_v13  ;;  %8474 = vst [vmem:[#allocation100_spill] sm:$0xff] %v7480_v30  ;;  %v4144_v39 = vld [vmem:[%s8160_s3 + $0xc0] sm:$0xff]  ;;  %v4170_v30 = vld [vmem:[%s8160_s3 + $0x190] sm:$0xff] }
  0xa0   : > { %5224 = vmatprep.mubr.f32.mxu1 %v6277_v14  ;;  %5318 = vmatpush3.msra.mxu1 %v6354_v50  ;;  %v4132_v50 = vld [vmem:[%s8160_s3 + $0x60] sm:$0xff] }
  0xa1   : > { %5516 = vmatmul.mubr.f32.vlgmr.msra.gmra.mrb[0].mxu0 %v6275_v13 }
  0xa2   : > { %5518 = vmatprep.mubr.f32.mxu0 %v6277_v14  ;;  %4231 = vperm.xlu1 %6135, %v4129_v24   ;;  %v7487_v24 = vpop.permute.xlu0 %391 }
  0xa3   : > { %5612 = vmatpush3.msra.mxu0 %v6327_v37  ;;  %4226 = vperm.xlu0 %6134, %v4128_v7   ;;  %v4133_v37 = vld [vmem:[%s8160_s3 + $0x68] sm:$0xff]  ;;  %8475 = vst [vmem:[#allocation101_spill] sm:$0xff] %v7487_v24  ;;  %v4147_v7 = vld [vmem:[%s8160_s3 + $0xd8] sm:$0xff] }
  0xa4   : > { %5225 = vmatmul.mubr.f32.gmra.mrb[2].mxu1 %v6287_v18  ;;  %v8509_v24 = vld [vmem:[#allocation62_spill] sm:$0xff] }
  0xa5   : > { %5519 = vmatmul.mubr.f32.gmra.mrb[2].mxu0 %v6287_v18  ;;  %5227 = vmatprep.mubr.f32.mxu1 %v6311_v26 }
  0xa6   : > { %5521 = vmatprep.mubr.f32.mxu0 %v6311_v26  ;;  %4241 = vperm.xlu1 %6135, %v4131_v43   ;;  %v4146_v43 = vld [vmem:[%s8160_s3 + $0xd0] sm:$0xff] }
  0xa7   : > { %4236 = vperm.xlu0 %6134, %v4130_v44   ;;  %v7500_v44 = vpop.permute.xlu1 %411 }
  0xa8   : > { %5228 = vmatmul.mubr.f32.gmra.mrb[4].mxu1 %v6318_v31  ;;  %8476 = vst [vmem:[#allocation102_spill] sm:$0xff] %v7500_v44  ;;  %v4168_v44 = vld [vmem:[%s8160_s3 + $0x180] sm:$0xff] }
  0xa9   : > { %5522 = vmatmul.mubr.f32.gmra.mrb[4].mxu0 %v6318_v31  ;;  %5230 = vmatprep.mubr.f32.mxu1 %v6340_v45 }
  0xaa   : > { %5524 = vmatprep.mubr.f32.mxu0 %v6340_v45  ;;  %4251 = vperm.xlu1 %6135, %v4133_v37   ;;  %v7502_v37 = vpop.permute.xlu0 %406 }
  0xab   : > { %4246 = vperm.xlu0 %6134, %v4132_v50   ;;  %8477 = vst [vmem:[#allocation103_spill] sm:$0xff] %v7502_v37  ;;  %v4149_v50 = vld [vmem:[%s8160_s3 + $0xe8] sm:$0xff]  ;;  %v4166_v37 = vld [vmem:[%s8160_s3 + $0x170] sm:$0xff] }
  0xac   : > { %5231 = vmatmul.mubr.f32.gmra.mrb[6].mxu1 %v6383_v2 }
  0xad   : > { %5525 = vmatmul.mubr.f32.gmra.mrb[6].mxu0 %v6383_v2  ;;  %5233 = vmatprep.mubr.f32.mxu1 %v6393_v8 }
  0xae   : > { %5527 = vmatprep.mubr.f32.mxu0 %v6393_v8  ;;  %4261 = vperm.xlu1 %6135, %v4135_v56   ;;  %v4148_v56 = vld [vmem:[%s8160_s3 + $0xe0] sm:$0xff] }
  0xaf   : > { %4256 = vperm.xlu0 %6134, %v4134_v53   ;;  %v4151_v53 = vld [vmem:[%s8160_s3 + $0xf8] sm:$0xff] }
  0xb0   : > { %5234 = vmatmul.mubr.f32.gmra.mrb[8].mxu1 %v6402_v15 }
  0xb1   : > { %5528 = vmatmul.mubr.f32.gmra.mrb[8].mxu0 %v6402_v15  ;;  %5236 = vmatprep.mubr.f32.mxu1 %v6414_v23 }
  0xb2   : > { %5530 = vmatprep.mubr.f32.mxu0 %v6414_v23  ;;  %4271 = vperm.xlu1 %6135, %v4137_v40   ;;  %v7518_v40 = vpop.permute.xlu1 %421 }
  0xb3   : > { %4266 = vperm.xlu0 %6134, %v4136_v60   ;;  %8478 = vst [vmem:[#allocation104_spill] sm:$0xff] %v7518_v40  ;;  %v4150_v60 = vld [vmem:[%s8160_s3 + $0xf0] sm:$0xff]  ;;  %v8499_v40 = vld [vmem:[#allocation51_spill] sm:$0xff] }
  0xb4   : > { %5237 = vmatmul.mubr.f32.gmra.mrb[10].mxu1 %v6424_v34 }
  0xb5   : > { %5531 = vmatmul.mubr.f32.gmra.mrb[10].mxu0 %v6424_v34  ;;  %5239 = vmatprep.mubr.f32.mxu1 %v6445_v49 }
  0xb6   : > { %5533 = vmatprep.mubr.f32.mxu0 %v6445_v49  ;;  %4281 = vperm.xlu1 %6135, %v4139_v62   ;;  %v7525_v62 = vpop.permute.xlu0 %416 }
  0xb7   : > { %4276 = vperm.xlu0 %6134, %v4138_v38   ;;  %8479 = vst [vmem:[#allocation105_spill] sm:$0xff] %v7525_v62  ;;  %v4153_v38 = vld [vmem:[%s8160_s3 + $0x108] sm:$0xff]  ;;  %v4167_v62 = vld [vmem:[%s8160_s3 + $0x178] sm:$0xff] }
  0xb8   : > { %5240 = vmatmul.mubr.f32.gmra.mrb[12].mxu1 %v6451_v54 }
  0xb9   : > { %5534 = vmatmul.mubr.f32.gmra.mrb[12].mxu0 %v6451_v54  ;;  %5242 = vmatprep.mubr.f32.mxu1 %v6478_v4 }
  0xba   : > { %5536 = vmatprep.mubr.f32.mxu0 %v6478_v4  ;;  %4291 = vperm.xlu1 %6135, %v4141_v27   ;;  %v4152_v27 = vld [vmem:[%s8160_s3 + $0x100] sm:$0xff] }
  0xbb   : > { %4286 = vperm.xlu0 %6134, %v4140_v12   ;;  %v7538_v12 = vpop.permute.xlu1 %431 }
  0xbc   : > { %5243 = vmatmul.mubr.f32.gmra.mrb[14].mxu1 %v6498_v19  ;;  %8480 = vst [vmem:[#allocation106_spill] sm:$0xff] %v7538_v12  ;;  %v4164_v12 = vld [vmem:[%s8160_s3 + $0x160] sm:$0xff] }
  0xbd   : > { %5537 = vmatmul.mubr.f32.gmra.mrb[14].mxu0 %v6498_v19  ;;  %5245 = vmatprep.mubr.f32.mxu1 %v6522_v52 }
  0xbe   : > { %5539 = vmatprep.mubr.f32.mxu0 %v6522_v52  ;;  %4301 = vperm.xlu1 %6135, %v4143_v59   ;;  %v7540_v59 = vpop.permute.xlu0 %426 }
  0xbf   : > { %4296 = vperm.xlu0 %6134, %v4142_v25   ;;  %8481 = vst [vmem:[#allocation107_spill] sm:$0xff] %v7540_v59  ;;  %v4155_v25 = vld [vmem:[%s8160_s3 + $0x118] sm:$0xff] }
  0xc0   : > { %5246 = vmatmul.mubr.f32.gmra.mrb[16].mxu1 %v6527_v57 }
  0xc1   : > { %5540 = vmatmul.mubr.f32.gmra.mrb[16].mxu0 %v6527_v57  ;;  %5248 = vmatprep.mubr.f32.mxu1 %v6550_v6 }
  0xc2   : > { %5542 = vmatprep.mubr.f32.mxu0 %v6550_v6  ;;  %4311 = vperm.xlu1 %6135, %v4145_v16   ;;  %v4154_v16 = vld [vmem:[%s8160_s3 + $0x110] sm:$0xff] }
  0xc3   : > { %4306 = vperm.xlu0 %6134, %v4144_v39   ;;  %v4157_v39 = vld [vmem:[%s8160_s3 + $0x128] sm:$0xff] }
  0xc4   : > { %5249 = vmatmul.mubr.f32.gmra.mrb[18].mxu1 %v6552_v10 }
  0xc5   : > { %5543 = vmatmul.mubr.f32.gmra.mrb[18].mxu0 %v6552_v10  ;;  %5251 = vmatprep.mubr.f32.mxu1 %v6561_v29 }
  0xc6   : > { %5545 = vmatprep.mubr.f32.mxu0 %v6561_v29  ;;  %4321 = vperm.xlu1 %6135, %v4147_v7   ;;  %v7556_v7 = vpop.permute.xlu1 %441 }
  0xc7   : > { %4316 = vperm.xlu0 %6134, %v4146_v43   ;;  %8482 = vst [vmem:[#allocation108_spill] sm:$0xff] %v7556_v7  ;;  %v4156_v43 = vld [vmem:[%s8160_s3 + $0x120] sm:$0xff]  ;;  %v4162_v7 = vld [vmem:[%s8160_s3 + $0x150] sm:$0xff] }
  0xc8   : > { %5252 = vmatmul.mubr.f32.gmra.mrb[20].mxu1 %v6576_v32 }
  0xc9   : > { %5546 = vmatmul.mubr.f32.gmra.mrb[20].mxu0 %v6576_v32  ;;  %5254 = vmatprep.mubr.f32.mxu1 %v6600_v63 }
  0xca   : > { %5548 = vmatprep.mubr.f32.mxu0 %v6600_v63  ;;  %4331 = vperm.xlu1 %6135, %v4149_v50   ;;  %v7563_v50 = vpop.permute.xlu0 %436 }
  0xcb   : > { %4326 = vperm.xlu0 %6134, %v4148_v56   ;;  %8483 = vst [vmem:[#allocation109_spill] sm:$0xff] %v7563_v50  ;;  %v8484_v56 = vld [vmem:[#allocation33_spill] sm:$0xff]  ;;  %v4160_v50 = vld [vmem:[%s8160_s3 + $0x140] sm:$0xff] }
  0xcc   : > { %5255 = vmatmul.mubr.f32.gmra.mrb[22].mxu1 %v6618_v11 }
  0xcd   : > { %5549 = vmatmul.mubr.f32.gmra.mrb[22].mxu0 %v6618_v11  ;;  %5257 = vmatprep.mubr.f32.mxu1 %v6645_v0 }
  0xce   : > { %5551 = vmatprep.mubr.f32.mxu0 %v6645_v0  ;;  %4341 = vperm.xlu1 %6135, %v4151_v53   ;;  %v4159_v53 = vld [vmem:[%s8160_s3 + $0x138] sm:$0xff] }
  0xcf   : > { %4336 = vperm.xlu0 %6134, %v4150_v60   ;;  %v8485_v60 = vld [vmem:[#allocation34_spill] sm:$0xff] }
  0xd0   : > { %5258 = vmatmul.mubr.f32.gmra.mrb[24].mxu1 %v6662_v46 }
  0xd1   : > { %5552 = vmatmul.mubr.f32.gmra.mrb[24].mxu0 %v6662_v46  ;;  %5260 = vmatprep.mubr.f32.mxu1 %v6664_v42 }
  0xd2   : > { %5554 = vmatprep.mubr.f32.mxu0 %v6664_v42  ;;  %4351 = vperm.xlu1 %6135, %v4153_v38   ;;  %v4158_v38 = vld [vmem:[%s8160_s3 + $0x130] sm:$0xff] }
  0xd3   : > { %4346 = vperm.xlu0 %6134, %v4152_v27   ;;  %v7576_v27 = vpop.permute.xlu1 %451 }
  0xd4   : > { %5261 = vmatmul.mubr.f32.gmra.mrb[26].mxu1 %v6688_v48  ;;  %8486 = vst [vmem:[#allocation33_spill] sm:$0xff] %v7576_v27  ;;  %v8492_v27 = vld [vmem:[#allocation43_spill] sm:$0xff] }
  0xd5   : > { %5555 = vmatmul.mubr.f32.gmra.mrb[26].mxu0 %v6688_v48  ;;  %5263 = vmatprep.mubr.f32.mxu1 %v6712_v41 }
  0xd6   : > { %5557 = vmatprep.mubr.f32.mxu0 %v6712_v41  ;;  %4361 = vperm.xlu1 %6135, %v4155_v25   ;;  %v7578_v25 = vpop.permute.xlu0 %446 }
  0xd7   : > { %4356 = vperm.xlu0 %6134, %v4154_v16   ;;  %8487 = vst [vmem:[#allocation34_spill] sm:$0xff] %v7578_v25  ;;  %v8488_v16 = vld [vmem:[#allocation37_spill] sm:$0xff]  ;;  %v7594_v25 = vpop.permute.xlu1 %461 }
  0xd8   : > { %5264 = vmatmul.mubr.f32.gmra.mrb[28].mxu1 %v6719_v1  ;;  %8491 = vst [vmem:[#allocation37_spill] sm:$0xff] %v7594_v25  ;;  %v8495_v25 = vld [vmem:[#allocation47_spill] sm:$0xff] }
  0xd9   : > { %5558 = vmatmul.mubr.f32.gmra.mrb[28].mxu0 %v6719_v1  ;;  %5266 = vmatprep.mubr.f32.mxu1 %v6748_v58 }
  0xda   : > { %5560 = vmatprep.mubr.f32.mxu0 %v6748_v58  ;;  %4371 = vperm.xlu1 %6135, %v4157_v39   ;;  %v4161_v39 = vld [vmem:[%s8160_s3 + $0x148] sm:$0xff]  ;;  %v7601_v59 = vpop.permute.xlu0 %456 }
  0xdb   : > { %4366 = vperm.xlu0 %6134, %v4156_v43   ;;  %v8489_v43 = vld [vmem:[#allocation39_spill] sm:$0xff] }
  0xdc   : > { %5267 = vmatmul.mubr.f32.gmra.mrb[30].mxu1 %v8484_v56  ;;  %8493 = vst [vmem:[#allocation39_spill] sm:$0xff] %v7601_v59  ;;  %v7614_v59 = vpop.permute.xlu1 %471 }
  0xdd   : > { %5561 = vmatmul.mubr.f32.gmra.mrb[30].mxu0 %v8484_v56  ;;  %5269 = vmatprep.mubr.f32.mxu1 %v8485_v60 }
  0xde   : > { %5563 = vmatprep.mubr.f32.mxu0 %v8485_v60  ;;  %4381 = vperm.xlu1 %6135, %v4159_v53   ;;  %v8490_v53 = vld [vmem:[#allocation41_spill] sm:$0xff] }
  0xdf   : > { %4376 = vperm.xlu0 %6134, %v4158_v38   ;;  %v4163_v38 = vld [vmem:[%s8160_s3 + $0x158] sm:$0xff]  ;;  %8496 = vst [vmem:[#allocation41_spill] sm:$0xff] %v7614_v59 }
  0xe0   : > { %5270 = vmatmul.mubr.f32.gmra.mrb[32].mxu1 %v8488_v16  ;;  %v8502_v59 = vld [vmem:[#allocation54_spill] sm:$0xff] }
  0xe1   : > { %5564 = vmatmul.mubr.f32.gmra.mrb[32].mxu0 %v8488_v16  ;;  %5272 = vmatprep.mubr.f32.mxu1 %v8489_v43 }
  0xe2   : > { %5566 = vmatprep.mubr.f32.mxu0 %v8489_v43  ;;  %4391 = vperm.xlu1 %6135, %v4161_v39   ;;  %v4165_v39 = vld [vmem:[%s8160_s3 + $0x168] sm:$0xff] }
  0xe3   : > { %4386 = vperm.xlu0 %6134, %v4160_v50   ;;  %v8494_v50 = vld [vmem:[#allocation45_spill] sm:$0xff] }
  0xe4   : > { %5273 = vmatmul.mubr.f32.gmra.mrb[34].mxu1 %v8490_v53 }
  0xe5   : > { %5567 = vmatmul.mubr.f32.gmra.mrb[34].mxu0 %v8490_v53  ;;  %5275 = vmatprep.mubr.f32.mxu1 %v8492_v27 }
  0xe6   : > { %5569 = vmatprep.mubr.f32.mxu0 %v8492_v27  ;;  %4401 = vperm.xlu1 %6135, %v4163_v38   ;;  %v8498_v38 = vld [vmem:[#allocation49_spill] sm:$0xff] }
  0xe7   : > { %4396 = vperm.xlu0 %6134, %v4162_v7   ;;  %v7616_v7 = vpop.permute.xlu0 %466 }
  0xe8   : > { %5276 = vmatmul.mubr.f32.gmra.mrb[36].mxu1 %v8494_v50  ;;  %8497 = vst [vmem:[#allocation43_spill] sm:$0xff] %v7616_v7  ;;  %v7632_v7 = vpop.permute.xlu1 %481 }
  0xe9   : > { %5570 = vmatmul.mubr.f32.gmra.mrb[36].mxu0 %v8494_v50  ;;  %5278 = vmatprep.mubr.f32.mxu1 %v8495_v25  ;;  %8501 = vst [vmem:[#allocation45_spill] sm:$0xff] %v7632_v7  ;;  %v8505_v7 = vld [vmem:[#allocation59_spill] sm:$0xff] }
  0xea   : > { %5572 = vmatprep.mubr.f32.mxu0 %v8495_v25  ;;  %4411 = vperm.xlu1 %6135, %v4165_v39   ;;  %v8500_v39 = vld [vmem:[#allocation53_spill] sm:$0xff] }
  0xeb   : > { %4406 = vperm.xlu0 %6134, %v4164_v12   ;;  %v4169_v12 = vld [vmem:[%s8160_s3 + $0x188] sm:$0xff]  ;;  %v7639_v36 = vpop.permute.xlu0 %476 }
  0xec   : > { %5279 = vmatmul.mubr.f32.gmra.mrb[38].mxu1 %v8498_v38  ;;  %8503 = vst [vmem:[#allocation47_spill] sm:$0xff] %v7639_v36  ;;  %v7652_v36 = vpop.permute.xlu1 %491 }
  0xed   : > { %5573 = vmatmul.mubr.f32.gmra.mrb[38].mxu0 %v8498_v38  ;;  %5281 = vmatprep.mubr.f32.mxu1 %v8499_v40  ;;  %8506 = vst [vmem:[#allocation49_spill] sm:$0xff] %v7652_v36  ;;  %v8512_v36 = vld [vmem:[#allocation67_spill] sm:$0xff] }
  0xee   : > { %5575 = vmatprep.mubr.f32.mxu0 %v8499_v40  ;;  %4421 = vperm.xlu1 %6135, %v4167_v62   ;;  %v4171_v62 = vld [vmem:[%s8160_s3 + $0x198] sm:$0xff] }
  0xef   : > { %4416 = vperm.xlu0 %6134, %v4166_v37   ;;  %v8504_v37 = vld [vmem:[#allocation56_spill] sm:$0xff] }
  0xf0   : > { %5282 = vmatmul.mubr.f32.gmra.mrb[40].mxu1 %v8500_v39 }
  0xf1   : > { %5576 = vmatmul.mubr.f32.gmra.mrb[40].mxu0 %v8500_v39  ;;  %5284 = vmatprep.mubr.f32.mxu1 %v8502_v59 }
  0xf2   : > { %5578 = vmatprep.mubr.f32.mxu0 %v8502_v59  ;;  %4431 = vperm.xlu1 %6135, %v4169_v12   ;;  %v8508_v12 = vld [vmem:[#allocation61_spill] sm:$0xff] }
  0xf3   : > { %4426 = vperm.xlu0 %6134, %v4168_v44   ;;  %v7654_v44 = vpop.permute.xlu0 %486 }
  0xf4   : > { %5285 = vmatmul.mubr.f32.gmra.mrb[42].mxu1 %v8504_v37  ;;  %8507 = vst [vmem:[#allocation51_spill] sm:$0xff] %v7654_v44  ;;  %v7670_v44 = vpop.permute.xlu1 %501 }
  0xf5   : > { %5579 = vmatmul.mubr.f32.gmra.mrb[42].mxu0 %v8504_v37  ;;  %5287 = vmatprep.mubr.f32.mxu1 %v8505_v7  ;;  %8511 = vst [vmem:[#allocation53_spill] sm:$0xff] %v7670_v44  ;;  %v8515_v44 = vld [vmem:[#allocation71_spill] sm:$0xff] }
  0xf6   : > { %5581 = vmatprep.mubr.f32.mxu0 %v8505_v7  ;;  %4441 = vperm.xlu1 %6135, %v4171_v62   ;;  %v8510_v62 = vld [vmem:[#allocation66_spill] sm:$0xff] }
  0xf7   : > { %4436 = vperm.xlu0 %6134, %v4170_v30   ;;  %v4175_v30 = vld [vmem:[%s8160_s3 + $0x1b8] sm:$0xff]  ;;  %v7677_v21 = vpop.permute.xlu0 %496 }
  0xf8   : > { %5288 = vmatmul.mubr.f32.gmra.mrb[44].mxu1 %v8508_v12  ;;  %8513 = vst [vmem:[#allocation54_spill] sm:$0xff] %v7677_v21  ;;  %v7690_v21 = vpop.permute.xlu1 %511 }
  0xf9   : > { %5582 = vmatmul.mubr.f32.gmra.mrb[44].mxu0 %v8508_v12  ;;  %5290 = vmatprep.mubr.f32.mxu1 %v8509_v24  ;;  %8516 = vst [vmem:[#allocation56_spill] sm:$0xff] %v7690_v21  ;;  %v8522_v21 = vld [vmem:[#allocation77_spill] sm:$0xff] }
  0xfa   : > { %5584 = vmatprep.mubr.f32.mxu0 %v8509_v24  ;;  %4451 = vperm.xlu1 %6135, %v4173_v3   ;;  %v4177_v3 = vld [vmem:[%s8160_s3 + $0x1c8] sm:$0xff] }
  0xfb   : > { %4446 = vperm.xlu0 %6134, %v4172_v55   ;;  %v8514_v55 = vld [vmem:[#allocation69_spill] sm:$0xff] }
  0xfc   : > { %5291 = vmatmul.mubr.f32.gmra.mrb[46].mxu1 %v8510_v62 }
  0xfd   : > { %5585 = vmatmul.mubr.f32.gmra.mrb[46].mxu0 %v8510_v62  ;;  %5293 = vmatprep.mubr.f32.mxu1 %v8512_v36 }
  0xfe   : > { %5587 = vmatprep.mubr.f32.mxu0 %v8512_v36  ;;  %4461 = vperm.xlu1 %6135, %v4175_v30   ;;  %v8518_v30 = vld [vmem:[#allocation73_spill] sm:$0xff] }
  0xff   : > { %4456 = vperm.xlu0 %6134, %v4174_v51   ;;  %v7692_v51 = vpop.permute.xlu0 %506 }
 0x100   : > { %5294 = vmatmul.mubr.f32.gmra.mrb[48].mxu1 %v8514_v55  ;;  %8517 = vst [vmem:[#allocation59_spill] sm:$0xff] %v7692_v51  ;;  %v7708_v51 = vpop.permute.xlu1 %521 }
 0x101   : > { %5588 = vmatmul.mubr.f32.gmra.mrb[48].mxu0 %v8514_v55  ;;  %5296 = vmatprep.mubr.f32.mxu1 %v8515_v44  ;;  %8521 = vst [vmem:[#allocation61_spill] sm:$0xff] %v7708_v51  ;;  %v8525_v51 = vld [vmem:[#allocation83_spill] sm:$0xff] }
 0x102   : > { %5590 = vmatprep.mubr.f32.mxu0 %v8515_v44  ;;  %4471 = vperm.xlu1 %6135, %v4177_v3   ;;  %v8520_v3 = vld [vmem:[#allocation76_spill] sm:$0xff] }
 0x103   : > { %4466 = vperm.xlu0 %6134, %v4176_v33   ;;  %v4181_v33 = vld [vmem:[%s8160_s3 + $0x1e8] sm:$0xff] }
 0x104   : > { %5297 = vmatmul.mubr.f32.gmra.mrb[50].mxu1 %v8518_v30 }
 0x105   : > { %5591 = vmatmul.mubr.f32.gmra.mrb[50].mxu0 %v8518_v30  ;;  %5299 = vmatprep.mubr.f32.mxu1 %v8519_v22  ;;  %v7715_v30 = vpop.permute.xlu0 %516 }
 0x106   : > { %5593 = vmatprep.mubr.f32.mxu0 %v8519_v22  ;;  %4481 = vperm.xlu1 %6135, %v4179_v5   ;;  %8523 = vst [vmem:[#allocation62_spill] sm:$0xff] %v7715_v30  ;;  %v4183_v5 = vld [vmem:[%s8160_s3 + $0x1f8] sm:$0xff]  ;;  %v7728_v30 = vpop.permute.xlu1 %531 }
 0x107   : > { %4476 = vperm.xlu0 %6134, %v4178_v20   ;;  %v8524_v20 = vld [vmem:[#allocation82_spill] sm:$0xff]  ;;  %8526 = vst [vmem:[#allocation66_spill] sm:$0xff] %v7728_v30 }
 0x108   : > { %5300 = vmatmul.mubr.f32.gmra.mrb[52].mxu1 %v8520_v3  ;;  %v8534_v30 = vld [vmem:[#allocation6_spill] sm:$0xff] }
 0x109   : > { %5594 = vmatmul.mubr.f32.gmra.mrb[52].mxu0 %v8520_v3  ;;  %5302 = vmatprep.mubr.f32.mxu1 %v8522_v21  ;;  %v4182_v3 = vld [vmem:[%s8160_s3 + $0x1f0] sm:$0xff] }
 0x10a   : > { %5596 = vmatprep.mubr.f32.mxu0 %v8522_v21  ;;  %4491 = vperm.xlu1 %6135, %v4181_v33   ;;  %v8528_v33 = vld [vmem:[#allocation86_spill] sm:$0xff] }
 0x10b   : > { %4486 = vperm.xlu0 %6134, %v4180_v35   ;;  %v7730_v35 = vpop.permute.xlu0 %526  ;;  %v8530_v21 = vld [vmem:[#allocation90_spill] sm:$0xff] }
 0x10c   : > { %5303 = vmatmul.mubr.f32.gmra.mrb[54].mxu1 %v8524_v20  ;;  %8527 = vst [vmem:[#allocation67_spill] sm:$0xff] %v7730_v35  ;;  %v8533_v35 = vld [vmem:[#allocation5_spill] sm:$0xff] }
 0x10d   : > { %5597 = vmatmul.mubr.f32.gmra.mrb[54].mxu0 %v8524_v20  ;;  %5305 = vmatprep.mubr.f32.mxu1 %v8525_v51  ;;  %v8529_v20 = vld [vmem:[#allocation88_spill] sm:$0xff] }
 0x10e   : > { %5599 = vmatprep.mubr.f32.mxu0 %v8525_v51  ;;  %4501 = vperm.xlu1 %6135, %v4183_v5   ;;  %v8532_v5 = vld [vmem:[#allocation4_spill] sm:$0xff] }
 0x10f   : > { %4496 = vperm.xlu0 %6134, %v4182_v3   ;;  %v8531_v3 = vld [vmem:[#allocation3_spill] sm:$0xff] }
 0x110   : > { %5306 = vmatmul.mubr.f32.gmra.mrb[56].mxu1 %v8528_v33 }
 0x111   : > { %5600 = vmatmul.mubr.f32.gmra.mrb[56].mxu0 %v8528_v33  ;;  %5308 = vmatprep.mubr.f32.mxu1 %v7251_v17 }
 0x112   : > { %5602 = vmatprep.mubr.f32.mxu0 %v7251_v17 }
 0x114   : > { %5309 = vmatmul.mubr.f32.gmra.mrb[58].mxu1 %v8529_v20 }
 0x115   : > { %5603 = vmatmul.mubr.f32.gmra.mrb[58].mxu0 %v8529_v20  ;;  %5311 = vmatprep.mubr.f32.mxu1 %v8530_v21 }
 0x116   : > { %5605 = vmatprep.mubr.f32.mxu0 %v8530_v21 }
 0x118   : > { %5312 = vmatmul.mubr.f32.gmra.mrb[60].mxu1 %v7307_v47 }
 0x119   : > { %5606 = vmatmul.mubr.f32.gmra.mrb[60].mxu0 %v7307_v47  ;;  %5314 = vmatprep.mubr.f32.mxu1 %v7318_v61 }
 0x11a   : > { %5608 = vmatprep.mubr.f32.mxu0 %v7318_v61  ;;  %v8535_v61 = vld [vmem:[#allocation7_spill] sm:$0xff] }
 0x11c   : > { %5315 = vmatmul.mubr.f32.gmra.mrb[62].mxu1 %v7331_v28 }
 0x11d   : > { %5609 = vmatmul.mubr.f32.gmra.mrb[62].mxu0 %v7331_v28  ;;  %5319 = vmatprep.mubr.f32.mxu1 %v8531_v3  ;;  %v8536_v28 = vld [vmem:[#allocation8_spill] sm:$0xff] }
 0x11e   : > { %5613 = vmatprep.mubr.f32.mxu0 %v6266_v9  ;;  %v8537_v9 = vld [vmem:[#allocation9_spill] sm:$0xff]  ;;  %v8566_v3 = vld [vmem:[#allocation44_spill] sm:$0xff] }
 0x120   : > { %5320 = vmatmul.mubr.f32.vlgmr.msra.gmra.mrb[0].mxu1 %v8532_v5  ;;  %v8568_v5 = vld [vmem:[#allocation48_spill] sm:$0xff] }
 0x121   : > { %5614 = vmatmul.mubr.f32.vlgmr.msra.gmra.mrb[0].mxu0 %v6275_v13  ;;  %5322 = vmatprep.mubr.f32.mxu1 %v8533_v35  ;;  %v8538_v13 = vld [vmem:[#allocation10_spill] sm:$0xff] }
 0x122   : > { %5616 = vmatprep.mubr.f32.mxu0 %v6277_v14  ;;  %v8539_v14 = vld [vmem:[#allocation11_spill] sm:$0xff] }
 0x124   : > { %5323 = vmatmul.mubr.f32.gmra.mrb[2].mxu1 %v8534_v30 }
 0x125   : > { %5617 = vmatmul.mubr.f32.gmra.mrb[2].mxu0 %v6287_v18  ;;  %5325 = vmatprep.mubr.f32.mxu1 %v8535_v61  ;;  %v8540_v18 = vld [vmem:[#allocation12_spill] sm:$0xff] }
 0x126   : > { %5619 = vmatprep.mubr.f32.mxu0 %v6311_v26  ;;  %v8541_v26 = vld [vmem:[#allocation13_spill] sm:$0xff]  ;;  %v8562_v61 = vld [vmem:[#allocation36_spill] sm:$0xff] }
 0x128   : > { %5326 = vmatmul.mubr.f32.gmra.mrb[4].mxu1 %v8536_v28  ;;  %v8558_v28 = vld [vmem:[#allocation30_spill] sm:$0xff] }
 0x129   : > { %5620 = vmatmul.mubr.f32.gmra.mrb[4].mxu0 %v6318_v31  ;;  %5328 = vmatprep.mubr.f32.mxu1 %v8537_v9  ;;  %v8542_v31 = vld [vmem:[#allocation14_spill] sm:$0xff] }
 0x12a   : > { %5622 = vmatprep.mubr.f32.mxu0 %v6340_v45  ;;  %v8543_v45 = vld [vmem:[#allocation15_spill] sm:$0xff] }
 0x12c   : > { %5329 = vmatmul.mubr.f32.gmra.mrb[6].mxu1 %v8538_v13 }
 0x12d   : > { %5623 = vmatmul.mubr.f32.gmra.mrb[6].mxu0 %v6383_v2  ;;  %5331 = vmatprep.mubr.f32.mxu1 %v8539_v14  ;;  %v8544_v2 = vld [vmem:[#allocation16_spill] sm:$0xff]  ;;  %v8572_v14 = vld [vmem:[#allocation57_spill] sm:$0xff] }
 0x12e   : > { %5625 = vmatprep.mubr.f32.mxu0 %v6393_v8  ;;  %v8545_v8 = vld [vmem:[#allocation17_spill] sm:$0xff] }
 0x130   : > { %5332 = vmatmul.mubr.f32.gmra.mrb[8].mxu1 %v8540_v18  ;;  %v8574_v18 = vld [vmem:[#allocation60_spill] sm:$0xff] }
 0x131   : > { %5626 = vmatmul.mubr.f32.gmra.mrb[8].mxu0 %v6402_v15  ;;  %5334 = vmatprep.mubr.f32.mxu1 %v8541_v26  ;;  %v8546_v15 = vld [vmem:[#allocation18_spill] sm:$0xff] }
 0x132   : > { %5628 = vmatprep.mubr.f32.mxu0 %v6414_v23  ;;  %v8547_v23 = vld [vmem:[#allocation19_spill] sm:$0xff] }
 0x134   : > { %5335 = vmatmul.mubr.f32.gmra.mrb[10].mxu1 %v8542_v31 }
 0x135   : > { %5629 = vmatmul.mubr.f32.gmra.mrb[10].mxu0 %v6424_v34  ;;  %5337 = vmatprep.mubr.f32.mxu1 %v8543_v45  ;;  %v8548_v34 = vld [vmem:[#allocation20_spill] sm:$0xff] }
 0x136   : > { %5631 = vmatprep.mubr.f32.mxu0 %v6445_v49  ;;  %v8549_v49 = vld [vmem:[#allocation21_spill] sm:$0xff]  ;;  %v8578_v45 = vld [vmem:[#allocation68_spill] sm:$0xff] }
 0x138   : > { %5338 = vmatmul.mubr.f32.gmra.mrb[12].mxu1 %v8544_v2  ;;  %v8580_v2 = vld [vmem:[#allocation72_spill] sm:$0xff] }
 0x139   : > { %5632 = vmatmul.mubr.f32.gmra.mrb[12].mxu0 %v6451_v54  ;;  %5340 = vmatprep.mubr.f32.mxu1 %v8545_v8  ;;  %v8550_v54 = vld [vmem:[#allocation22_spill] sm:$0xff] }
 0x13a   : > { %5634 = vmatprep.mubr.f32.mxu0 %v6478_v4  ;;  %v8551_v4 = vld [vmem:[#allocation23_spill] sm:$0xff] }
 0x13c   : > { %5341 = vmatmul.mubr.f32.gmra.mrb[14].mxu1 %v8546_v15 }
 0x13d   : > { %5635 = vmatmul.mubr.f32.gmra.mrb[14].mxu0 %v6498_v19  ;;  %5343 = vmatprep.mubr.f32.mxu1 %v8547_v23  ;;  %v8552_v19 = vld [vmem:[#allocation24_spill] sm:$0xff]  ;;  %v8585_v23 = vld [vmem:[#allocation79_spill] sm:$0xff] }
 0x13e   : > { %5637 = vmatprep.mubr.f32.mxu0 %v6522_v52  ;;  %v8553_v52 = vld [vmem:[#allocation25_spill] sm:$0xff] }
 0x140   : > { %5344 = vmatmul.mubr.f32.gmra.mrb[16].mxu1 %v8548_v34  ;;  %v8586_v34 = vld [vmem:[#allocation80_spill] sm:$0xff] }
 0x141   : > { %5638 = vmatmul.mubr.f32.gmra.mrb[16].mxu0 %v6527_v57  ;;  %5346 = vmatprep.mubr.f32.mxu1 %v8549_v49  ;;  %v8554_v57 = vld [vmem:[#allocation26_spill] sm:$0xff]  ;;  %v8587_v49 = vld [vmem:[#allocation76_spill] sm:$0xff] }
 0x142   : > { %5640 = vmatprep.mubr.f32.mxu0 %v6550_v6  ;;  %v8555_v6 = vld [vmem:[#allocation27_spill] sm:$0xff] }
 0x144   : > { %5347 = vmatmul.mubr.f32.gmra.mrb[18].mxu1 %v8550_v54  ;;  %v8589_v54 = vld [vmem:[#allocation77_spill] sm:$0xff] }
 0x145   : > { %5641 = vmatmul.mubr.f32.gmra.mrb[18].mxu0 %v6552_v10  ;;  %5349 = vmatprep.mubr.f32.mxu1 %v8551_v4  ;;  %v8556_v10 = vld [vmem:[#allocation28_spill] sm:$0xff] }
 0x146   : > { %5643 = vmatprep.mubr.f32.mxu0 %v6561_v29  ;;  %v8557_v29 = vld [vmem:[#allocation29_spill] sm:$0xff]  ;;  %v8591_v4 = vld [vmem:[#allocation84_spill] sm:$0xff] }
 0x148   : > { %5350 = vmatmul.mubr.f32.gmra.mrb[20].mxu1 %v8552_v19 }
 0x149   : > { %5644 = vmatmul.mubr.f32.gmra.mrb[20].mxu0 %v6576_v32  ;;  %5352 = vmatprep.mubr.f32.mxu1 %v8553_v52  ;;  %v7801_v32 = vpop.permute.xlu0 %536  ;;  %v8593_v52 = vld [vmem:[#allocation82_spill] sm:$0xff] }
 0x14a   : > { %5646 = vmatprep.mubr.f32.mxu0 %v6600_v63  ;;  %v8559_v63 = vld [vmem:[#allocation31_spill] sm:$0xff] }
 0x14c   : > { %5353 = vmatmul.mubr.f32.gmra.mrb[22].mxu1 %v8554_v57  ;;  %v8594_v57 = vld [vmem:[#allocation85_spill] sm:$0xff] }
 0x14d   : > { %5647 = vmatmul.mubr.f32.gmra.mrb[22].mxu0 %v6618_v11  ;;  %5355 = vmatprep.mubr.f32.mxu1 %v8555_v6  ;;  %v7806_v11 = vpop.permute.xlu1 %541 }
 0x14e   : > { %5649 = vmatprep.mubr.f32.mxu0 %v6645_v0  ;;  %v8560_v0 = vld [vmem:[#allocation32_spill] sm:$0xff] }
 0x150   : > { %5356 = vmatmul.mubr.f32.gmra.mrb[24].mxu1 %v8556_v10  ;;  %v8597_v10 = vld [vmem:[#allocation89_spill] sm:$0xff] }
 0x151   : > { %5650 = vmatmul.mubr.f32.gmra.mrb[24].mxu0 %v6662_v46  ;;  %5358 = vmatprep.mubr.f32.mxu1 %v8557_v29  ;;  %v8561_v46 = vld [vmem:[#allocation35_spill] sm:$0xff]  ;;  %v7815_v30 = vpop.permute.xlu1 %551 }
 0x152   : > { %5652 = vmatprep.mubr.f32.mxu0 %v6664_v42  ;;  %v7812_v42 = vpop.permute.xlu0 %546 }
 0x154   : > { %5359 = vmatmul.mubr.f32.gmra.mrb[26].mxu1 %v8558_v28  ;;  %v8599_v28 = vld [vmem:[#allocation91_spill] sm:$0xff] }
 0x155   : > { %5653 = vmatmul.mubr.f32.gmra.mrb[26].mxu0 %v6688_v48  ;;  %5361 = vmatprep.mubr.f32.mxu1 %v8559_v63  ;;  %v8563_v48 = vld [vmem:[#allocation38_spill] sm:$0xff]  ;;  %v8600_v63 = vld [vmem:[#allocation92_spill] sm:$0xff] }
 0x156   : > { %5655 = vmatprep.mubr.f32.mxu0 %v6712_v41  ;;  %v8564_v41 = vld [vmem:[#allocation40_spill] sm:$0xff]  ;;  %v7821_v35 = vpop.permute.xlu0 %556 }
 0x158   : > { %5362 = vmatmul.mubr.f32.gmra.mrb[28].mxu1 %v8560_v0  ;;  %v8602_v0 = vld [vmem:[#allocation94_spill] sm:$0xff] }
 0x159   : > { %5656 = vmatmul.mubr.f32.gmra.mrb[28].mxu0 %v6719_v1  ;;  %5364 = vmatprep.mubr.f32.mxu1 %v8561_v46  ;;  %v8565_v1 = vld [vmem:[#allocation42_spill] sm:$0xff] }
 0x15a   : > { %5658 = vmatprep.mubr.f32.mxu0 %v6748_v58  ;;  %v7826_v58 = vpop.permute.xlu1 %561 }
 0x15c   : > { %5365 = vmatmul.mubr.f32.gmra.mrb[30].mxu1 %v8562_v61  ;;  %v8606_v61 = vld [vmem:[#allocation97_spill] sm:$0xff] }
 0x15d   : > { %5659 = vmatmul.mubr.f32.gmra.mrb[30].mxu0 %v8484_v56  ;;  %5367 = vmatprep.mubr.f32.mxu1 %v8563_v48  ;;  %v8567_v56 = vld [vmem:[#allocation46_spill] sm:$0xff] }
 0x15e   : > { %5661 = vmatprep.mubr.f32.mxu0 %v8485_v60  ;;  %v7832_v60 = vpop.permute.xlu0 %566  ;;  %v7835_v9 = vpop.permute.xlu1 %571 }
 0x160   : > { %5368 = vmatmul.mubr.f32.gmra.mrb[32].mxu1 %v8564_v41 }
 0x161   : > { %5662 = vmatmul.mubr.f32.gmra.mrb[32].mxu0 %v8488_v16  ;;  %5370 = vmatprep.mubr.f32.mxu1 %v8565_v1  ;;  %v8569_v16 = vld [vmem:[#allocation50_spill] sm:$0xff] }
 0x162   : > { %5664 = vmatprep.mubr.f32.mxu0 %v8489_v43  ;;  %v8570_v43 = vld [vmem:[#allocation52_spill] sm:$0xff]  ;;  %v7841_v13 = vpop.permute.xlu0 %576 }
 0x164   : > { %5371 = vmatmul.mubr.f32.gmra.mrb[34].mxu1 %v8566_v3 }
 0x165   : > { %5665 = vmatmul.mubr.f32.gmra.mrb[34].mxu0 %v8490_v53  ;;  %5373 = vmatprep.mubr.f32.mxu1 %v8567_v56  ;;  %v8571_v53 = vld [vmem:[#allocation55_spill] sm:$0xff] }
 0x166   : > { %5667 = vmatprep.mubr.f32.mxu0 %v8492_v27  ;;  %v7846_v27 = vpop.permute.xlu1 %581 }
 0x168   : > { %5374 = vmatmul.mubr.f32.gmra.mrb[36].mxu1 %v8568_v5 }
 0x169   : > { %5668 = vmatmul.mubr.f32.gmra.mrb[36].mxu0 %v8494_v50  ;;  %5376 = vmatprep.mubr.f32.mxu1 %v8569_v16  ;;  %v8573_v50 = vld [vmem:[#allocation58_spill] sm:$0xff] }
 0x16a   : > { %5670 = vmatprep.mubr.f32.mxu0 %v8495_v25  ;;  %v7852_v25 = vpop.permute.xlu0 %586  ;;  %v7855_v26 = vpop.permute.xlu1 %591 }
 0x16c   : > { %5377 = vmatmul.mubr.f32.gmra.mrb[38].mxu1 %v8570_v43 }
 0x16d   : > { %5671 = vmatmul.mubr.f32.gmra.mrb[38].mxu0 %v8498_v38  ;;  %5379 = vmatprep.mubr.f32.mxu1 %v8571_v53  ;;  %v8575_v38 = vld [vmem:[#allocation63_spill] sm:$0xff] }
 0x16e   : > { %5673 = vmatprep.mubr.f32.mxu0 %v8499_v40  ;;  %v8576_v40 = vld [vmem:[#allocation64_spill] sm:$0xff]  ;;  %v7861_v31 = vpop.permute.xlu0 %596 }
 0x170   : > { %5380 = vmatmul.mubr.f32.gmra.mrb[40].mxu1 %v8572_v14 }
 0x171   : > { %5674 = vmatmul.mubr.f32.gmra.mrb[40].mxu0 %v8500_v39  ;;  %5382 = vmatprep.mubr.f32.mxu1 %v8573_v50  ;;  %v8577_v39 = vld [vmem:[#allocation65_spill] sm:$0xff] }
 0x172   : > { %5676 = vmatprep.mubr.f32.mxu0 %v8502_v59  ;;  %v7866_v59 = vpop.permute.xlu1 %601 }
 0x174   : > { %5383 = vmatmul.mubr.f32.gmra.mrb[42].mxu1 %v8574_v18 }
 0x175   : > { %5677 = vmatmul.mubr.f32.gmra.mrb[42].mxu0 %v8504_v37  ;;  %5385 = vmatprep.mubr.f32.mxu1 %v8575_v38  ;;  %v8579_v37 = vld [vmem:[#allocation70_spill] sm:$0xff] }
 0x176   : > { %5679 = vmatprep.mubr.f32.mxu0 %v8505_v7  ;;  %v7872_v7 = vpop.permute.xlu0 %606  ;;  %v7875_v8 = vpop.permute.xlu1 %611 }
 0x178   : > { %5386 = vmatmul.mubr.f32.gmra.mrb[44].mxu1 %v8576_v40 }
 0x179   : > { %5680 = vmatmul.mubr.f32.gmra.mrb[44].mxu0 %v8508_v12  ;;  %5388 = vmatprep.mubr.f32.mxu1 %v8577_v39  ;;  %v8581_v12 = vld [vmem:[#allocation74_spill] sm:$0xff] }
 0x17a   : > { %5682 = vmatprep.mubr.f32.mxu0 %v8509_v24  ;;  %v8582_v24 = vld [vmem:[#allocation78_spill] sm:$0xff]  ;;  %v7881_v15 = vpop.permute.xlu0 %616 }
 0x17b   : > { %8583 = vst [vmem:[#allocation69_spill] sm:$0xff] %v7881_v15 }
 0x17c   : > { %5389 = vmatmul.mubr.f32.gmra.mrb[46].mxu1 %v8578_v45 }
 0x17d   : > { %5683 = vmatmul.mubr.f32.gmra.mrb[46].mxu0 %v8510_v62  ;;  %5391 = vmatprep.mubr.f32.mxu1 %v8579_v37  ;;  %v8584_v62 = vld [vmem:[#allocation73_spill] sm:$0xff] }
 0x17e   : > { %5685 = vmatprep.mubr.f32.mxu0 %v8512_v36  ;;  %v7886_v36 = vpop.permute.xlu1 %621 }
 0x180   : > { %5392 = vmatmul.mubr.f32.gmra.mrb[48].mxu1 %v8580_v2 }
 0x181   : > { %5686 = vmatmul.mubr.f32.gmra.mrb[48].mxu0 %v8514_v55  ;;  %5394 = vmatprep.mubr.f32.mxu1 %v8581_v12  ;;  %v8588_v55 = vld [vmem:[#allocation81_spill] sm:$0xff] }
 0x182   : > { %5688 = vmatprep.mubr.f32.mxu0 %v8515_v44  ;;  %v7892_v44 = vpop.permute.xlu0 %626  ;;  %v7895_v19 = vpop.permute.xlu1 %631 }
 0x183   : > { %8590 = vst [vmem:[#allocation71_spill] sm:$0xff] %v7892_v44  ;;  %8592 = vst [vmem:[#allocation75_spill] sm:$0xff] %v7895_v19  ;;  %v8623_v44 = vld [vmem:[#allocation103_spill] sm:$0xff] }
 0x184   : > { %5395 = vmatmul.mubr.f32.gmra.mrb[50].mxu1 %v8582_v24 }
 0x185   : > { %5689 = vmatmul.mubr.f32.gmra.mrb[50].mxu0 %v8584_v62  ;;  %5397 = vmatprep.mubr.f32.mxu1 %v8585_v23 }
 0x186   : > { %5691 = vmatprep.mubr.f32.mxu0 %v8519_v22  ;;  %v8595_v22 = vld [vmem:[#allocation87_spill] sm:$0xff]  ;;  %v7901_v6 = vpop.permute.xlu0 %636  ;;  %v7906_v29 = vpop.permute.xlu1 %641 }
 0x187   : > { %8596 = vst [vmem:[#allocation83_spill] sm:$0xff] %v7901_v6  ;;  %8598 = vst [vmem:[#allocation86_spill] sm:$0xff] %v7906_v29  ;;  %v8622_v6 = vld [vmem:[#allocation102_spill] sm:$0xff] }
 0x188   : > { %5398 = vmatmul.mubr.f32.gmra.mrb[52].mxu1 %v8586_v34 }
 0x189   : > { %5692 = vmatmul.mubr.f32.gmra.mrb[52].mxu0 %v8587_v49  ;;  %5400 = vmatprep.mubr.f32.mxu1 %v8588_v55 }
 0x18a   : > { %5694 = vmatprep.mubr.f32.mxu0 %v8589_v54  ;;  %v7915_v46 = vpop.permute.xlu1 %651 }
 0x18b   : > { %8603 = vst [vmem:[#allocation90_spill] sm:$0xff] %v7915_v46 }
 0x18c   : > { %5401 = vmatmul.mubr.f32.gmra.mrb[54].mxu1 %v8591_v4 }
 0x18d   : > { %5695 = vmatmul.mubr.f32.gmra.mrb[54].mxu0 %v8593_v52  ;;  %5403 = vmatprep.mubr.f32.mxu1 %v8594_v57 }
 0x18e   : > { %5697 = vmatprep.mubr.f32.mxu0 %v8525_v51  ;;  %v7912_v51 = vpop.permute.xlu0 %646  ;;  %v7924_v41 = vpop.permute.xlu1 %661 }
 0x18f   : > { %8601 = vst [vmem:[#allocation88_spill] sm:$0xff] %v7912_v51  ;;  %8609 = vst [vmem:[#allocation4_spill] sm:$0xff] %v7924_v41  ;;  %v8621_v41 = vld [vmem:[#allocation98_spill] sm:$0xff] }
 0x190   : > { %5404 = vmatmul.mubr.f32.gmra.mrb[56].mxu1 %v8595_v22  ;;  %v8618_v22 = vld [vmem:[#allocation101_spill] sm:$0xff] }
 0x191   : > { %5698 = vmatmul.mubr.f32.gmra.mrb[56].mxu0 %v8528_v33  ;;  %5406 = vmatprep.mubr.f32.mxu1 %v8597_v10  ;;  %v8604_v33 = vld [vmem:[#allocation96_spill] sm:$0xff] }
 0x192   : > { %5700 = vmatprep.mubr.f32.mxu0 %v7251_v17  ;;  %v8605_v17 = vld [vmem:[#allocation93_spill] sm:$0xff]  ;;  %v7921_v48 = vpop.permute.xlu0 %656  ;;  %v7928_v1 = vpop.permute.xlu1 %671 }
 0x193   : > { %8607 = vst [vmem:[#allocation3_spill] sm:$0xff] %v7921_v48  ;;  %8611 = vst [vmem:[#allocation6_spill] sm:$0xff] %v7928_v1 }
 0x194   : > { %5407 = vmatmul.mubr.f32.gmra.mrb[58].mxu1 %v8599_v28 }
 0x195   : > { %5701 = vmatmul.mubr.f32.gmra.mrb[58].mxu0 %v8529_v20  ;;  %5409 = vmatprep.mubr.f32.mxu1 %v8600_v63  ;;  %v8608_v20 = vld [vmem:[#allocation95_spill] sm:$0xff] }
 0x196   : > { %5703 = vmatprep.mubr.f32.mxu0 %v8530_v21  ;;  %v7926_v21 = vpop.permute.xlu0 %666  ;;  %v7932_v56 = vpop.permute.xlu1 %681 }
 0x197   : > { %8610 = vst [vmem:[#allocation5_spill] sm:$0xff] %v7926_v21  ;;  %8613 = vst [vmem:[#allocation8_spill] sm:$0xff] %v7932_v56 }
 0x198   : > { %5410 = vmatmul.mubr.f32.gmra.mrb[60].mxu1 %v8602_v0  ;;  %v8619_v0 = vld [vmem:[#allocation99_spill] sm:$0xff] }
 0x199   : > { %5704 = vmatmul.mubr.f32.gmra.mrb[60].mxu0 %v7307_v47  ;;  %5412 = vmatprep.mubr.f32.mxu1 %v8604_v33 }
 0x19a   : > { %5706 = vmatprep.mubr.f32.mxu0 %v8605_v17  ;;  %v7930_v3 = vpop.permute.xlu0 %676  ;;  %v7936_v5 = vpop.permute.xlu1 %691 }
 0x19b   : > { %8612 = vst [vmem:[#allocation7_spill] sm:$0xff] %v7930_v3  ;;  %8615 = vst [vmem:[#allocation10_spill] sm:$0xff] %v7936_v5  ;;  %v8620_v5 = vld [vmem:[#allocation100_spill] sm:$0xff] }
 0x19c   : > { %5413 = vmatmul.mubr.f32.gmra.mrb[62].mxu1 %v8606_v61 }
 0x19d   : > { %5707 = vmatmul.mubr.f32.gmra.mrb[62].mxu0 %v8608_v20 }
 0x19e   : > { %v7934_v47 = vpop.permute.xlu0 %686  ;;  %v7940_v43 = vpop.permute.xlu1 %701 }
 0x19f   : > { %8614 = vst [vmem:[#allocation9_spill] sm:$0xff] %v7934_v47  ;;  %8617 = vst [vmem:[#allocation12_spill] sm:$0xff] %v7940_v43 }
 0x1a2   : > { %v7938_v16 = vpop.permute.xlu0 %696  ;;  %v4192_v14 = vpop.permute.xlu1 %4191 }
 0x1a3   : > { %8616 = vst [vmem:[#allocation11_spill] sm:$0xff] %v7938_v16 }
 0x1a6   : > { %v4187_v53 = vpop.permute.xlu0 %4186  ;;  %v4202_v18 = vpop.permute.xlu1 %4201 }
 0x1aa   : > { %v4197_v50 = vpop.permute.xlu0 %4196  ;;  %v7944_v40 = vpop.permute.xlu1 %4211 }
 0x1ae   : > { %v7942_v38 = vpop.permute.xlu0 %4206  ;;  %v7948_v45 = vpop.permute.xlu1 %4221 }
 0x1b2   : > { %v7946_v39 = vpop.permute.xlu0 %4216  ;;  %v7952_v2 = vpop.permute.xlu1 %4231 }
 0x1b6   : > { %v7950_v37 = vpop.permute.xlu0 %4226  ;;  %v7956_v24 = vpop.permute.xlu1 %4241 }
 0x1ba   : > { %v7954_v12 = vpop.permute.xlu0 %4236  ;;  %v7960_v23 = vpop.permute.xlu1 %4251 }
 0x1be   : > { %v7958_v62 = vpop.permute.xlu0 %4246  ;;  %v7964_v49 = vpop.permute.xlu1 %4261 }
 0x1c2   : > { %v7962_v34 = vpop.permute.xlu0 %4256  ;;  %v7968_v54 = vpop.permute.xlu1 %4271 }
 0x1c6   : > { %v7966_v55 = vpop.permute.xlu0 %4266  ;;  %v7972_v52 = vpop.permute.xlu1 %4281 }
 0x1ca   : > { %v7970_v4 = vpop.permute.xlu0 %4276  ;;  %v7979_v1 = vpop.permute.xlu1 %4291 }
 0x1ce   : > { %v7976_v20 = vpop.permute.xlu0 %4286 }
 0x1d2   : > { %v7983_v29 = vpop.permute.xlu0 %4296 }
 0x1f3   : > { %v5321_v57 = vpop.f32.mrb[0].mxu1 }
 0x1f4   : > { %v5709_v10 = vadd.f32 %v5321_v57, %v8618_v22  ;;  %v5615_v28 = vpop.f32.mrb[0].mxu0  ;;  %v2131_v63 = vpop.f32.mrb[1].mxu1 }
 0x1f5   : > { %v5711_v33 = vadd.f32 %v2131_v63, %v8619_v0  ;;  %v3674_v17 = vpop.f32.mrb[1].mxu0 }
 0x1f6   : > { %v5710_v61 = vadd.f32 %v5709_v10, %v5615_v28 }
 0x1f7   : > { %v5712_v16 = vadd.f32 %v5711_v33, %v3674_v17  ;;  %v5324_v43 = vpop.f32.mrb[2].mxu1 }
 0x1f8   : > { %v4057_v47 = vmax.f32 %v5710_v61, 0.0  ;;  %v5713_v3 = vadd.f32 %v5324_v43, %v8620_v5  ;;  %v5618_v56 = vpop.f32.mrb[2].mxu0  ;;  %v2145_v21 = vpop.f32.mrb[3].mxu1 }
 0x1f9   : > { %v4056_v48 = vmax.f32 %v5712_v16, 0.0  ;;  %v5715_v57 = vadd.f32 %v2145_v21, %v8621_v41  ;;  %v3686_v22 = vpop.f32.mrb[3].mxu0  ;;  %v7986_v41 = vpop.permute.xlu1 %4301 }
 0x1fa   : > { %v4505_v51 = vmul.f32 %v4192_v14, %v4057_v47  ;;  %v5714_v46 = vadd.f32 %v5713_v3, %v5618_v56  ;;  %v8624_v47 = vld [vmem:[#allocation104_spill] sm:$0xff] }
 0x1fb   : > { %v4504_v63 = vmul.f32 %v4187_v53, %v4056_v48  ;;  %v5716_v0 = vadd.f32 %v5715_v57, %v3686_v22  ;;  %v5327_v10 = vpop.f32.mrb[4].mxu1 }
 0x1fc   : > { %v4059_v28 = vmax.f32 %v5714_v46, 0.0  ;;  %v5717_v33 = vadd.f32 %v5327_v10, %v8622_v6  ;;  %v5621_v17 = vpop.f32.mrb[4].mxu0  ;;  %v2159_v61 = vpop.f32.mrb[5].mxu1  ;;  %v8625_v10 = vld [vmem:[#allocation105_spill] sm:$0xff] }
 0x1fd   : > { %v4568_v5 = vadd.f32 %v4505_v51, %v4504_v63  ;;  %v4058_v43 = vmax.f32 %v5716_v0, 0.0  ;;  %v5719_v19 = vadd.f32 %v2159_v61, %v8623_v44  ;;  %v3698_v16 = vpop.f32.mrb[5].mxu0  ;;  %v7990_v44 = vpop.permute.xlu0 %4306 }
 0x1fe   : > { %v5718_v15 = vadd.f32 %v5717_v33, %v5621_v17  ;;  %v4507_v56 = vmul.f32 %v4202_v18, %v4059_v28  ;;  %v8626_v18 = vld [vmem:[#allocation106_spill] sm:$0xff] }
 0x1ff   : > { %v4506_v21 = vmul.f32 %v4197_v50, %v4058_v43  ;;  %v5720_v3 = vadd.f32 %v5719_v19, %v3698_v16  ;;  %v5330_v48 = vpop.f32.mrb[6].mxu1 }
 0x200   : > { %v5721_v46 = vadd.f32 %v5330_v48, %v8624_v47  ;;  %v5624_v53 = vpop.f32.mrb[6].mxu0  ;;  %v2173_v6 = vpop.f32.mrb[7].mxu1  ;;  %v4061_v57 = vmax.f32 %v5718_v15, 0.0 }
 0x201   : > { %v4569_v14 = vadd.f32 %v4568_v5, %v4506_v21  ;;  %v4060_v22 = vmax.f32 %v5720_v3, 0.0  ;;  %v5723_v51 = vadd.f32 %v2173_v6, %v8625_v10  ;;  %v3710_v63 = vpop.f32.mrb[7].mxu0  ;;  %v7994_v48 = vpop.permute.xlu1 %4311  ;;  %v8627_v3 = vld [vmem:[#allocation107_spill] sm:$0xff]  ;;  %v8628_v10 = vld [vmem:[#allocation108_spill] sm:$0xff] }
 0x202   : > { %v5722_v0 = vadd.f32 %v5721_v46, %v5624_v53  ;;  %v4509_v15 = vmul.f32 %v7944_v40, %v4061_v57 }
 0x203   : > { %v4508_v33 = vmul.f32 %v7942_v38, %v4060_v22  ;;  %v4570_v17 = vadd.f32 %v4569_v14, %v4507_v56  ;;  %v5724_v50 = vadd.f32 %v5723_v51, %v3710_v63  ;;  %v5333_v19 = vpop.f32.mrb[8].mxu1 }
 0x204   : > { %v4063_v61 = vmax.f32 %v5722_v0, 0.0  ;;  %v5725_v28 = vadd.f32 %v5333_v19, %v8626_v18  ;;  %v5627_v43 = vpop.f32.mrb[8].mxu0  ;;  %v2187_v16 = vpop.f32.mrb[9].mxu1 }
 0x205   : > { %v4571_v5 = vadd.f32 %v4570_v17, %v4508_v33  ;;  %v4062_v21 = vmax.f32 %v5724_v50, 0.0  ;;  %v5727_v47 = vadd.f32 %v2187_v16, %v8627_v3  ;;  %v3722_v46 = vpop.f32.mrb[9].mxu0  ;;  %v8001_v19 = vpop.permute.xlu0 %4316  ;;  %v8629_v17 = vld [vmem:[#allocation109_spill] sm:$0xff] }
 0x206   : > { %v5726_v53 = vadd.f32 %v5725_v28, %v5627_v43  ;;  %v4511_v22 = vmul.f32 %v7948_v45, %v4063_v61  ;;  %v8004_v43 = vpop.permute.xlu1 %4321 }
 0x207   : > { %v4510_v38 = vmul.f32 %v7946_v39, %v4062_v21  ;;  %v4572_v56 = vadd.f32 %v4571_v5, %v4509_v15  ;;  %v5728_v6 = vadd.f32 %v5727_v47, %v3722_v46  ;;  %v5336_v14 = vpop.f32.mrb[10].mxu1  ;;  %v8630_v5 = vld [vmem:[#allocation33_spill] sm:$0xff] }
 0x208   : > { %v5729_v51 = vadd.f32 %v5336_v14, %v8628_v10  ;;  %v5630_v63 = vpop.f32.mrb[10].mxu0  ;;  %v2201_v0 = vpop.f32.mrb[11].mxu1  ;;  %v4065_v57 = vmax.f32 %v5726_v53, 0.0 }
 0x209   : > { %v4573_v40 = vadd.f32 %v4572_v56, %v4510_v38  ;;  %v4064_v33 = vmax.f32 %v5728_v6, 0.0  ;;  %v5731_v50 = vadd.f32 %v2201_v0, %v8629_v17  ;;  %v3734_v18 = vpop.f32.mrb[11].mxu0  ;;  %v8631_v56 = vld [vmem:[#allocation34_spill] sm:$0xff] }
 0x20a   : > { %v5730_v28 = vadd.f32 %v5729_v51, %v5630_v63  ;;  %v4513_v46 = vmul.f32 %v7952_v2, %v4065_v57  ;;  %v8010_v51 = vpop.permute.xlu0 %4326  ;;  %v8015_v2 = vpop.permute.xlu1 %4331 }
 0x20b   : > { %v4512_v39 = vmul.f32 %v7950_v37, %v4064_v33  ;;  %v4574_v16 = vadd.f32 %v4573_v40, %v4511_v22  ;;  %v5732_v15 = vadd.f32 %v5731_v50, %v3734_v18  ;;  %v5339_v45 = vpop.f32.mrb[12].mxu1  ;;  %v8632_v33 = vld [vmem:[#allocation37_spill] sm:$0xff] }
 0x20c   : > { %v4067_v61 = vmax.f32 %v5730_v28, 0.0  ;;  %v5733_v21 = vadd.f32 %v5339_v45, %v8630_v5  ;;  %v5633_v3 = vpop.f32.mrb[12].mxu0  ;;  %v2215_v47 = vpop.f32.mrb[13].mxu1 }
 0x20d   : > { %v4575_v53 = vadd.f32 %v4574_v16, %v4512_v39  ;;  %v4066_v38 = vmax.f32 %v5732_v15, 0.0  ;;  %v5735_v6 = vadd.f32 %v2215_v47, %v8631_v56  ;;  %v3746_v14 = vpop.f32.mrb[13].mxu0  ;;  %v8633_v16 = vld [vmem:[#allocation39_spill] sm:$0xff] }
 0x20e   : > { %v5734_v10 = vadd.f32 %v5733_v21, %v5633_v3  ;;  %v4515_v40 = vmul.f32 %v7956_v24, %v4067_v61  ;;  %v8634_v24 = vld [vmem:[#allocation41_spill] sm:$0xff]  ;;  %v8020_v56 = vpop.permute.xlu0 %4336 }
 0x20f   : > { %v4514_v37 = vmul.f32 %v7954_v12, %v4066_v38  ;;  %v4576_v22 = vadd.f32 %v4575_v53, %v4513_v46  ;;  %v5736_v63 = vadd.f32 %v5735_v6, %v3746_v14  ;;  %v5342_v0 = vpop.f32.mrb[14].mxu1 }
 0x210   : > { %v5737_v17 = vadd.f32 %v5342_v0, %v8632_v33  ;;  %v5636_v50 = vpop.f32.mrb[14].mxu0  ;;  %v2229_v18 = vpop.f32.mrb[15].mxu1  ;;  %v4069_v28 = vmax.f32 %v5734_v10, 0.0 }
 0x211   : > { %v4577_v57 = vadd.f32 %v4576_v22, %v4514_v37  ;;  %v4068_v39 = vmax.f32 %v5736_v63, 0.0  ;;  %v5739_v15 = vadd.f32 %v2229_v18, %v8633_v16  ;;  %v3758_v45 = vpop.f32.mrb[15].mxu0  ;;  %v8635_v37 = vld [vmem:[#allocation43_spill] sm:$0xff]  ;;  %v8024_v33 = vpop.permute.xlu1 %4341 }
 0x212   : > { %v5738_v5 = vadd.f32 %v5737_v17, %v5636_v50  ;;  %v4517_v6 = vmul.f32 %v7960_v23, %v4069_v28 }
 0x213   : > { %v4516_v12 = vmul.f32 %v7958_v62, %v4068_v39  ;;  %v4578_v21 = vadd.f32 %v4577_v57, %v4515_v40  ;;  %v5740_v3 = vadd.f32 %v5739_v15, %v3758_v45  ;;  %v5345_v47 = vpop.f32.mrb[16].mxu1  ;;  %v8636_v57 = vld [vmem:[#allocation45_spill] sm:$0xff] }
 0x214   : > { %v4071_v46 = vmax.f32 %v5738_v5, 0.0  ;;  %v5741_v61 = vadd.f32 %v5345_v47, %v8634_v24  ;;  %v5639_v53 = vpop.f32.mrb[16].mxu0  ;;  %v2243_v38 = vpop.f32.mrb[17].mxu1  ;;  %v8637_v5 = vld [vmem:[#allocation47_spill] sm:$0xff] }
 0x215   : > { %v4579_v14 = vadd.f32 %v4578_v21, %v4516_v12  ;;  %v4070_v10 = vmax.f32 %v5740_v3, 0.0  ;;  %v5743_v22 = vadd.f32 %v2243_v38, %v8635_v37  ;;  %v3770_v63 = vpop.f32.mrb[17].mxu0  ;;  %v8030_v47 = vpop.permute.xlu0 %4346 }
 0x216   : > { %v5742_v0 = vadd.f32 %v5741_v61, %v5639_v53  ;;  %v4519_v18 = vmul.f32 %v7964_v49, %v4071_v46  ;;  %v8638_v49 = vld [vmem:[#allocation49_spill] sm:$0xff] }
 0x217   : > { %v4518_v62 = vmul.f32 %v7962_v34, %v4070_v10  ;;  %v4580_v40 = vadd.f32 %v4579_v14, %v4517_v6  ;;  %v5744_v17 = vadd.f32 %v5743_v22, %v3770_v63  ;;  %v5348_v50 = vpop.f32.mrb[18].mxu1  ;;  %v8034_v10 = vpop.permute.xlu1 %4351 }
 0x218   : > { %v5745_v39 = vadd.f32 %v5348_v50, %v8636_v57  ;;  %v5642_v16 = vpop.f32.mrb[18].mxu0  ;;  %v2257_v15 = vpop.f32.mrb[19].mxu1  ;;  %v4073_v28 = vmax.f32 %v5742_v0, 0.0  ;;  %v8639_v0 = vld [vmem:[#allocation51_spill] sm:$0xff] }
 0x219   : > { %v4581_v23 = vadd.f32 %v4580_v40, %v4518_v62  ;;  %v4072_v45 = vmax.f32 %v5744_v17, 0.0  ;;  %v5747_v12 = vadd.f32 %v2257_v15, %v8637_v5  ;;  %v3782_v21 = vpop.f32.mrb[19].mxu0  ;;  %v8041_v5 = vpop.permute.xlu0 %4356 }
 0x21a   : > { %v5746_v3 = vadd.f32 %v5745_v39, %v5642_v16  ;;  %v4521_v37 = vmul.f32 %v7968_v54, %v4073_v28  ;;  %v8640_v16 = vld [vmem:[#allocation53_spill] sm:$0xff] }
 0x21b   : > { %v4520_v34 = vmul.f32 %v7966_v55, %v4072_v45  ;;  %v4582_v24 = vadd.f32 %v4581_v23, %v4519_v18  ;;  %v5748_v61 = vadd.f32 %v5747_v12, %v3782_v21  ;;  %v5351_v53 = vpop.f32.mrb[20].mxu1  ;;  %v8641_v21 = vld [vmem:[#allocation54_spill] sm:$0xff] }
 0x21c   : > { %v4075_v38 = vmax.f32 %v5746_v3, 0.0  ;;  %v5749_v46 = vadd.f32 %v5351_v53, %v8638_v49  ;;  %v5645_v6 = vpop.f32.mrb[20].mxu0  ;;  %v2271_v14 = vpop.f32.mrb[21].mxu1 }
 0x21d   : > { %v4583_v22 = vadd.f32 %v4582_v24, %v4520_v34  ;;  %v4074_v63 = vmax.f32 %v5748_v61, 0.0  ;;  %v5751_v62 = vadd.f32 %v2271_v14, %v8639_v0  ;;  %v3794_v40 = vpop.f32.mrb[21].mxu0  ;;  %v8044_v61 = vpop.permute.xlu1 %4361 }
 0x21e   : > { %v5750_v17 = vadd.f32 %v5749_v46, %v5645_v6  ;;  %v4523_v39 = vmul.f32 %v7972_v52, %v4075_v38  ;;  %v8642_v46 = vld [vmem:[#allocation56_spill] sm:$0xff] }
 0x21f   : > { %v4522_v55 = vmul.f32 %v7970_v4, %v4074_v63  ;;  %v4584_v50 = vadd.f32 %v4583_v22, %v4521_v37  ;;  %v5752_v18 = vadd.f32 %v5751_v62, %v3794_v40  ;;  %v5354_v57 = vpop.f32.mrb[22].mxu1  ;;  %v8643_v62 = vld [vmem:[#allocation59_spill] sm:$0xff] }
 0x220   : > { %v5753_v15 = vadd.f32 %v5354_v57, %v8640_v16  ;;  %v5648_v23 = vpop.f32.mrb[22].mxu0  ;;  %v2285_v45 = vpop.f32.mrb[23].mxu1  ;;  %v4077_v28 = vmax.f32 %v5750_v17, 0.0 }
 0x221   : > { %v4585_v54 = vadd.f32 %v4584_v50, %v4522_v55  ;;  %v4076_v12 = vmax.f32 %v5752_v18, 0.0  ;;  %v5755_v3 = vadd.f32 %v2285_v45, %v8641_v21  ;;  %v3806_v34 = vpop.f32.mrb[23].mxu0  ;;  %v8050_v50 = vpop.permute.xlu0 %4366 }
 0x222   : > { %v5754_v24 = vadd.f32 %v5753_v15, %v5648_v23  ;;  %v4525_v22 = vmul.f32 %v7979_v1, %v4077_v28  ;;  %v8644_v15 = vld [vmem:[#allocation61_spill] sm:$0xff]  ;;  %v8055_v1 = vpop.permute.xlu1 %4371 }
 0x223   : > { %v4524_v4 = vmul.f32 %v7976_v20, %v4076_v12  ;;  %v4586_v53 = vadd.f32 %v4585_v54, %v4523_v39  ;;  %v5756_v49 = vadd.f32 %v5755_v3, %v3806_v34  ;;  %v5357_v52 = vpop.f32.mrb[24].mxu1  ;;  %v8645_v3 = vld [vmem:[#allocation62_spill] sm:$0xff] }
 0x224   : > { %v4079_v38 = vmax.f32 %v5754_v24, 0.0  ;;  %v5757_v6 = vadd.f32 %v5357_v52, %v8642_v46  ;;  %v5651_v14 = vpop.f32.mrb[24].mxu0  ;;  %v2299_v37 = vpop.f32.mrb[25].mxu1 }
 0x225   : > { %v4587_v63 = vadd.f32 %v4586_v53, %v4524_v4  ;;  %v4078_v0 = vmax.f32 %v5756_v49, 0.0  ;;  %v5759_v40 = vadd.f32 %v2299_v37, %v8643_v62  ;;  %v3818_v17 = vpop.f32.mrb[25].mxu0  ;;  %v8060_v37 = vpop.permute.xlu0 %4376  ;;  %v8647_v62 = vld [vmem:[#allocation67_spill] sm:$0xff] }
 0x226   : > { %v5758_v55 = vadd.f32 %v5757_v6, %v5651_v14  ;;  %v4527_v16 = vmul.f32 %v7986_v41, %v4079_v38  ;;  %v8646_v41 = vld [vmem:[#allocation66_spill] sm:$0xff] }
 0x227   : > { %v4526_v20 = vmul.f32 %v7983_v29, %v4078_v0  ;;  %v4588_v18 = vadd.f32 %v4587_v63, %v4525_v22  ;;  %v5760_v57 = vadd.f32 %v5759_v40, %v3818_v17  ;;  %v5360_v39 = vpop.f32.mrb[26].mxu1 }
 0x228   : > { %v5761_v23 = vadd.f32 %v5360_v39, %v8644_v15  ;;  %v5654_v45 = vpop.f32.mrb[26].mxu0  ;;  %v2313_v54 = vpop.f32.mrb[27].mxu1  ;;  %v4081_v12 = vmax.f32 %v5758_v55, 0.0 }
 0x229   : > { %v4589_v28 = vadd.f32 %v4588_v18, %v4526_v20  ;;  %v4080_v21 = vmax.f32 %v5760_v57, 0.0  ;;  %v5763_v34 = vadd.f32 %v2313_v54, %v8645_v3  ;;  %v3830_v24 = vpop.f32.mrb[27].mxu0  ;;  %v8064_v20 = vpop.permute.xlu1 %4381 }
 0x22a   : > { %v5762_v4 = vadd.f32 %v5761_v23, %v5654_v45  ;;  %v4529_v22 = vmul.f32 %v7994_v48, %v4081_v12 }
 0x22b   : > { %v4528_v29 = vmul.f32 %v7990_v44, %v4080_v21  ;;  %v4590_v53 = vadd.f32 %v4589_v28, %v4527_v16  ;;  %v5764_v49 = vadd.f32 %v5763_v34, %v3830_v24  ;;  %v5363_v52 = vpop.f32.mrb[28].mxu1  ;;  %v8070_v34 = vpop.permute.xlu0 %4386 }
 0x22c   : > { %v4083_v46 = vmax.f32 %v5762_v4, 0.0  ;;  %v5765_v38 = vadd.f32 %v5363_v52, %v8646_v41  ;;  %v5657_v6 = vpop.f32.mrb[28].mxu0  ;;  %v2327_v14 = vpop.f32.mrb[29].mxu1 }
 0x22d   : > { %v4591_v63 = vadd.f32 %v4590_v53, %v4528_v29  ;;  %v4082_v0 = vmax.f32 %v5764_v49, 0.0  ;;  %v5767_v40 = vadd.f32 %v2327_v14, %v8647_v62  ;;  %v3842_v17 = vpop.f32.mrb[29].mxu0  ;;  %v8074_v52 = vpop.permute.xlu1 %4391 }
 0x22e   : > { %v5766_v55 = vadd.f32 %v5765_v38, %v5657_v6  ;;  %v4531_v16 = vmul.f32 %v8004_v43, %v4083_v46 }
 0x22f   : > { %v4530_v44 = vmul.f32 %v8001_v19, %v4082_v0  ;;  %v4592_v18 = vadd.f32 %v4591_v63, %v4529_v22  ;;  %v5768_v57 = vadd.f32 %v5767_v40, %v3842_v17  ;;  %v5366_v39 = vpop.f32.mrb[30].mxu1 }
 0x230   : > { %v5769_v15 = vadd.f32 %v5366_v39, %v7806_v11  ;;  %v5660_v23 = vpop.f32.mrb[30].mxu0  ;;  %v2341_v45 = vpop.f32.mrb[31].mxu1  ;;  %v4085_v54 = vmax.f32 %v5766_v55, 0.0 }
 0x231   : > { %v4593_v48 = vadd.f32 %v4592_v18, %v4530_v44  ;;  %v4084_v28 = vmax.f32 %v5768_v57, 0.0  ;;  %v5771_v12 = vadd.f32 %v2341_v45, %v7801_v32  ;;  %v3854_v21 = vpop.f32.mrb[31].mxu0  ;;  %v8081_v55 = vpop.permute.xlu0 %4396 }
 0x232   : > { %v5770_v3 = vadd.f32 %v5769_v15, %v5660_v23  ;;  %v4533_v46 = vmul.f32 %v8015_v2, %v4085_v54 }
 0x233   : > { %v4532_v19 = vmul.f32 %v8010_v51, %v4084_v28  ;;  %v4594_v24 = vadd.f32 %v4593_v48, %v4531_v16  ;;  %v5772_v4 = vadd.f32 %v5771_v12, %v3854_v21  ;;  %v5369_v29 = vpop.f32.mrb[32].mxu1  ;;  %v8084_v16 = vpop.permute.xlu1 %4401 }
 0x234   : > { %v4087_v53 = vmax.f32 %v5770_v3, 0.0  ;;  %v5773_v43 = vadd.f32 %v5369_v29, %v7815_v30  ;;  %v5663_v11 = vpop.f32.mrb[32].mxu0  ;;  %v2355_v49 = vpop.f32.mrb[33].mxu1 }
 0x235   : > { %v4595_v41 = vadd.f32 %v4594_v24, %v4532_v19  ;;  %v4086_v32 = vmax.f32 %v5772_v4, 0.0  ;;  %v5775_v38 = vadd.f32 %v2355_v49, %v7812_v42  ;;  %v3866_v6 = vpop.f32.mrb[33].mxu0  ;;  %v8090_v24 = vpop.permute.xlu0 %4406 }
 0x236   : > { %v5774_v14 = vadd.f32 %v5773_v43, %v5663_v11  ;;  %v4535_v62 = vmul.f32 %v8024_v33, %v4087_v53 }
 0x237   : > { %v4534_v51 = vmul.f32 %v8020_v56, %v4086_v32  ;;  %v4596_v22 = vadd.f32 %v4595_v41, %v4533_v46  ;;  %v5776_v63 = vadd.f32 %v5775_v38, %v3866_v6  ;;  %v5372_v0 = vpop.f32.mrb[34].mxu1 }
 0x238   : > { %v5777_v30 = vadd.f32 %v5372_v0, %v7826_v58  ;;  %v5666_v40 = vpop.f32.mrb[34].mxu0  ;;  %v2369_v17 = vpop.f32.mrb[35].mxu1  ;;  %v4089_v44 = vmax.f32 %v5774_v14, 0.0 }
 0x239   : > { %v4597_v2 = vadd.f32 %v4596_v22, %v4534_v51  ;;  %v4088_v18 = vmax.f32 %v5776_v63, 0.0  ;;  %v5779_v42 = vadd.f32 %v2369_v17, %v7821_v35  ;;  %v3878_v57 = vpop.f32.mrb[35].mxu0 }
 0x23a   : > { %v5778_v39 = vadd.f32 %v5777_v30, %v5666_v40  ;;  %v4537_v28 = vmul.f32 %v8034_v10, %v4089_v44  ;;  %v8095_v10 = vpop.permute.xlu1 %4411 }
 0x23b   : > { %v4536_v56 = vmul.f32 %v8030_v47, %v4088_v18  ;;  %v4598_v15 = vadd.f32 %v4597_v2, %v4535_v62  ;;  %v5780_v23 = vadd.f32 %v5779_v42, %v3878_v57  ;;  %v5375_v33 = vpop.f32.mrb[36].mxu1  ;;  %v8100_v62 = vpop.permute.xlu0 %4416 }
 0x23c   : > { %v4091_v45 = vmax.f32 %v5778_v39, 0.0  ;;  %v5781_v58 = vadd.f32 %v5375_v33, %v7835_v9  ;;  %v5669_v48 = vpop.f32.mrb[36].mxu0  ;;  %v2383_v54 = vpop.f32.mrb[37].mxu1 }
 0x23d   : > { %v4599_v12 = vadd.f32 %v4598_v15, %v4536_v56  ;;  %v4090_v21 = vmax.f32 %v5780_v23, 0.0  ;;  %v5783_v35 = vadd.f32 %v2383_v54, %v7832_v60  ;;  %v3890_v3 = vpop.f32.mrb[37].mxu0 }
 0x23e   : > { %v5782_v19 = vadd.f32 %v5781_v58, %v5669_v48  ;;  %v4539_v43 = vmul.f32 %v8044_v61, %v4091_v45  ;;  %v8104_v18 = vpop.permute.xlu1 %4421 }
 0x23f   : > { %v4538_v47 = vmul.f32 %v8041_v5, %v4090_v21  ;;  %v4600_v4 = vadd.f32 %v4599_v12, %v4537_v28  ;;  %v5784_v29 = vadd.f32 %v5783_v35, %v3890_v3  ;;  %v5378_v53 = vpop.f32.mrb[38].mxu1  ;;  %v4427_v54 = vpop.permute.xlu0 %4426 }
 0x240   : > { %v5785_v9 = vadd.f32 %v5378_v53, %v7846_v27  ;;  %v5672_v11 = vpop.f32.mrb[38].mxu0  ;;  %v2397_v49 = vpop.f32.mrb[39].mxu1  ;;  %v4093_v41 = vmax.f32 %v5782_v19, 0.0 }
 0x241   : > { %v4601_v46 = vadd.f32 %v4600_v4, %v4538_v47  ;;  %v4092_v60 = vmax.f32 %v5784_v29, 0.0  ;;  %v5787_v32 = vadd.f32 %v2397_v49, %v7841_v13  ;;  %v3902_v38 = vpop.f32.mrb[39].mxu0 }
 0x242   : > { %v5786_v6 = vadd.f32 %v5785_v9, %v5672_v11  ;;  %v4541_v30 = vmul.f32 %v8055_v1, %v4093_v41  ;;  %v4432_v19 = vpop.permute.xlu1 %4431 }
 0x243   : > { %v4540_v5 = vmul.f32 %v8050_v50, %v4092_v60  ;;  %v4602_v14 = vadd.f32 %v4601_v46, %v4539_v43  ;;  %v5788_v51 = vadd.f32 %v5787_v32, %v3902_v38  ;;  %v5381_v22 = vpop.f32.mrb[40].mxu1  ;;  %v4437_v32 = vpop.permute.xlu0 %4436 }
 0x244   : > { %v4095_v63 = vmax.f32 %v5786_v6, 0.0  ;;  %v5789_v61 = vadd.f32 %v5381_v22, %v7855_v26  ;;  %v5675_v27 = vpop.f32.mrb[40].mxu0  ;;  %v2411_v0 = vpop.f32.mrb[41].mxu1 }
 0x245   : > { %v4603_v40 = vadd.f32 %v4602_v14, %v4540_v5  ;;  %v4094_v17 = vmax.f32 %v5788_v51, 0.0  ;;  %v5791_v13 = vadd.f32 %v2411_v0, %v7852_v25  ;;  %v3914_v2 = vpop.f32.mrb[41].mxu0  ;;  %v8648_v5 = vld [vmem:[#allocation69_spill] sm:$0xff] }
 0x246   : > { %v5790_v44 = vadd.f32 %v5789_v61, %v5675_v27  ;;  %v4543_v26 = vmul.f32 %v8064_v20, %v4095_v63  ;;  %v4442_v22 = vpop.permute.xlu1 %4441 }
 0x247   : > { %v4542_v50 = vmul.f32 %v8060_v37, %v4094_v17  ;;  %v4604_v42 = vadd.f32 %v4603_v40, %v4541_v30  ;;  %v5792_v57 = vadd.f32 %v5791_v13, %v3914_v2  ;;  %v5384_v39 = vpop.f32.mrb[42].mxu1 }
 0x248   : > { %v5793_v56 = vadd.f32 %v5384_v39, %v7866_v59  ;;  %v5678_v15 = vpop.f32.mrb[42].mxu0  ;;  %v2425_v23 = vpop.f32.mrb[43].mxu1  ;;  %v4097_v33 = vmax.f32 %v5790_v44, 0.0  ;;  %v8650_v44 = vld [vmem:[#allocation71_spill] sm:$0xff] }
 0x249   : > { %v4605_v1 = vadd.f32 %v4604_v42, %v4542_v50  ;;  %v4096_v45 = vmax.f32 %v5792_v57, 0.0  ;;  %v5795_v25 = vadd.f32 %v2425_v23, %v7861_v31  ;;  %v3926_v58 = vpop.f32.mrb[43].mxu0  ;;  %v4447_v39 = vpop.permute.xlu0 %4446 }
 0x24a   : > { %v5794_v48 = vadd.f32 %v5793_v56, %v5678_v15  ;;  %v4545_v47 = vmul.f32 %v8074_v52, %v4097_v33 }
 0x24b   : > { %v4544_v28 = vmul.f32 %v8070_v34, %v4096_v45  ;;  %v4606_v37 = vadd.f32 %v4605_v1, %v4543_v26  ;;  %v5796_v12 = vadd.f32 %v5795_v25, %v3926_v58  ;;  %v5387_v21 = vpop.f32.mrb[44].mxu1  ;;  %v8651_v1 = vld [vmem:[#allocation86_spill] sm:$0xff]  ;;  %v4452_v58 = vpop.permute.xlu1 %4451 }
 0x24c   : > { %v4099_v35 = vmax.f32 %v5794_v48, 0.0  ;;  %v5797_v20 = vadd.f32 %v5387_v21, %v7875_v8  ;;  %v5681_v3 = vpop.f32.mrb[44].mxu0  ;;  %v2439_v59 = vpop.f32.mrb[45].mxu1 }
 0x24d   : > { %v4607_v4 = vadd.f32 %v4606_v37, %v4544_v28  ;;  %v4098_v29 = vmax.f32 %v5796_v12, 0.0  ;;  %v5799_v31 = vadd.f32 %v2439_v59, %v7872_v7  ;;  %v3938_v53 = vpop.f32.mrb[45].mxu0  ;;  %v8652_v37 = vld [vmem:[#allocation83_spill] sm:$0xff] }
 0x24e   : > { %v5798_v43 = vadd.f32 %v5797_v20, %v5681_v3  ;;  %v4547_v46 = vmul.f32 %v8084_v16, %v4099_v35  ;;  %v8649_v16 = vld [vmem:[#allocation75_spill] sm:$0xff] }
 0x24f   : > { %v4546_v9 = vmul.f32 %v8081_v55, %v4098_v29  ;;  %v4608_v34 = vadd.f32 %v4607_v4, %v4545_v47  ;;  %v5800_v11 = vadd.f32 %v5799_v31, %v3938_v53  ;;  %v5390_v49 = vpop.f32.mrb[46].mxu1  ;;  %v8653_v4 = vld [vmem:[#allocation90_spill] sm:$0xff]  ;;  %v4457_v53 = vpop.permute.xlu0 %4456 }
 0x250   : > { %v5801_v8 = vadd.f32 %v5390_v49, %v7886_v36  ;;  %v5684_v41 = vpop.f32.mrb[46].mxu0  ;;  %v2453_v60 = vpop.f32.mrb[47].mxu1  ;;  %v4101_v52 = vmax.f32 %v5798_v43, 0.0 }
 0x251   : > { %v4609_v38 = vadd.f32 %v4608_v34, %v4546_v9  ;;  %v4100_v6 = vmax.f32 %v5800_v11, 0.0  ;;  %v5803_v14 = vadd.f32 %v2453_v60, %v8648_v5  ;;  %v3950_v7 = vpop.f32.mrb[47].mxu0  ;;  %v8654_v11 = vld [vmem:[#allocation88_spill] sm:$0xff] }
 0x252   : > { %v5802_v51 = vadd.f32 %v5801_v8, %v5684_v41  ;;  %v4549_v17 = vmul.f32 %v8095_v10, %v4101_v52  ;;  %v4462_v41 = vpop.permute.xlu1 %4461  ;;  %v8655_v5 = vld [vmem:[#allocation4_spill] sm:$0xff] }
 0x253   : > { %v4548_v55 = vmul.f32 %v8090_v24, %v4100_v6  ;;  %v4610_v63 = vadd.f32 %v4609_v38, %v4547_v46  ;;  %v5804_v61 = vadd.f32 %v5803_v14, %v3950_v7  ;;  %v5393_v27 = vpop.f32.mrb[48].mxu1 }
 0x254   : > { %v4103_v0 = vmax.f32 %v5802_v51, 0.0  ;;  %v5805_v30 = vadd.f32 %v5393_v27, %v8649_v16  ;;  %v5687_v36 = vpop.f32.mrb[48].mxu0  ;;  %v2467_v40 = vpop.f32.mrb[49].mxu1 }
 0x255   : > { %v4611_v13 = vadd.f32 %v4610_v63, %v4548_v55  ;;  %v4102_v2 = vmax.f32 %v5804_v61, 0.0  ;;  %v5807_v50 = vadd.f32 %v2467_v40, %v8650_v44  ;;  %v3962_v42 = vpop.f32.mrb[49].mxu0 }
 0x256   : > { %v5806_v57 = vadd.f32 %v5805_v30, %v5687_v36  ;;  %v4551_v23 = vmul.f32 %v8104_v18, %v4103_v0  ;;  %v4467_v30 = vpop.permute.xlu0 %4466 }
 0x257   : > { %v4550_v26 = vmul.f32 %v8100_v62, %v4102_v2  ;;  %v4612_v24 = vadd.f32 %v4611_v13, %v4549_v17  ;;  %v5808_v56 = vadd.f32 %v5807_v50, %v3962_v42  ;;  %v5396_v15 = vpop.f32.mrb[50].mxu1  ;;  %v8657_v2 = vld [vmem:[#allocation6_spill] sm:$0xff]  ;;  %v4472_v42 = vpop.permute.xlu1 %4471 }
 0x258   : > { %v5809_v33 = vadd.f32 %v5396_v15, %v8651_v1  ;;  %v5690_v45 = vpop.f32.mrb[50].mxu0  ;;  %v2481_v25 = vpop.f32.mrb[51].mxu1  ;;  %v4105_v48 = vmax.f32 %v5806_v57, 0.0 }
 0x259   : > { %v4613_v10 = vadd.f32 %v4612_v24, %v4550_v26  ;;  %v4104_v28 = vmax.f32 %v5808_v56, 0.0  ;;  %v5811_v12 = vadd.f32 %v2481_v25, %v8652_v37  ;;  %v3974_v21 = vpop.f32.mrb[51].mxu0  ;;  %v8658_v56 = vld [vmem:[#allocation5_spill] sm:$0xff] }
 0x25a   : > { %v5810_v35 = vadd.f32 %v5809_v33, %v5690_v45  ;;  %v4553_v43 = vmul.f32 %v4432_v19, %v4105_v48  ;;  %v8656_v19 = vld [vmem:[#allocation3_spill] sm:$0xff]  ;;  %v8659_v48 = vld [vmem:[#allocation8_spill] sm:$0xff] }
 0x25b   : > { %v4552_v20 = vmul.f32 %v4427_v54, %v4104_v28  ;;  %v4614_v3 = vadd.f32 %v4613_v10, %v4551_v23  ;;  %v5812_v62 = vadd.f32 %v5811_v12, %v3974_v21  ;;  %v5399_v59 = vpop.f32.mrb[52].mxu1  ;;  %v4477_v21 = vpop.permute.xlu0 %4476 }
 0x25c   : > { %v4107_v47 = vmax.f32 %v5810_v35, 0.0  ;;  %v5813_v29 = vadd.f32 %v5399_v59, %v8653_v4  ;;  %v5693_v18 = vpop.f32.mrb[52].mxu0  ;;  %v2495_v31 = vpop.f32.mrb[53].mxu1 }
 0x25d   : > { %v4615_v9 = vadd.f32 %v4614_v3, %v4552_v20  ;;  %v4106_v34 = vmax.f32 %v5812_v62, 0.0  ;;  %v5815_v49 = vadd.f32 %v2495_v31, %v8654_v11  ;;  %v3986_v46 = vpop.f32.mrb[53].mxu0  ;;  %v4482_v4 = vpop.permute.xlu1 %4481 }
 0x25e   : > { %v5814_v8 = vadd.f32 %v5813_v29, %v5693_v18  ;;  %v4555_v6 = vmul.f32 %v4442_v22, %v4107_v47 }
 0x25f   : > { %v4554_v60 = vmul.f32 %v4437_v32, %v4106_v34  ;;  %v4616_v38 = vadd.f32 %v4615_v9, %v4553_v43  ;;  %v5816_v54 = vadd.f32 %v5815_v49, %v3986_v46  ;;  %v5402_v52 = vpop.f32.mrb[54].mxu1  ;;  %v8661_v9 = vld [vmem:[#allocation10_spill] sm:$0xff] }
 0x260   : > { %v5817_v14 = vadd.f32 %v5402_v52, %v8655_v5  ;;  %v5696_v7 = vpop.f32.mrb[54].mxu0  ;;  %v2509_v51 = vpop.f32.mrb[55].mxu1  ;;  %v4109_v63 = vmax.f32 %v5814_v8, 0.0 }
 0x261   : > { %v4617_v55 = vadd.f32 %v4616_v38, %v4554_v60  ;;  %v4108_v61 = vmax.f32 %v5816_v54, 0.0  ;;  %v5819_v27 = vadd.f32 %v2509_v51, %v8656_v19  ;;  %v3998_v0 = vpop.f32.mrb[55].mxu0  ;;  %v8662_v60 = vld [vmem:[#allocation9_spill] sm:$0xff] }
 0x262   : > { %v5818_v16 = vadd.f32 %v5817_v14, %v5696_v7  ;;  %v4557_v57 = vmul.f32 %v4452_v58, %v4109_v63  ;;  %v8660_v58 = vld [vmem:[#allocation7_spill] sm:$0xff]  ;;  %v8663_v63 = vld [vmem:[#allocation12_spill] sm:$0xff] }
 0x263   : > { %v4556_v36 = vmul.f32 %v4447_v39, %v4108_v61  ;;  %v4618_v40 = vadd.f32 %v4617_v55, %v4555_v6  ;;  %v5820_v17 = vadd.f32 %v5819_v27, %v3998_v0  ;;  %v5405_v32 = vpop.f32.mrb[56].mxu1  ;;  %v4487_v6 = vpop.permute.xlu0 %4486 }
 0x264   : > { %v4111_v13 = vmax.f32 %v5818_v16, 0.0  ;;  %v5821_v44 = vadd.f32 %v5405_v32, %v8657_v2  ;;  %v5699_v22 = vpop.f32.mrb[56].mxu0  ;;  %v2523_v50 = vpop.f32.mrb[57].mxu1 }
 0x265   : > { %v4619_v26 = vadd.f32 %v4618_v40, %v4556_v36  ;;  %v4110_v24 = vmax.f32 %v5820_v17, 0.0  ;;  %v5823_v15 = vadd.f32 %v2523_v50, %v8658_v56  ;;  %v4010_v23 = vpop.f32.mrb[57].mxu0  ;;  %v8664_v36 = vld [vmem:[#allocation11_spill] sm:$0xff]  ;;  %v4492_v32 = vpop.permute.xlu1 %4491 }
 0x266   : > { %v5822_v1 = vadd.f32 %v5821_v44, %v5699_v22  ;;  %v4559_v10 = vmul.f32 %v4462_v41, %v4111_v13 }
 0x267   : > { %v4558_v33 = vmul.f32 %v4457_v53, %v4110_v24  ;;  %v4620_v45 = vadd.f32 %v4619_v26, %v4557_v57  ;;  %v5824_v25 = vadd.f32 %v5823_v15, %v4010_v23  ;;  %v5408_v39 = vpop.f32.mrb[58].mxu1  ;;  %v4497_v24 = vpop.permute.xlu0 %4496 }
 0x268   : > { %v5825_v28 = vadd.f32 %v5408_v39, %v8659_v48  ;;  %v5702_v37 = vpop.f32.mrb[58].mxu0  ;;  %v2537_v12 = vpop.f32.mrb[59].mxu1  ;;  %v4113_v20 = vmax.f32 %v5822_v1, 0.0 }
 0x269   : > { %v4621_v35 = vadd.f32 %v4620_v45, %v4558_v33  ;;  %v4112_v3 = vmax.f32 %v5824_v25, 0.0  ;;  %v5827_v62 = vadd.f32 %v2537_v12, %v8660_v58  ;;  %v4022_v59 = vpop.f32.mrb[59].mxu0  ;;  %v4502_v23 = vpop.permute.xlu1 %4501 }
 0x26a   : > { %v5826_v47 = vadd.f32 %v5825_v28, %v5702_v37  ;;  %v4561_v46 = vmul.f32 %v4472_v42, %v4113_v20  ;;  %v4638_v37 = vstv %s4637_s10 }
 0x26b   : > { %v4560_v29 = vmul.f32 %v4467_v30, %v4112_v3  ;;  %v4622_v18 = vadd.f32 %v4621_v35, %v4559_v10  ;;  %v5828_v31 = vadd.f32 %v5827_v62, %v4022_v59  ;;  %v5411_v53 = vpop.f32.mrb[60].mxu1 }
 0x26c   : > { %v4115_v43 = vmax.f32 %v5826_v47, 0.0  ;;  %v5829_v34 = vadd.f32 %v5411_v53, %v8661_v9  ;;  %v5705_v11 = vpop.f32.mrb[60].mxu0  ;;  %v2551_v49 = vpop.f32.mrb[61].mxu1 }
 0x26d   : > { %v4623_v8 = vadd.f32 %v4622_v18, %v4560_v29  ;;  %v4114_v41 = vmax.f32 %v5828_v31, 0.0  ;;  %v5831_v38 = vadd.f32 %v2551_v49, %v8662_v60  ;;  %v4034_v54 = vpop.f32.mrb[61].mxu0 }
 0x26e   : > { %v5830_v52 = vadd.f32 %v5829_v34, %v5705_v11  ;;  %v4563_v55 = vmul.f32 %v4482_v4, %v4115_v43 }
 0x26f   : > { %v4562_v5 = vmul.f32 %v4477_v21, %v4114_v41  ;;  %v4624_v14 = vadd.f32 %v4623_v8, %v4561_v46  ;;  %v5832_v7 = vadd.f32 %v5831_v38, %v4034_v54  ;;  %v5414_v51 = vpop.f32.mrb[62].mxu1 }
 0x270   : > { %v5833_v61 = vadd.f32 %v5414_v51, %v8663_v63  ;;  %v5708_v19 = vpop.f32.mrb[62].mxu0  ;;  %v2565_v27 = vpop.f32.mrb[63].mxu1  ;;  %v4117_v16 = vmax.f32 %v5830_v52, 0.0 }
 0x271   : > { %v4625_v0 = vadd.f32 %v4624_v14, %v4562_v5  ;;  %v4116_v30 = vmax.f32 %v5832_v7, 0.0  ;;  %v5835_v40 = vadd.f32 %v2565_v27, %v8664_v36  ;;  %v4046_v17 = vpop.f32.mrb[63].mxu0 }
 0x272   : > { %v5834_v13 = vadd.f32 %v5833_v61, %v5708_v19  ;;  %v4565_v50 = vmul.f32 %v4492_v32, %v4117_v16 }
 0x273   : > { %v4564_v2 = vmul.f32 %v4487_v6, %v4116_v30  ;;  %v4626_v44 = vadd.f32 %v4625_v0, %v4563_v55  ;;  %v5836_v22 = vadd.f32 %v5835_v40, %v4046_v17 }
 0x274   : > { %v4119_v57 = vmax.f32 %v5834_v13, 0.0 }
 0x275   : > { %v4627_v42 = vadd.f32 %v4626_v44, %v4564_v2  ;;  %v4118_v26 = vmax.f32 %v5836_v22, 0.0 }
 0x276   : > { %v4567_v1 = vmul.f32 %v4502_v23, %v4119_v57 }
 0x277   : > { %v4566_v56 = vmul.f32 %v4497_v24, %v4118_v26  ;;  %v4628_v15 = vadd.f32 %v4627_v42, %v4565_v50 }
 0x279   : > { %v4629_v33 = vadd.f32 %v4628_v15, %v4566_v56 }
 0x27b   : > { %v4630_v45 = vadd.f32 %v4629_v33, %v4567_v1 }
 0x27d   : > { %v4631_v25 = vrot.slane %v4630_v45, 4 }
 0x27f   : > { %v4632_v39 = vadd.f32 %v4631_v25, %v4630_v45 }
 0x281   : > { %v4633_v10 = vrot.slane %v4632_v39, 2 }
 0x283   : > { %v4634_v48 = vadd.f32 %v4633_v10, %v4632_v39 }
 0x285   : > { %v4635_v28 = vrot.slane %v4634_v48, 1 }
 0x287   : > { %v4636_v12 = vadd.f32 %v4635_v28, %v4634_v48 }
 0x289   : > { %v4639_v21 = vadd.f32 %v4638_v37, %v4636_v12 }
 0x28b   : > { %4640 = vst [vmem:[%s254_s13] sm:$0x1] %v4639_v21 }
 0x28c PF: > { %s16_s24 = sadd.s32 1, %s6174_s24   ;;  %s8665_s20 = smov %s6166_s22 }
 0x28d   : > { %p13_p7 = scmp.ge.s32.totalorder %s16_s24, 6   ;;  %s8666_s21 = smov %s6170_s23 }
 0x28e   : > { %s8667_s22 = smov %s8670_s4  ;;  %s8668_s23 = smov %s8674_s25 }
 0x28f   :  { %15 = sbr.rel (!%p13_p7) target bundleno = 3 (0x3), region = 70 }

</bundles_post_ra>
